<compile_context>
chip_gen: v6e
topology: v6e:2x2x1
jax: 0.10.0
libtpu: 0.0.40
codegen_flags: <defaults>
</compile_context>

<pallas_src>
import numpy as np
import jax
import jax.numpy as jnp
from jax import lax
from jax.experimental import pallas as pl
from jax.experimental.pallas import tpu as pltpu

# Canonical edge types (src, relation, dst), reordered so that (a) all edge
# types with the same destination are consecutive (resident-output mean/sum
# accumulation) and (b) consecutive edge types share a source ntype where
# possible (resident source-feature block).  'organize' has no incoming edge
# types, so it does not appear as a destination at all.
ORDERED_ETYPES = (
    # dst = company  (7 edge types, reference takes the MEAN)
    ('company', 'business', 'company'),
    ('company', 'competition', 'company'),
    ('company', 'invest', 'company'),
    ('company', 'member', 'company'),
    ('company', 'shareholder', 'company'),
    ('organize', 'invest', 'company'),
    ('brand', 'business_event', 'company'),
    # dst = brand    (4 edge types, reference takes the SUM)
    ('brand', 'competition', 'brand'),
    ('brand', 'member', 'brand'),
    ('organize', 'invest', 'brand'),
    ('company', 'business_event', 'brand'),
)

SRC_SLAB = {'company': 0, 'brand': 1, 'organize': 2}   # feature / src-info slabs
DST_SLAB = {'company': 0, 'brand': 1}                  # aggregation output slabs
N_COMPANY_DST = sum(1 for et in ORDERED_ETYPES if et[2] == 'company')   # == 7


def _round_up(x, m):
    return ((x + m - 1) // m) * m


def _pad_rows(x, n_pad):
    return jnp.pad(x, ((0, n_pad - x.shape[0]), (0, 0)))


def _pick_tile(n_pad, cap=512):
    """Largest multiple of 128 that divides n_pad and is <= cap."""
    t = min(n_pad, cap)
    while n_pad % t:
        t -= 128
    return t


# ---------------------------------------------------------------------------
# Kernel 1: Hadamard_product_layer + CosineSimilarity + fused argmax / probmax
#   a  = W_mean * x          (heads pre-averaged: mean_i(W_i*x) == mean(W)*x)
#   b* = W_mean * feat_mean  (broadcast)
#   cos = <a,b> / max(||a||*||b||, 1e-8)
# Transposed layout: features on sublanes, nodes on lanes.  Four lane-dense
# (1, TN) outputs: t, f, pred_label, pred_prob_max.
# ---------------------------------------------------------------------------
def _hadamard_cos_kernel(xT_ref, wT_ref, tm_ref, fm_ref,
                         t_ref, f_ref, lab_ref, pm_ref):
    x = xT_ref[...]                          # (D, TN) f32
    w = wT_ref[...]                          # (D, TN)
    a = w * x
    bt = w * tm_ref[...]                     # (D, 1) broadcast over lanes
    bf = w * fm_ref[...]
    eps2 = jnp.float32(1e-16)                # == (1e-8)**2 cosine eps
    na2 = jnp.sum(a * a, axis=0, keepdims=True)          # (1, TN)
    nbt2 = jnp.sum(bt * bt, axis=0, keepdims=True)
    nbf2 = jnp.sum(bf * bf, axis=0, keepdims=True)
    dt = jnp.sum(a * bt, axis=0, keepdims=True)
    df = jnp.sum(a * bf, axis=0, keepdims=True)
    t = dt * lax.rsqrt(jnp.maximum(na2 * nbt2, eps2))     # EUP rsqrt
    f = df * lax.rsqrt(jnp.maximum(na2 * nbf2, eps2))
    t_ref[...] = t
    f_ref[...] = f
    # class order is [t, f]; ties -> class 0 (matches torch.argmax first-max)
    lab_ref[...] = (f > t).astype(jnp.float32)
    pm_ref[...] = jnp.maximum(t, f)


def hadamard_cosine(xT_packed, wT_packed, tmean_col, fmean_col, tn):
    k, d, n_pad = xT_packed.shape
    out_sds = jax.ShapeDtypeStruct((k, 1, n_pad), jnp.float32)
    row_spec = pl.BlockSpec((None, 1, tn), lambda j, n: (j, 0, n))
    return pl.pallas_call(
        _hadamard_cos_kernel,
        grid=(k, n_pad // tn),
        out_shape=(out_sds, out_sds, out_sds, out_sds),
        in_specs=[pl.BlockSpec((None, d, tn), lambda j, n: (j, 0, n)),
                  pl.BlockSpec((None, d, tn), lambda j, n: (j, 0, n)),
                  pl.BlockSpec((d, 1), lambda j, n: (0, 0)),
                  pl.BlockSpec((d, 1), lambda j, n: (0, 0))],
        out_specs=[row_spec, row_spec, row_spec, row_spec],
        compiler_params=pltpu.CompilerParams(
            dimension_semantics=("parallel", "parallel")),
    )(xT_packed, wT_packed, tmean_col, fmean_col)


# ---------------------------------------------------------------------------
# Kernel 2: fused per-edge-type masked mean aggregation + cross-edge-type
#           mean/sum accumulation, tiled over (dst blocks, edge types, src
#           blocks).  grid = (NB, E, NK), dims = (parallel, arbitrary, arbitrary)
#   edge mask d[u,v] = (pred_label_src[u] == pred_label_dst[v])
#                      & (max(pred_prob_dst[v]) > 0.3)   for company-touching
#                      edge types, else all-ones            (cal_sam_neigh)
#   h_dst = mean_{u : A[u,v] & d[u,v]} feat_src[u]          (copy_u + mean)
#   nodes with no selected in-edges get 0 (matching DGL send_and_recv)
# The feature block is (TK, D+128) bf16 with a ones column at index D, so the
# selected in-degree pops out of the same matmul (exact f32 accumulation).
# ---------------------------------------------------------------------------
def fused_neighbor_aggregate(meta, adjT_packed, feat_aug, srclab, dstlab,
                             dstpm, d, n_pad, tb, tk):
    e_cnt = adjT_packed.shape[0]
    daug = feat_aug.shape[-1]                # D + 128
    nb = n_pad // tb
    nk = n_pad // tk
    inv_comp = np.float32(1.0 / N_COMPANY_DST)

    def kernel(meta_ref, adjT_ref, feat_ref, slab_ref, dlab_ref, dpm_ref,
               out_ref, acc_ref):
        e = pl.program_id(1)
        k = pl.program_id(2)
        nk_ = pl.num_programs(2)
        use_mask = meta_ref[e, 2]            # 1 iff cal_sam_neigh mask applies
        is_first = meta_ref[e, 3]            # 1 iff first edge type of dst group

        @pl.when(jnp.logical_and(k == 0, is_first == 1))
        def _():                              # first touch of this output block
            out_ref[...] = jnp.zeros_like(out_ref)

        @pl.when(k == 0)
        def _():                              # fresh msum/deg for this edge type
            acc_ref[...] = jnp.zeros_like(acc_ref)

        # Specialized matmul paths: eq mask math only when the edge type needs
        # it.  adjT and the labels are bf16 (0/1 exact); keep f32 on v5e.
        @pl.when(use_mask == 1)
        def _():
            eq = dlab_ref[...] == slab_ref[...]            # (TB,1)==(1,TK)
            adjT = adjT_ref[...]
            adjm = jnp.where(eq, adjT, jnp.zeros_like(adjT))
            acc_ref[...] += jnp.dot(adjm, feat_ref[...],
                                    preferred_element_type=jnp.float32)

        @pl.when(use_mask == 0)
        def _():
            acc_ref[...] += jnp.dot(adjT_ref[...], feat_ref[...],
                                    preferred_element_type=jnp.float32)

        @pl.when(k == nk_ - 1)
        def _():                              # finalize this edge type
            acc = acc_ref[...]                # (TB, D+128)
            msum = acc[:, :d]
            deg = acc[:, d:d + 1]             # exact integer in-degree (f32 acc)
            over = (dpm_ref[...].astype(jnp.float32) > jnp.float32(0.3)
                    ).astype(jnp.float32)
            ov = jnp.where(use_mask == 1, over, jnp.ones_like(over))
            sc = jnp.where(meta_ref[e, 1] == 0, inv_comp, jnp.float32(1.0))
            rowscale = ov * (sc / jnp.maximum(deg, 1.0))   # (TB,1), exact mean
            out_ref[...] += msum * rowscale

    grid_spec = pltpu.PrefetchScalarGridSpec(
        num_scalar_prefetch=1,
        grid=(nb, e_cnt, nk),
        in_specs=[
            pl.BlockSpec((None, tb, tk), lambda i, e, k, m: (e, i, k)),
            pl.BlockSpec((None, tk, daug), lambda i, e, k, m: (m[e, 0], k, 0)),
            pl.BlockSpec((None, 1, tk), lambda i, e, k, m: (m[e, 0], 0, k)),
            pl.BlockSpec((None, tb, 1), lambda i, e, k, m: (m[e, 1], i, 0)),
            pl.BlockSpec((None, tb, 1), lambda i, e, k, m: (m[e, 1], i, 0)),
        ],
        out_specs=pl.BlockSpec((None, tb, d), lambda i, e, k, m: (m[e, 1], i, 0)),
        scratch_shapes=[pltpu.VMEM((tb, daug), jnp.float32)],
    )
    return pl.pallas_call(
        kernel,
        grid_spec=grid_spec,
        out_shape=jax.ShapeDtypeStruct((2, n_pad, d), jnp.float32),
        compiler_params=pltpu.CompilerParams(
            dimension_semantics=("parallel", "arbitrary", "arbitrary")),
    )(meta, adjT_packed, feat_aug, srclab, dstlab, dstpm)


# ---------------------------------------------------------------------------
# Kernel 3: fused Linear + activation over the three ntypes, tiled over nodes.
#   out = relu(feat @ W1 + h @ W2 + b)
#   company: W1 = W_company[:D], W2 = W_company[D:]  (== concat([feat, h]) @ W)
#   brand:   W1 = W2 = W_brand                        (== (feat + h) @ W)
#   organize: no incoming edge types -> h term skipped entirely (flag==0)
# ---------------------------------------------------------------------------
def dual_linear_act(k3meta, feat_bf, agg, w1, w2, b, tm):
    k, n_pad, d = feat_bf.shape
    dout = w1.shape[-1]

    def kernel(m_ref, x_ref, h_ref, w1_ref, w2_ref, b_ref, o_ref):
        j = pl.program_id(0)
        y = jnp.dot(x_ref[...], w1_ref[...],
                    preferred_element_type=jnp.float32) + b_ref[...]
        # TODO(synk): `activation` is a constructor argument of semantic_layer;
        # ReLU is assumed and fused here.

        @pl.when(m_ref[j, 1] == 1)
        def _():
            y2 = y + jnp.dot(h_ref[...].astype(jnp.bfloat16), w2_ref[...],
                             preferred_element_type=jnp.float32)
            o_ref[...] = jnp.maximum(y2, 0.0)

        @pl.when(m_ref[j, 1] == 0)
        def _():
            o_ref[...] = jnp.maximum(y, 0.0)

    grid_spec = pltpu.PrefetchScalarGridSpec(
        num_scalar_prefetch=1,
        grid=(k, n_pad // tm),
        in_specs=[
            pl.BlockSpec((None, tm, d), lambda j, n, m: (j, n, 0)),
            pl.BlockSpec((None, tm, d), lambda j, n, m: (m[j, 0], n, 0)),
            pl.BlockSpec((None, d, dout), lambda j, n, m: (j, 0, 0)),
            pl.BlockSpec((None, d, dout), lambda j, n, m: (j, 0, 0)),
            pl.BlockSpec((None, 1, dout), lambda j, n, m: (j, 0, 0)),
        ],
        out_specs=pl.BlockSpec((None, tm, dout), lambda j, n, m: (j, n, 0)),
    )
    return pl.pallas_call(
        kernel,
        grid_spec=grid_spec,
        out_shape=jax.ShapeDtypeStruct((k, n_pad, dout), jnp.float32),
        compiler_params=pltpu.CompilerParams(
            dimension_semantics=("parallel", "parallel")),
    )(k3meta, feat_bf, agg, w1, w2, b)


# ---------------------------------------------------------------------------
# static per-edge-type schedule (int table via scalar prefetch -> SMEM)
# columns: [src_slab, dst_slab, use_mask, is_first_of_dst_group]
# ---------------------------------------------------------------------------
def build_edge_schedule():
    rows, prev_dst = [], None
    for et in ORDERED_ETYPES:
        src, _, dst = et
        use_mask = int(src == 'company' or dst == 'company')
        is_first = int(dst != prev_dst)
        prev_dst = dst
        rows.append([SRC_SLAB[src], DST_SLAB[dst], use_mask, is_first])
    return jnp.asarray(np.array(rows, dtype=np.int32))


# ---------------------------------------------------------------------------
# packed transposed adjacencies (dst x src), bf16, built ONCE outside the
# jitted forward (perf review: re-materializing 11*NP^2 per call is HBM-bound).
# v5e note: int8 storage + one in-kernel cast would quarter the stream there.
# ---------------------------------------------------------------------------
def pack_adjacency(graph, sizes, n_pad):
    slabs = []
    for et in ORDERED_ETYPES:
        src, _, dst = et
        a_t = jnp.asarray(graph[et]).T.astype(jnp.bfloat16)      # (Ndst, Nsrc)
        slabs.append(jnp.pad(a_t, ((0, n_pad - sizes[dst]),
                                   (0, n_pad - sizes[src]))))
    return jnp.stack(slabs)                                      # (E, NP, NP)


# ---------------------------------------------------------------------------
# semantic_layer.forward
# ---------------------------------------------------------------------------
def semantic_layer_forward(params, adjT_packed, sem_feat, y_company):
    feat_c, feat_b, feat_o = (sem_feat['company'], sem_feat['brand'],
                              sem_feat['organize'])
    nc, d = feat_c.shape
    nb, no = feat_b.shape[0], feat_o.shape[0]
    n_pad = _round_up(max(nc, nb, no), 128)
    assert adjT_packed.shape == (len(ORDERED_ETYPES), n_pad, n_pad)

    # packed per-ntype slabs (company=0, brand=1, organize=2)
    # TODO(synk): the reference never assigns g.nodes['organize'].data['feat'];
    # sem_feat['organize'] is assumed to be the organize source feature.
    feat_packed = jnp.stack([_pad_rows(feat_c, n_pad), _pad_rows(feat_b, n_pad),
                             _pad_rows(feat_o, n_pad)])           # (3, NP, D) f32
    w_mean = jnp.mean(params['hadamard'], axis=0)                 # head average
    w_packed = jnp.stack([_pad_rows(w_mean[:nc], n_pad),
                          _pad_rows(w_mean[nc:nc + nb], n_pad),
                          _pad_rows(w_mean[nc + nb:], n_pad)])
    xT_packed = jnp.swapaxes(feat_packed, 1, 2)                   # (3, D, NP)
    wT_packed = jnp.swapaxes(w_packed, 1, 2)

    # masked means over bankrupt (y==1) / healthy (y==0) companies
    tmask = (y_company == 1).astype(jnp.float32)[:, None]
    fmask = (y_company == 0).astype(jnp.float32)[:, None]
    tmean = jnp.sum(feat_c * tmask, axis=0) / jnp.maximum(jnp.sum(tmask), 1.0)
    fmean = jnp.sum(feat_c * fmask, axis=0) / jnp.maximum(jnp.sum(fmask), 1.0)

    # ---- kernel 1: cosine sims + pred_label + pred_prob_max (lane-dense) ----
    tn = _pick_tile(n_pad)
    t_row, f_row, lab_row, pm_row = hadamard_cosine(
        xT_packed, wT_packed, tmean[:, None], fmean[:, None], tn)   # (3,1,NP) each

    # pseudo CrossEntropy on the company slice (tiny scalar reduction, plain JAX)
    logits = jnp.stack([t_row[0, 0, :nc], f_row[0, 0, :nc]], axis=1)   # [t, f]
    logz = jax.nn.logsumexp(logits, axis=1)
    picked = jnp.take_along_axis(logits, y_company[:, None].astype(jnp.int32),
                                 axis=1)[:, 0]
    pseudo_loss = jnp.mean(logz - picked)

    # bf16 feature slabs; augmented src block has a ones column at index D so
    # the selected in-degree pops out of the aggregation matmul.
    feat_bf = feat_packed.astype(jnp.bfloat16)                     # (3, NP, D)
    ones_col = jnp.ones((3, n_pad, 1), jnp.bfloat16)
    zero_fill = jnp.zeros((3, n_pad, 127), jnp.bfloat16)
    feat_aug = jnp.concatenate([feat_bf, ones_col, zero_fill], axis=2)  # (3,NP,D+128)

    # pre-sliced src/dst views of the kernel-1 info (no lane-sparse slicing in-kernel)
    srclab = lab_row.astype(jnp.bfloat16)                          # (3, 1, NP)
    dstlab = jnp.swapaxes(lab_row, 1, 2).astype(jnp.bfloat16)      # (3, NP, 1)
    dstpm = jnp.swapaxes(pm_row, 1, 2)                             # (3, NP, 1) f32

    # ---- kernel 2: one fused aggregation over all 11 edge types ----
    meta = build_edge_schedule()
    tb = tk = _pick_tile(n_pad)
    agg_packed = fused_neighbor_aggregate(meta, adjT_packed, feat_aug, srclab,
                                          dstlab, dstpm, d, n_pad, tb, tk)
    # agg_packed: (2, NP, D) -> slab 0 = company MEAN over 7 etypes,
    #                           slab 1 = brand SUM over 4 etypes
    # TODO(synk): the cross-edge-type company MEAN is hard-coded as 1/7 (all 7
    # canonical dst=company edge types exist in the graph, as in the reference).

    # ---- kernel 3: fused Linear + activation per ntype ----
    wc = params['w_company'].astype(jnp.bfloat16)                  # (2D, OUT)
    wb = params['w_brand'].astype(jnp.bfloat16)
    wo = params['w_organize'].astype(jnp.bfloat16)
    w1 = jnp.stack([wc[:d], wb, wo])
    w2 = jnp.stack([wc[d:], wb, wo])
    bp = jnp.stack([params['b_company'], params['b_brand'], params['b_organize']])
    # k3meta columns: [agg slab to read, use_h flag]; organize skips the h matmul
    k3meta = jnp.asarray(np.array([[0, 1], [1, 1], [0, 0]], dtype=np.int32))
    tm_ = _pick_tile(n_pad)
    out_packed = dual_linear_act(k3meta, feat_bf, agg_packed, w1, w2, bp, tm_)

    return {'company': out_packed[0, :nc],
            'brand': out_packed[1, :nb],
            'organize': out_packed[2, :no],
            'pseudo_loss': pseudo_loss}


# ---------------------------------------------------------------------------
if __name__ == "__main__":
    NC, NB, NO = 24, 12, 10        # company / brand / organize node counts
    D, OUT, NUM_HEAD = 128, 128, 2
    N_TOTAL = NC + NB + NO
    sizes = {'company': NC, 'brand': NB, 'organize': NO}
    n_pad = _round_up(max(NC, NB, NO), 128)

    key = jax.random.PRNGKey(0)
    keys = jax.random.split(key, 8 + len(ORDERED_ETYPES))

    sem_feat = {
        'company': jax.random.normal(keys[0], (NC, D), jnp.float32),
        'brand': jax.random.normal(keys[1], (NB, D), jnp.float32),
        'organize': jax.random.normal(keys[2], (NO, D), jnp.float32),
    }
    # deterministic company labels: half bankrupt (1), half healthy (0)
    y_company = (jnp.arange(NC) % 2).astype(jnp.int32)

    # synthetic dense adjacencies per canonical edge type (src x dst)
    graph = {}
    for i, et in enumerate(ORDERED_ETYPES):
        src, _, dst = et
        graph[et] = jax.random.bernoulli(
            keys[8 + i], 0.4, (sizes[src], sizes[dst])).astype(jnp.float32)

    # packed bf16 (dst x src) adjacency, built once outside the jitted forward
    adjT_packed = pack_adjacency(graph, sizes, n_pad)

    params = {
        'hadamard': jax.random.normal(keys[3], (NUM_HEAD, N_TOTAL, D), jnp.float32),
        'w_company': jax.random.normal(keys[4], (2 * D, OUT), jnp.float32) * 0.1,
        'b_company': jnp.zeros((1, OUT), jnp.float32),
        'w_brand': jax.random.normal(keys[5], (D, OUT), jnp.float32) * 0.1,
        'b_brand': jnp.zeros((1, OUT), jnp.float32),
        'w_organize': jax.random.normal(keys[6], (D, OUT), jnp.float32) * 0.1,
        'b_organize': jnp.zeros((1, OUT), jnp.float32),
    }

    fwd = jax.jit(semantic_layer_forward)
    out = fwd(params, adjT_packed, sem_feat, y_company)
    jax.block_until_ready(out)
    assert out['company'].shape == (NC, OUT)
    assert out['brand'].shape == (NB, OUT)
    assert out['organize'].shape == (NO, OUT)
    assert out['pseudo_loss'].shape == ()
    assert bool(jnp.all(jnp.isfinite(out['company'])))
    assert bool(jnp.all(jnp.isfinite(out['brand'])))
    assert bool(jnp.all(jnp.isfinite(out['organize'])))
    assert bool(jnp.isfinite(out['pseudo_loss']))
    print("KERNEL_OK")
</pallas_src>

<mosaic_0001>
module attributes {stable_mosaic.version = 11 : i64} {
  func.func @_hadamard_cos_kernel(%arg0: i32, %arg1: i32, %arg2: memref<1x128x128xf32, #tpu.memory_space<vmem>>, %arg3: memref<1x128x128xf32, #tpu.memory_space<vmem>>, %arg4: memref<128x1xf32, #tpu.memory_space<vmem>>, %arg5: memref<128x1xf32, #tpu.memory_space<vmem>>, %arg6: memref<1x1x128xf32, #tpu.memory_space<vmem>>, %arg7: memref<1x1x128xf32, #tpu.memory_space<vmem>>, %arg8: memref<1x1x128xf32, #tpu.memory_space<vmem>>, %arg9: memref<1x1x128xf32, #tpu.memory_space<vmem>>) attributes {dimension_semantics = [#tpu.dimension_semantics<parallel>, #tpu.dimension_semantics<parallel>], iteration_bounds = array<i64: 3, 1>, scalar_prefetch = 0 : i64, scratch_operands = 0 : i64, tpu.core_type = #tpu.core_type<tc>, window_params = [{transform_indices = @transform_0, window_bounds = array<i64: 1, 128, 128>}, {transform_indices = @transform_1, window_bounds = array<i64: 1, 128, 128>}, {pipeline_mode = #tpu.pipeline_mode<synchronous>, transform_indices = @transform_2, window_bounds = array<i64: 128, 1>}, {pipeline_mode = #tpu.pipeline_mode<synchronous>, transform_indices = @transform_3, window_bounds = array<i64: 128, 1>}, {transform_indices = @transform_4, window_bounds = array<i64: 1, 1, 128>}, {transform_indices = @transform_5, window_bounds = array<i64: 1, 1, 128>}, {transform_indices = @transform_6, window_bounds = array<i64: 1, 1, 128>}, {transform_indices = @transform_7, window_bounds = array<i64: 1, 1, 128>}]} {
    %c0 = arith.constant 0 : index
    %c0_0 = arith.constant 0 : index
    %c0_1 = arith.constant 0 : index
    %0 = vector.load %arg2[%c0, %c0_0, %c0_1] : memref<1x128x128xf32, #tpu.memory_space<vmem>>, vector<1x128x128xf32>
    %1 = vector.shape_cast %0 : vector<1x128x128xf32> to vector<128x128xf32>
    %c0_2 = arith.constant 0 : index
    %c0_3 = arith.constant 0 : index
    %c0_4 = arith.constant 0 : index
    %2 = vector.load %arg3[%c0_2, %c0_3, %c0_4] : memref<1x128x128xf32, #tpu.memory_space<vmem>>, vector<1x128x128xf32>
    %3 = vector.shape_cast %2 : vector<1x128x128xf32> to vector<128x128xf32>
    %4 = arith.mulf %3, %1 : vector<128x128xf32>
    %c0_5 = arith.constant 0 : index
    %c0_6 = arith.constant 0 : index
    %5 = vector.load %arg4[%c0_5, %c0_6] : memref<128x1xf32, #tpu.memory_space<vmem>>, vector<128x1xf32>
    %6 = vector.broadcast %5 : vector<128x1xf32> to vector<128x128xf32>
    %7 = arith.mulf %3, %6 : vector<128x128xf32>
    %c0_7 = arith.constant 0 : index
    %c0_8 = arith.constant 0 : index
    %8 = vector.load %arg5[%c0_7, %c0_8] : memref<128x1xf32, #tpu.memory_space<vmem>>, vector<128x1xf32>
    %9 = vector.broadcast %8 : vector<128x1xf32> to vector<128x128xf32>
    %10 = arith.mulf %3, %9 : vector<128x128xf32>
    %11 = arith.mulf %4, %4 : vector<128x128xf32>
    %cst = arith.constant dense<0.000000e+00> : vector<128xf32>
    %12 = vector.multi_reduction <add>, %11, %cst [0] : vector<128x128xf32> to vector<128xf32>
    %13 = vector.shape_cast %12 : vector<128xf32> to vector<1x128xf32>
    %14 = arith.mulf %7, %7 : vector<128x128xf32>
    %cst_9 = arith.constant dense<0.000000e+00> : vector<128xf32>
    %15 = vector.multi_reduction <add>, %14, %cst_9 [0] : vector<128x128xf32> to vector<128xf32>
    %16 = vector.shape_cast %15 : vector<128xf32> to vector<1x128xf32>
    %17 = arith.mulf %10, %10 : vector<128x128xf32>
    %cst_10 = arith.constant dense<0.000000e+00> : vector<128xf32>
    %18 = vector.multi_reduction <add>, %17, %cst_10 [0] : vector<128x128xf32> to vector<128xf32>
    %19 = vector.shape_cast %18 : vector<128xf32> to vector<1x128xf32>
    %20 = arith.mulf %4, %7 : vector<128x128xf32>
    %cst_11 = arith.constant dense<0.000000e+00> : vector<128xf32>
    %21 = vector.multi_reduction <add>, %20, %cst_11 [0] : vector<128x128xf32> to vector<128xf32>
    %22 = vector.shape_cast %21 : vector<128xf32> to vector<1x128xf32>
    %23 = arith.mulf %4, %10 : vector<128x128xf32>
    %cst_12 = arith.constant dense<0.000000e+00> : vector<128xf32>
    %24 = vector.multi_reduction <add>, %23, %cst_12 [0] : vector<128x128xf32> to vector<128xf32>
    %25 = vector.shape_cast %24 : vector<128xf32> to vector<1x128xf32>
    %26 = arith.mulf %13, %16 : vector<1x128xf32>
    %cst_13 = arith.constant 1.000000e-16 : f32
    %27 = vector.broadcast %cst_13 : f32 to vector<1x128xf32>
    %28 = arith.maximumf %26, %27 : vector<1x128xf32>
    %29 = math.rsqrt %28 : vector<1x128xf32>
    %30 = arith.mulf %22, %29 : vector<1x128xf32>
    %31 = arith.mulf %13, %19 : vector<1x128xf32>
    %cst_14 = arith.constant 1.000000e-16 : f32
    %32 = vector.broadcast %cst_14 : f32 to vector<1x128xf32>
    %33 = arith.maximumf %31, %32 : vector<1x128xf32>
    %34 = math.rsqrt %33 : vector<1x128xf32>
    %35 = arith.mulf %25, %34 : vector<1x128xf32>
    %c0_15 = arith.constant 0 : index
    %c0_16 = arith.constant 0 : index
    %c0_17 = arith.constant 0 : index
    %36 = vector.load %arg6[%c0_15, %c0_16, %c0_17] : memref<1x1x128xf32, #tpu.memory_space<vmem>>, vector<1x1x128xf32>
    %37 = vector.shape_cast %36 : vector<1x1x128xf32> to vector<1x128xf32>
    %38 = vector.shape_cast %30 : vector<1x128xf32> to vector<1x1x128xf32>
    tpu.vector_store %arg6[%c0_15, %c0_16, %c0_17], %38 {strides = array<i32>} : memref<1x1x128xf32, #tpu.memory_space<vmem>>, vector<1x1x128xf32>,
    %c0_18 = arith.constant 0 : index
    %c0_19 = arith.constant 0 : index
    %c0_20 = arith.constant 0 : index
    %39 = vector.load %arg7[%c0_18, %c0_19, %c0_20] : memref<1x1x128xf32, #tpu.memory_space<vmem>>, vector<1x1x128xf32>
    %40 = vector.shape_cast %39 : vector<1x1x128xf32> to vector<1x128xf32>
    %41 = vector.shape_cast %35 : vector<1x128xf32> to vector<1x1x128xf32>
    tpu.vector_store %arg7[%c0_18, %c0_19, %c0_20], %41 {strides = array<i32>} : memref<1x1x128xf32, #tpu.memory_space<vmem>>, vector<1x1x128xf32>,
    %42 = arith.cmpf ogt, %35, %30 : vector<1x128xf32>
    %43 = arith.extui %42 : vector<1x128xi1> to vector<1x128xi32>
    %44 = arith.sitofp %43 : vector<1x128xi32> to vector<1x128xf32>
    %c0_21 = arith.constant 0 : index
    %c0_22 = arith.constant 0 : index
    %c0_23 = arith.constant 0 : index
    %45 = vector.load %arg8[%c0_21, %c0_22, %c0_23] : memref<1x1x128xf32, #tpu.memory_space<vmem>>, vector<1x1x128xf32>
    %46 = vector.shape_cast %45 : vector<1x1x128xf32> to vector<1x128xf32>
    %47 = vector.shape_cast %44 : vector<1x128xf32> to vector<1x1x128xf32>
    tpu.vector_store %arg8[%c0_21, %c0_22, %c0_23], %47 {strides = array<i32>} : memref<1x1x128xf32, #tpu.memory_space<vmem>>, vector<1x1x128xf32>,
    %48 = arith.maximumf %30, %35 : vector<1x128xf32>
    %c0_24 = arith.constant 0 : index
    %c0_25 = arith.constant 0 : index
    %c0_26 = arith.constant 0 : index
    %49 = vector.load %arg9[%c0_24, %c0_25, %c0_26] : memref<1x1x128xf32, #tpu.memory_space<vmem>>, vector<1x1x128xf32>
    %50 = vector.shape_cast %49 : vector<1x1x128xf32> to vector<1x128xf32>
    %51 = vector.shape_cast %48 : vector<1x128xf32> to vector<1x1x128xf32>
    tpu.vector_store %arg9[%c0_24, %c0_25, %c0_26], %51 {strides = array<i32>} : memref<1x1x128xf32, #tpu.memory_space<vmem>>, vector<1x1x128xf32>,
    return
  }
  func.func @transform_0(%arg0: i32, %arg1: i32) -> (i32, i32, i32) {
    %c0_i32 = arith.constant 0 : i32
    %c0_i32_0 = arith.constant 0 : i32
    return %arg0, %c0_i32, %arg1 : i32, i32, i32
  }
  func.func @transform_1(%arg0: i32, %arg1: i32) -> (i32, i32, i32) {
    %c0_i32 = arith.constant 0 : i32
    %c0_i32_0 = arith.constant 0 : i32
    return %arg0, %c0_i32, %arg1 : i32, i32, i32
  }
  func.func @transform_2(%arg0: i32, %arg1: i32) -> (i32, i32) {
    %c0_i32 = arith.constant 0 : i32
    %c0_i32_0 = arith.constant 0 : i32
    %c0_i32_1 = arith.constant 0 : i32
    return %c0_i32, %c0_i32_0 : i32, i32
  }
  func.func @transform_3(%arg0: i32, %arg1: i32) -> (i32, i32) {
    %c0_i32 = arith.constant 0 : i32
    %c0_i32_0 = arith.constant 0 : i32
    %c0_i32_1 = arith.constant 0 : i32
    return %c0_i32, %c0_i32_0 : i32, i32
  }
  func.func @transform_4(%arg0: i32, %arg1: i32) -> (i32, i32, i32) {
    %c0_i32 = arith.constant 0 : i32
    %c0_i32_0 = arith.constant 0 : i32
    return %arg0, %c0_i32, %arg1 : i32, i32, i32
  }
  func.func @transform_5(%arg0: i32, %arg1: i32) -> (i32, i32, i32) {
    %c0_i32 = arith.constant 0 : i32
    %c0_i32_0 = arith.constant 0 : i32
    return %arg0, %c0_i32, %arg1 : i32, i32, i32
  }
  func.func @transform_6(%arg0: i32, %arg1: i32) -> (i32, i32, i32) {
    %c0_i32 = arith.constant 0 : i32
    %c0_i32_0 = arith.constant 0 : i32
    return %arg0, %c0_i32, %arg1 : i32, i32, i32
  }
  func.func @transform_7(%arg0: i32, %arg1: i32) -> (i32, i32, i32) {
    %c0_i32 = arith.constant 0 : i32
    %c0_i32_0 = arith.constant 0 : i32
    return %arg0, %c0_i32, %arg1 : i32, i32, i32
  }
}

module attributes {stable_mosaic.version = 11 : i64} {
  func.func @kernel(%arg0: i32, %arg1: i32, %arg2: i32, %arg3: memref<11x4xi32, #tpu.memory_space<smem>>, %arg4: memref<1x128x128xbf16, #tpu.memory_space<vmem>>, %arg5: memref<1x128x256xbf16, #tpu.memory_space<vmem>>, %arg6: memref<1x1x128xbf16, #tpu.memory_space<vmem>>, %arg7: memref<1x128x1xbf16, #tpu.memory_space<vmem>>, %arg8: memref<1x128x1xf32, #tpu.memory_space<vmem>>, %arg9: memref<1x128x128xf32, #tpu.memory_space<vmem>>, %arg10: memref<128x256xf32, #tpu.memory_space<vmem>>) attributes {dimension_semantics = [#tpu.dimension_semantics<parallel>, #tpu.dimension_semantics<arbitrary>, #tpu.dimension_semantics<arbitrary>], iteration_bounds = array<i64: 1, 11, 1>, scalar_prefetch = 1 : i64, scratch_operands = 1 : i64, tpu.core_type = #tpu.core_type<tc>, window_params = [{transform_indices = @transform_0, window_bounds = array<i64: 1, 128, 128>}, {transform_indices = @transform_1, window_bounds = array<i64: 1, 128, 256>}, {transform_indices = @transform_2, window_bounds = array<i64: 1, 1, 128>}, {transform_indices = @transform_3, window_bounds = array<i64: 1, 128, 1>}, {transform_indices = @transform_4, window_bounds = array<i64: 1, 128, 1>}, {transform_indices = @transform_5, window_bounds = array<i64: 1, 128, 128>}]} {
    %0 = arith.index_cast %arg1 : i32 to index
    %c2 = arith.constant 2 : index
    %1 = memref.load %arg3[%0, %c2] : memref<11x4xi32, #tpu.memory_space<smem>>
    %2 = arith.index_cast %arg1 : i32 to index
    %c3 = arith.constant 3 : index
    %3 = memref.load %arg3[%2, %c3] : memref<11x4xi32, #tpu.memory_space<smem>>
    %c0_i32 = arith.constant 0 : i32
    %4 = arith.cmpi eq, %arg2, %c0_i32 : i32
    %c1_i32 = arith.constant 1 : i32
    %5 = arith.cmpi eq, %3, %c1_i32 : i32
    %6 = arith.andi %4, %5 : i1
    %7 = arith.extui %6 : i1 to i32
    %c0_i32_0 = arith.constant 0 : i32
    %8 = arith.cmpi ne, %7, %c0_i32_0 : i32
    scf.if %8 {
      %cst = arith.constant 0.000000e+00 : f32
      %21 = vector.broadcast %cst : f32 to vector<128x128xf32>
      %c0 = arith.constant 0 : index
      %c0_9 = arith.constant 0 : index
      %c0_10 = arith.constant 0 : index
      %22 = vector.load %arg9[%c0, %c0_9, %c0_10] : memref<1x128x128xf32, #tpu.memory_space<vmem>>, vector<1x128x128xf32>
      %23 = vector.shape_cast %22 : vector<1x128x128xf32> to vector<128x128xf32>
      %24 = vector.shape_cast %21 : vector<128x128xf32> to vector<1x128x128xf32>
      tpu.vector_store %arg9[%c0, %c0_9, %c0_10], %24 {strides = array<i32>} : memref<1x128x128xf32, #tpu.memory_space<vmem>>, vector<1x128x128xf32>,
    } else {
    }
    %c0_i32_1 = arith.constant 0 : i32
    %9 = arith.cmpi eq, %arg2, %c0_i32_1 : i32
    %10 = arith.extui %9 : i1 to i32
    %c0_i32_2 = arith.constant 0 : i32
    %11 = arith.cmpi ne, %10, %c0_i32_2 : i32
    scf.if %11 {
      %cst = arith.constant 0.000000e+00 : f32
      %21 = vector.broadcast %cst : f32 to vector<128x256xf32>
      %c0 = arith.constant 0 : index
      %c0_9 = arith.constant 0 : index
      %22 = vector.load %arg10[%c0, %c0_9] : memref<128x256xf32, #tpu.memory_space<vmem>>, vector<128x256xf32>
      tpu.vector_store %arg10[%c0, %c0_9], %21 {strides = array<i32>} : memref<128x256xf32, #tpu.memory_space<vmem>>, vector<128x256xf32>,
    } else {
    }
    %c1_i32_3 = arith.constant 1 : i32
    %12 = arith.cmpi eq, %1, %c1_i32_3 : i32
    %13 = arith.extui %12 : i1 to i32
    %c0_i32_4 = arith.constant 0 : i32
    %14 = arith.cmpi ne, %13, %c0_i32_4 : i32
    scf.if %14 {
      %c0 = arith.constant 0 : index
      %c0_9 = arith.constant 0 : index
      %c0_10 = arith.constant 0 : index
      %21 = vector.load %arg7[%c0, %c0_9, %c0_10] : memref<1x128x1xbf16, #tpu.memory_space<vmem>>, vector<1x128x1xbf16>
      %22 = vector.shape_cast %21 : vector<1x128x1xbf16> to vector<128x1xbf16>
      %c0_11 = arith.constant 0 : index
      %c0_12 = arith.constant 0 : index
      %c0_13 = arith.constant 0 : index
      %23 = vector.load %arg6[%c0_11, %c0_12, %c0_13] : memref<1x1x128xbf16, #tpu.memory_space<vmem>>, vector<1x1x128xbf16>
      %24 = vector.shape_cast %23 : vector<1x1x128xbf16> to vector<1x128xbf16>
      %25 = vector.broadcast %22 : vector<128x1xbf16> to vector<128x128xbf16>
      %26 = vector.broadcast %24 : vector<1x128xbf16> to vector<128x128xbf16>
      %27 = arith.cmpf oeq, %25, %26 : vector<128x128xbf16>
      %c0_14 = arith.constant 0 : index
      %c0_15 = arith.constant 0 : index
      %c0_16 = arith.constant 0 : index
      %28 = vector.load %arg4[%c0_14, %c0_15, %c0_16] : memref<1x128x128xbf16, #tpu.memory_space<vmem>>, vector<1x128x128xbf16>
      %29 = vector.shape_cast %28 : vector<1x128x128xbf16> to vector<128x128xbf16>
      %cst = arith.constant 0.000000e+00 : bf16
      %30 = vector.broadcast %cst : bf16 to vector<128x128xbf16>
      %31 = arith.select %27, %29, %30 : vector<128x128xi1>, vector<128x128xbf16>
      %c0_17 = arith.constant 0 : index
      %c0_18 = arith.constant 0 : index
      %32 = vector.load %arg10[%c0_17, %c0_18] : memref<128x256xf32, #tpu.memory_space<vmem>>, vector<128x256xf32>
      %c0_19 = arith.constant 0 : index
      %c0_20 = arith.constant 0 : index
      %c0_21 = arith.constant 0 : index
      %33 = vector.load %arg5[%c0_19, %c0_20, %c0_21] : memref<1x128x256xbf16, #tpu.memory_space<vmem>>, vector<1x128x256xbf16>
      %34 = vector.shape_cast %33 : vector<1x128x256xbf16> to vector<128x256xbf16>
      %cst_22 = arith.constant dense<0.000000e+00> : vector<128x256xf32>
      %35 = tpu.matmul %31, %34, %cst_22 {dimension_numbers = #tpu.dot_dimension_numbers<[1], [0], [0], [1], [0, 0, 1, 1], [], []>} : vector<128x128xbf16>, vector<128x256xbf16>, vector<128x256xf32> -> vector<128x256xf32>
      %36 = arith.addf %32, %35 : vector<128x256xf32>
      %c0_23 = arith.constant 0 : index
      %c0_24 = arith.constant 0 : index
      %37 = vector.load %arg10[%c0_23, %c0_24] : memref<128x256xf32, #tpu.memory_space<vmem>>, vector<128x256xf32>
      tpu.vector_store %arg10[%c0_23, %c0_24], %36 {strides = array<i32>} : memref<128x256xf32, #tpu.memory_space<vmem>>, vector<128x256xf32>,
    } else {
    }
    %c0_i32_5 = arith.constant 0 : i32
    %15 = arith.cmpi eq, %1, %c0_i32_5 : i32
    %16 = arith.extui %15 : i1 to i32
    %c0_i32_6 = arith.constant 0 : i32
    %17 = arith.cmpi ne, %16, %c0_i32_6 : i32
    scf.if %17 {
      %c0 = arith.constant 0 : index
      %c0_9 = arith.constant 0 : index
      %21 = vector.load %arg10[%c0, %c0_9] : memref<128x256xf32, #tpu.memory_space<vmem>>, vector<128x256xf32>
      %c0_10 = arith.constant 0 : index
      %c0_11 = arith.constant 0 : index
      %c0_12 = arith.constant 0 : index
      %22 = vector.load %arg4[%c0_10, %c0_11, %c0_12] : memref<1x128x128xbf16, #tpu.memory_space<vmem>>, vector<1x128x128xbf16>
      %23 = vector.shape_cast %22 : vector<1x128x128xbf16> to vector<128x128xbf16>
      %c0_13 = arith.constant 0 : index
      %c0_14 = arith.constant 0 : index
      %c0_15 = arith.constant 0 : index
      %24 = vector.load %arg5[%c0_13, %c0_14, %c0_15] : memref<1x128x256xbf16, #tpu.memory_space<vmem>>, vector<1x128x256xbf16>
      %25 = vector.shape_cast %24 : vector<1x128x256xbf16> to vector<128x256xbf16>
      %cst = arith.constant dense<0.000000e+00> : vector<128x256xf32>
      %26 = tpu.matmul %23, %25, %cst {dimension_numbers = #tpu.dot_dimension_numbers<[1], [0], [0], [1], [0, 0, 1, 1], [], []>} : vector<128x128xbf16>, vector<128x256xbf16>, vector<128x256xf32> -> vector<128x256xf32>
      %27 = arith.addf %21, %26 : vector<128x256xf32>
      %c0_16 = arith.constant 0 : index
      %c0_17 = arith.constant 0 : index
      %28 = vector.load %arg10[%c0_16, %c0_17] : memref<128x256xf32, #tpu.memory_space<vmem>>, vector<128x256xf32>
      tpu.vector_store %arg10[%c0_16, %c0_17], %27 {strides = array<i32>} : memref<128x256xf32, #tpu.memory_space<vmem>>, vector<128x256xf32>,
    } else {
    }
    %c0_i32_7 = arith.constant 0 : i32
    %18 = arith.cmpi eq, %arg2, %c0_i32_7 : i32
    %19 = arith.extui %18 : i1 to i32
    %c0_i32_8 = arith.constant 0 : i32
    %20 = arith.cmpi ne, %19, %c0_i32_8 : i32
    scf.if %20 {
      %c0 = arith.constant 0 : index
      %c0_9 = arith.constant 0 : index
      %21 = vector.load %arg10[%c0, %c0_9] : memref<128x256xf32, #tpu.memory_space<vmem>>, vector<128x256xf32>
      %22 = vector.extract_strided_slice %21 {offsets = [0, 0], sizes = [128, 128], strides = [1, 1]} : vector<128x256xf32> to vector<128x128xf32>
      %23 = vector.extract_strided_slice %21 {offsets = [0, 128], sizes = [128, 1], strides = [1, 1]} : vector<128x256xf32> to vector<128x1xf32>
      %c0_10 = arith.constant 0 : index
      %c0_11 = arith.constant 0 : index
      %c0_12 = arith.constant 0 : index
      %24 = vector.load %arg8[%c0_10, %c0_11, %c0_12] : memref<1x128x1xf32, #tpu.memory_space<vmem>>, vector<1x128x1xf32>
      %25 = vector.shape_cast %24 : vector<1x128x1xf32> to vector<128x1xf32>
      %cst = arith.constant 3.000000e-01 : f32
      %26 = vector.broadcast %cst : f32 to vector<128x1xf32>
      %27 = arith.cmpf ogt, %25, %26 : vector<128x1xf32>
      %28 = arith.extui %27 : vector<128x1xi1> to vector<128x1xi32>
      %29 = arith.sitofp %28 : vector<128x1xi32> to vector<128x1xf32>
      %c1_i32_13 = arith.constant 1 : i32
      %30 = arith.cmpi eq, %1, %c1_i32_13 : i32
      %cst_14 = arith.constant 1.000000e+00 : f32
      %31 = vector.broadcast %cst_14 : f32 to vector<128x1xf32>
      %32 = arith.select %30, %29, %31 : vector<128x1xf32>
      %33 = arith.index_cast %arg1 : i32 to index
      %c1 = arith.constant 1 : index
      %34 = memref.load %arg3[%33, %c1] : memref<11x4xi32, #tpu.memory_space<smem>>
      %c0_i32_15 = arith.constant 0 : i32
      %35 = arith.cmpi eq, %34, %c0_i32_15 : i32
      %cst_16 = arith.constant 0.142857149 : f32
      %cst_17 = arith.constant 1.000000e+00 : f32
      %36 = arith.select %35, %cst_16, %cst_17 : f32
      %cst_18 = arith.constant 1.000000e+00 : f32
      %37 = vector.broadcast %cst_18 : f32 to vector<128x1xf32>
      %38 = arith.maximumf %23, %37 : vector<128x1xf32>
      %39 = vector.broadcast %36 : f32 to vector<128x1xf32>
      %40 = arith.divf %39, %38 : vector<128x1xf32>
      %41 = arith.mulf %32, %40 : vector<128x1xf32>
      %c0_19 = arith.constant 0 : index
      %c0_20 = arith.constant 0 : index
      %c0_21 = arith.constant 0 : index
      %42 = vector.load %arg9[%c0_19, %c0_20, %c0_21] : memref<1x128x128xf32, #tpu.memory_space<vmem>>, vector<1x128x128xf32>
      %43 = vector.shape_cast %42 : vector<1x128x128xf32> to vector<128x128xf32>
      %44 = vector.broadcast %41 : vector<128x1xf32> to vector<128x128xf32>
      %45 = arith.mulf %22, %44 : vector<128x128xf32>
      %46 = arith.addf %43, %45 : vector<128x128xf32>
      %c0_22 = arith.constant 0 : index
      %c0_23 = arith.constant 0 : index
      %c0_24 = arith.constant 0 : index
      %47 = vector.load %arg9[%c0_22, %c0_23, %c0_24] : memref<1x128x128xf32, #tpu.memory_space<vmem>>, vector<1x128x128xf32>
      %48 = vector.shape_cast %47 : vector<1x128x128xf32> to vector<128x128xf32>
      %49 = vector.shape_cast %46 : vector<128x128xf32> to vector<1x128x128xf32>
      tpu.vector_store %arg9[%c0_22, %c0_23, %c0_24], %49 {strides = array<i32>} : memref<1x128x128xf32, #tpu.memory_space<vmem>>, vector<1x128x128xf32>,
    } else {
    }
    return
  }
  func.func @transform_0(%arg0: i32, %arg1: i32, %arg2: i32, %arg3: memref<11x4xi32, #tpu.memory_space<smem>>) -> (i32, i32, i32) {
    %c0_i32 = arith.constant 0 : i32
    return %arg1, %arg0, %arg2 : i32, i32, i32
  }
  func.func @transform_1(%arg0: i32, %arg1: i32, %arg2: i32, %arg3: memref<11x4xi32, #tpu.memory_space<smem>>) -> (i32, i32, i32) {
    %0 = arith.index_cast %arg1 : i32 to index
    %c0 = arith.constant 0 : index
    %1 = memref.load %arg3[%0, %c0] : memref<11x4xi32, #tpu.memory_space<smem>>
    %c0_i32 = arith.constant 0 : i32
    %c0_i32_0 = arith.constant 0 : i32
    return %1, %arg2, %c0_i32 : i32, i32, i32
  }
  func.func @transform_2(%arg0: i32, %arg1: i32, %arg2: i32, %arg3: memref<11x4xi32, #tpu.memory_space<smem>>) -> (i32, i32, i32) {
    %0 = arith.index_cast %arg1 : i32 to index
    %c0 = arith.constant 0 : index
    %1 = memref.load %arg3[%0, %c0] : memref<11x4xi32, #tpu.memory_space<smem>>
    %c0_i32 = arith.constant 0 : i32
    %c0_i32_0 = arith.constant 0 : i32
    return %1, %c0_i32, %arg2 : i32, i32, i32
  }
  func.func @transform_3(%arg0: i32, %arg1: i32, %arg2: i32, %arg3: memref<11x4xi32, #tpu.memory_space<smem>>) -> (i32, i32, i32) {
    %0 = arith.index_cast %arg1 : i32 to index
    %c1 = arith.constant 1 : index
    %1 = memref.load %arg3[%0, %c1] : memref<11x4xi32, #tpu.memory_space<smem>>
    %c0_i32 = arith.constant 0 : i32
    %c0_i32_0 = arith.constant 0 : i32
    return %1, %arg0, %c0_i32 : i32, i32, i32
  }
  func.func @transform_4(%arg0: i32, %arg1: i32, %arg2: i32, %arg3: memref<11x4xi32, #tpu.memory_space<smem>>) -> (i32, i32, i32) {
    %0 = arith.index_cast %arg1 : i32 to index
    %c1 = arith.constant 1 : index
    %1 = memref.load %arg3[%0, %c1] : memref<11x4xi32, #tpu.memory_space<smem>>
    %c0_i32 = arith.constant 0 : i32
    %c0_i32_0 = arith.constant 0 : i32
    return %1, %arg0, %c0_i32 : i32, i32, i32
  }
  func.func @transform_5(%arg0: i32, %arg1: i32, %arg2: i32, %arg3: memref<11x4xi32, #tpu.memory_space<smem>>) -> (i32, i32, i32) {
    %0 = arith.index_cast %arg1 : i32 to index
    %c1 = arith.constant 1 : index
    %1 = memref.load %arg3[%0, %c1] : memref<11x4xi32, #tpu.memory_space<smem>>
    %c0_i32 = arith.constant 0 : i32
    %c0_i32_0 = arith.constant 0 : i32
    return %1, %arg0, %c0_i32 : i32, i32, i32
  }
}

module attributes {stable_mosaic.version = 11 : i64} {
  func.func @kernel(%arg0: i32, %arg1: i32, %arg2: memref<3x2xi32, #tpu.memory_space<smem>>, %arg3: memref<1x128x128xbf16, #tpu.memory_space<vmem>>, %arg4: memref<1x128x128xf32, #tpu.memory_space<vmem>>, %arg5: memref<1x128x128xbf16, #tpu.memory_space<vmem>>, %arg6: memref<1x128x128xbf16, #tpu.memory_space<vmem>>, %arg7: memref<1x1x128xf32, #tpu.memory_space<vmem>>, %arg8: memref<1x128x128xf32, #tpu.memory_space<vmem>>) attributes {dimension_semantics = [#tpu.dimension_semantics<parallel>, #tpu.dimension_semantics<parallel>], iteration_bounds = array<i64: 3, 1>, scalar_prefetch = 1 : i64, scratch_operands = 0 : i64, tpu.core_type = #tpu.core_type<tc>, window_params = [{transform_indices = @transform_0, window_bounds = array<i64: 1, 128, 128>}, {transform_indices = @transform_1, window_bounds = array<i64: 1, 128, 128>}, {transform_indices = @transform_2, window_bounds = array<i64: 1, 128, 128>}, {transform_indices = @transform_3, window_bounds = array<i64: 1, 128, 128>}, {transform_indices = @transform_4, window_bounds = array<i64: 1, 1, 128>}, {transform_indices = @transform_5, window_bounds = array<i64: 1, 128, 128>}]} {
    %c0 = arith.constant 0 : index
    %c0_0 = arith.constant 0 : index
    %c0_1 = arith.constant 0 : index
    %0 = vector.load %arg3[%c0, %c0_0, %c0_1] : memref<1x128x128xbf16, #tpu.memory_space<vmem>>, vector<1x128x128xbf16>
    %1 = vector.shape_cast %0 : vector<1x128x128xbf16> to vector<128x128xbf16>
    %c0_2 = arith.constant 0 : index
    %c0_3 = arith.constant 0 : index
    %c0_4 = arith.constant 0 : index
    %2 = vector.load %arg5[%c0_2, %c0_3, %c0_4] : memref<1x128x128xbf16, #tpu.memory_space<vmem>>, vector<1x128x128xbf16>
    %3 = vector.shape_cast %2 : vector<1x128x128xbf16> to vector<128x128xbf16>
    %cst = arith.constant dense<0.000000e+00> : vector<128x128xf32>
    %4 = tpu.matmul %1, %3, %cst {dimension_numbers = #tpu.dot_dimension_numbers<[1], [0], [0], [1], [0, 0, 1, 1], [], []>} : vector<128x128xbf16>, vector<128x128xbf16>, vector<128x128xf32> -> vector<128x128xf32>
    %c0_5 = arith.constant 0 : index
    %c0_6 = arith.constant 0 : index
    %c0_7 = arith.constant 0 : index
    %5 = vector.load %arg7[%c0_5, %c0_6, %c0_7] : memref<1x1x128xf32, #tpu.memory_space<vmem>>, vector<1x1x128xf32>
    %6 = vector.shape_cast %5 : vector<1x1x128xf32> to vector<1x128xf32>
    %7 = vector.broadcast %6 : vector<1x128xf32> to vector<128x128xf32>
    %8 = arith.addf %4, %7 : vector<128x128xf32>
    %9 = arith.index_cast %arg0 : i32 to index
    %c1 = arith.constant 1 : index
    %10 = memref.load %arg2[%9, %c1] : memref<3x2xi32, #tpu.memory_space<smem>>
    %c1_i32 = arith.constant 1 : i32
    %11 = arith.cmpi eq, %10, %c1_i32 : i32
    %12 = arith.extui %11 : i1 to i32
    %c0_i32 = arith.constant 0 : i32
    %13 = arith.cmpi ne, %12, %c0_i32 : i32
    scf.if %13 {
      %c0_11 = arith.constant 0 : index
      %c0_12 = arith.constant 0 : index
      %c0_13 = arith.constant 0 : index
      %19 = vector.load %arg4[%c0_11, %c0_12, %c0_13] : memref<1x128x128xf32, #tpu.memory_space<vmem>>, vector<1x128x128xf32>
      %20 = vector.shape_cast %19 : vector<1x128x128xf32> to vector<128x128xf32>
      %21 = arith.truncf %20 : vector<128x128xf32> to vector<128x128xbf16>
      %c0_14 = arith.constant 0 : index
      %c0_15 = arith.constant 0 : index
      %c0_16 = arith.constant 0 : index
      %22 = vector.load %arg6[%c0_14, %c0_15, %c0_16] : memref<1x128x128xbf16, #tpu.memory_space<vmem>>, vector<1x128x128xbf16>
      %23 = vector.shape_cast %22 : vector<1x128x128xbf16> to vector<128x128xbf16>
      %cst_17 = arith.constant dense<0.000000e+00> : vector<128x128xf32>
      %24 = tpu.matmul %21, %23, %cst_17 {dimension_numbers = #tpu.dot_dimension_numbers<[1], [0], [0], [1], [0, 0, 1, 1], [], []>} : vector<128x128xbf16>, vector<128x128xbf16>, vector<128x128xf32> -> vector<128x128xf32>
      %25 = arith.addf %8, %24 : vector<128x128xf32>
      %cst_18 = arith.constant 0.000000e+00 : f32
      %26 = vector.broadcast %cst_18 : f32 to vector<128x128xf32>
      %27 = arith.maximumf %25, %26 : vector<128x128xf32>
      %c0_19 = arith.constant 0 : index
      %c0_20 = arith.constant 0 : index
      %c0_21 = arith.constant 0 : index
      %28 = vector.load %arg8[%c0_19, %c0_20, %c0_21] : memref<1x128x128xf32, #tpu.memory_space<vmem>>, vector<1x128x128xf32>
      %29 = vector.shape_cast %28 : vector<1x128x128xf32> to vector<128x128xf32>
      %30 = vector.shape_cast %27 : vector<128x128xf32> to vector<1x128x128xf32>
      tpu.vector_store %arg8[%c0_19, %c0_20, %c0_21], %30 {strides = array<i32>} : memref<1x128x128xf32, #tpu.memory_space<vmem>>, vector<1x128x128xf32>,
    } else {
    }
    %14 = arith.index_cast %arg0 : i32 to index
    %c1_8 = arith.constant 1 : index
    %15 = memref.load %arg2[%14, %c1_8] : memref<3x2xi32, #tpu.memory_space<smem>>
    %c0_i32_9 = arith.constant 0 : i32
    %16 = arith.cmpi eq, %15, %c0_i32_9 : i32
    %17 = arith.extui %16 : i1 to i32
    %c0_i32_10 = arith.constant 0 : i32
    %18 = arith.cmpi ne, %17, %c0_i32_10 : i32
    scf.if %18 {
      %cst_11 = arith.constant 0.000000e+00 : f32
      %19 = vector.broadcast %cst_11 : f32 to vector<128x128xf32>
      %20 = arith.maximumf %8, %19 : vector<128x128xf32>
      %c0_12 = arith.constant 0 : index
      %c0_13 = arith.constant 0 : index
      %c0_14 = arith.constant 0 : index
      %21 = vector.load %arg8[%c0_12, %c0_13, %c0_14] : memref<1x128x128xf32, #tpu.memory_space<vmem>>, vector<1x128x128xf32>
      %22 = vector.shape_cast %21 : vector<1x128x128xf32> to vector<128x128xf32>
      %23 = vector.shape_cast %20 : vector<128x128xf32> to vector<1x128x128xf32>
      tpu.vector_store %arg8[%c0_12, %c0_13, %c0_14], %23 {strides = array<i32>} : memref<1x128x128xf32, #tpu.memory_space<vmem>>, vector<1x128x128xf32>,
    } else {
    }
    return
  }
  func.func @transform_0(%arg0: i32, %arg1: i32, %arg2: memref<3x2xi32, #tpu.memory_space<smem>>) -> (i32, i32, i32) {
    %c0_i32 = arith.constant 0 : i32
    %c0_i32_0 = arith.constant 0 : i32
    return %arg0, %arg1, %c0_i32 : i32, i32, i32
  }
  func.func @transform_1(%arg0: i32, %arg1: i32, %arg2: memref<3x2xi32, #tpu.memory_space<smem>>) -> (i32, i32, i32) {
    %0 = arith.index_cast %arg0 : i32 to index
    %c0 = arith.constant 0 : index
    %1 = memref.load %arg2[%0, %c0] : memref<3x2xi32, #tpu.memory_space<smem>>
    %c0_i32 = arith.constant 0 : i32
    %c0_i32_0 = arith.constant 0 : i32
    return %1, %arg1, %c0_i32 : i32, i32, i32
  }
  func.func @transform_2(%arg0: i32, %arg1: i32, %arg2: memref<3x2xi32, #tpu.memory_space<smem>>) -> (i32, i32, i32) {
    %c0_i32 = arith.constant 0 : i32
    %c0_i32_0 = arith.constant 0 : i32
    %c0_i32_1 = arith.constant 0 : i32
    return %arg0, %c0_i32, %c0_i32_0 : i32, i32, i32
  }
  func.func @transform_3(%arg0: i32, %arg1: i32, %arg2: memref<3x2xi32, #tpu.memory_space<smem>>) -> (i32, i32, i32) {
    %c0_i32 = arith.constant 0 : i32
    %c0_i32_0 = arith.constant 0 : i32
    %c0_i32_1 = arith.constant 0 : i32
    return %arg0, %c0_i32, %c0_i32_0 : i32, i32, i32
  }
  func.func @transform_4(%arg0: i32, %arg1: i32, %arg2: memref<3x2xi32, #tpu.memory_space<smem>>) -> (i32, i32, i32) {
    %c0_i32 = arith.constant 0 : i32
    %c0_i32_0 = arith.constant 0 : i32
    %c0_i32_1 = arith.constant 0 : i32
    return %arg0, %c0_i32, %c0_i32_0 : i32, i32, i32
  }
  func.func @transform_5(%arg0: i32, %arg1: i32, %arg2: memref<3x2xi32, #tpu.memory_space<smem>>) -> (i32, i32, i32) {
    %c0_i32 = arith.constant 0 : i32
    %c0_i32_0 = arith.constant 0 : i32
    return %arg0, %arg1, %c0_i32 : i32, i32, i32
  }
}

</mosaic_0001>

<bundles_post_ra>
// kernel: semantic_layer_forward.3
= control target key start
LH: loop header
LB: loop body
LE: loop exit
PB: predicated region body
PF: predicated region fallthrough
CT: control target
= control target key end

     0   :  { %s1165_s24 = smov 0   ;;  %s1167_s25 = smov 0   ;;  %s1533_s0 = inlined_call_operand.vmem [shape: f32[3,128,128], index: 0, kind: input, shape index: {}]   ;;  %s1534_s1 = inlined_call_operand.vmem [shape: f32[3,128,128], index: 1, kind: input, shape index: {}]   ;;  %s1535_s2 = inlined_call_operand.vmem [shape: f32[128,1], index: 2, kind: input, shape index: {}]   ;;  %s1536_s3 = inlined_call_operand.vmem [shape: f32[128,1], index: 3, kind: input, shape index: {}]   ;;  %s1537_s4 = inlined_call_operand.vmem [shape: f32[3,1,128], index: 4, kind: output, shape index: {0}]   ;;  %s1538_s5 = inlined_call_operand.vmem [shape: f32[3,1,128], index: 5, kind: output, shape index: {1}]   ;;  %s1539_s6 = inlined_call_operand.vmem [shape: f32[3,1,128], index: 6, kind: output, shape index: {2}]   ;;  %s1540_s7 = inlined_call_operand.vmem [shape: f32[3,1,128], index: 7, kind: output, shape index: {3}]  }
   0x1   :  { %s1169_s26 = smov 0  }
   0x2 LB: > { %s30_s27 = sadd.s32 1, %s1117_s25  ;;  %p1057_p0 = scmp.ge.s32.totalorder %s1121_s26, 1  ;;  %s1121_s26 = sphi %s1169_s26, %s18_s26   ;;  %s1117_s25 = sphi %s1167_s25, %s1546_s25   ;;  %s1113_s24 = sphi %s1165_s24, %s1545_s24  }
   0x3   : > { %p32_p1 = scmp.ge.s32.totalorder %s30_s27, 3  ;;  %p284_p2 = scmp.lt.s32.totalorder %s1121_s26, 4 }
   0x5   : > { %s1548_s27 = smov (%p32_p1, %s30_s27), 0  ;;  %p285_p3 = pnand %p1057_p0, %p284_p2 }
   0x7   : > { %288 = sbr.rel (%p285_p3) target bundleno = 240 (0xf0), region = 36 }
   0xc   : > { %v546_v0 = vld [vmem:[%s1536_s3] sm:$0xff]  ;;  %v1123_v2 = vmov 0   ;;  %v547_v3 = vld [vmem:[%s1536_s3 + $0x8] sm:$0xff]  ;;  %v548_v5 = vld [vmem:[%s1536_s3 + $0x10] sm:$0xff]  ;;  %p346_p4 = scmp.lt.s32.totalorder %s1113_s24, 2 }
   0xd   : > { %v434_v1 = vld [vmem:[%s1535_s2] sm:$0xff]  ;;  %1094 = vset.pattern.permute.xlu1 %v1123_v2  ;;  %1093 = vset.pattern.permute.xlu0 %v1123_v2  ;;  %v435_v4 = vld [vmem:[%s1535_s2 + $0x8] sm:$0xff]  ;;  %v436_v6 = vld [vmem:[%s1535_s2 + $0x10] sm:$0xff] }
   0xe   : > { %564 = vperm.xlu1 %1094, %v546_v0   ;;  %452 = vperm.xlu0 %1093, %v434_v1   ;;  %v549_v7 = vld [vmem:[%s1536_s3 + $0x18] sm:$0xff]  ;;  %v550_v9 = vld [vmem:[%s1536_s3 + $0x20] sm:$0xff]  ;;  %v551_v11 = vld [vmem:[%s1536_s3 + $0x28] sm:$0xff]  ;;  %s1550_s24 = smov (!%p346_p4, %s1113_s24), 2 }
   0xf   : > { %v437_v8 = vld [vmem:[%s1535_s2 + $0x18] sm:$0xff]  ;;  %v438_v10 = vld [vmem:[%s1535_s2 + $0x20] sm:$0xff]  ;;  %v439_v12 = vld [vmem:[%s1535_s2 + $0x28] sm:$0xff]  ;;  %s1065_s12 = sshll.u32 %s1550_s24, 7  ;;  %s373_s21 = scalar_lea.vmem %s1538_s5, %s1550_s24 }
  0x10   : > { %v552_v13 = vld [vmem:[%s1536_s3 + $0x30] sm:$0xff]  ;;  %v553_v15 = vld [vmem:[%s1536_s3 + $0x38] sm:$0xff]  ;;  %v554_v17 = vld [vmem:[%s1536_s3 + $0x40] sm:$0xff]  ;;  %s1289_s15 = scalar_lea.vmem %s1533_s0, %s1065_s12  ;;  %s1294_s18 = scalar_lea.vmem %s1534_s1, %s1065_s12 }
  0x11   : > { %v440_v14 = vld [vmem:[%s1535_s2 + $0x30] sm:$0xff]  ;;  %v441_v16 = vld [vmem:[%s1535_s2 + $0x38] sm:$0xff]  ;;  %v442_v18 = vld [vmem:[%s1535_s2 + $0x40] sm:$0xff]  ;;  %s367_s28 = scalar_lea.vmem %s1537_s4, %s1550_s24  ;;  %s379_s8 = scalar_lea.vmem %s1539_s6, %s1550_s24 }
  0x12   : > { %569 = vperm.xlu1 %1094, %v547_v3   ;;  %457 = vperm.xlu0 %1093, %v435_v4   ;;  %v555_v19 = vld [vmem:[%s1536_s3 + $0x48] sm:$0xff]  ;;  %v556_v21 = vld [vmem:[%s1536_s3 + $0x50] sm:$0xff]  ;;  %v557_v23 = vld [vmem:[%s1536_s3 + $0x58] sm:$0xff]  ;;  %s385_s11 = scalar_lea.vmem %s1540_s7, %s1550_s24 }
  0x13   : > { %v443_v20 = vld [vmem:[%s1535_s2 + $0x48] sm:$0xff]  ;;  %v444_v22 = vld [vmem:[%s1535_s2 + $0x50] sm:$0xff]  ;;  %v445_v24 = vld [vmem:[%s1535_s2 + $0x58] sm:$0xff] }
  0x14   : > { %v558_v25 = vld [vmem:[%s1536_s3 + $0x60] sm:$0xff]  ;;  %v559_v27 = vld [vmem:[%s1536_s3 + $0x68] sm:$0xff]  ;;  %v560_v29 = vld [vmem:[%s1536_s3 + $0x70] sm:$0xff] }
  0x15   : > { %v446_v26 = vld [vmem:[%s1535_s2 + $0x60] sm:$0xff]  ;;  %v447_v28 = vld [vmem:[%s1535_s2 + $0x68] sm:$0xff]  ;;  %v448_v30 = vld [vmem:[%s1535_s2 + $0x70] sm:$0xff] }
  0x16   : > { %574 = vperm.xlu1 %1094, %v548_v5   ;;  %462 = vperm.xlu0 %1093, %v436_v6   ;;  %v561_v31 = vld [vmem:[%s1536_s3 + $0x78] sm:$0xff]  ;;  %v386_v33 = vld [vmem:[%s1289_s15] sm:$0xff]  ;;  %v387_v35 = vld [vmem:[%s1289_s15 + $0x8] sm:$0xff] }
  0x17   : > { %v449_v32 = vld [vmem:[%s1535_s2 + $0x78] sm:$0xff]  ;;  %v1298_v34 = vld [vmem:[%s1294_s18] sm:$0xff]  ;;  %v1302_v36 = vld [vmem:[%s1294_s18 + $0x8] sm:$0xff] }
  0x18   : > { %v1305_v37 = vmul.f32 %v1298_v34, %v386_v33  ;;  %v1308_v38 = vmul.f32 %v1302_v36, %v387_v35  ;;  %v388_v39 = vld [vmem:[%s1289_s15 + $0x10] sm:$0xff]  ;;  %v389_v44 = vld [vmem:[%s1289_s15 + $0x18] sm:$0xff]  ;;  %v390_v49 = vld [vmem:[%s1289_s15 + $0x20] sm:$0xff] }
  0x19   : > { %v1312_v40 = vld [vmem:[%s1294_s18 + $0x10] sm:$0xff]  ;;  %v1323_v45 = vld [vmem:[%s1294_s18 + $0x18] sm:$0xff]  ;;  %v1332_v50 = vld [vmem:[%s1294_s18 + $0x20] sm:$0xff] }
  0x1a   : > { %579 = vperm.xlu1 %1094, %v549_v7   ;;  %467 = vperm.xlu0 %1093, %v437_v8   ;;  %v658_v41 = vmul.f32 %v1305_v37, %v1305_v37  ;;  %v659_v42 = vmul.f32 %v1308_v38, %v1308_v38  ;;  %v1319_v43 = vmul.f32 %v1312_v40, %v388_v39  ;;  %v391_v54 = vld [vmem:[%s1289_s15 + $0x28] sm:$0xff]  ;;  %v392_v59 = vld [vmem:[%s1289_s15 + $0x30] sm:$0xff]  ;;  %v393_v0 = vld [vmem:[%s1289_s15 + $0x38] sm:$0xff] }
  0x1b   : > { %v1328_v48 = vmul.f32 %v1323_v45, %v389_v44  ;;  %v1337_v53 = vmul.f32 %v1332_v50, %v390_v49  ;;  %v1341_v55 = vld [vmem:[%s1294_s18 + $0x28] sm:$0xff]  ;;  %v1350_v60 = vld [vmem:[%s1294_s18 + $0x30] sm:$0xff]  ;;  %v1359_v1 = vld [vmem:[%s1294_s18 + $0x38] sm:$0xff] }
  0x1c   : > { %v674_v46 = vadd.f32 %v659_v42, %v658_v41  ;;  %v660_v47 = vmul.f32 %v1319_v43, %v1319_v43  ;;  %v1346_v58 = vmul.f32 %v1341_v55, %v391_v54  ;;  %v1355_v63 = vmul.f32 %v1350_v60, %v392_v59  ;;  %v394_v5 = vld [vmem:[%s1289_s15 + $0x40] sm:$0xff]  ;;  %v399_v35 = vld [vmem:[%s1289_s15 + $0x68] sm:$0xff]  ;;  %v400_v49 = vld [vmem:[%s1289_s15 + $0x70] sm:$0xff] }
  0x1d   : > { %v661_v52 = vmul.f32 %v1328_v48, %v1328_v48  ;;  %v662_v57 = vmul.f32 %v1337_v53, %v1337_v53  ;;  %v1364_v4 = vmul.f32 %v1359_v1, %v393_v0  ;;  %v1368_v6 = vld [vmem:[%s1294_s18 + $0x40] sm:$0xff]  ;;  %v1413_v39 = vld [vmem:[%s1294_s18 + $0x68] sm:$0xff] }
  0x1e   : > { %584 = vperm.xlu1 %1094, %v550_v9   ;;  %472 = vperm.xlu0 %1093, %v438_v10   ;;  %v675_v51 = vadd.f32 %v674_v46, %v660_v47  ;;  %v663_v62 = vmul.f32 %v1346_v58, %v1346_v58  ;;  %v664_v3 = vmul.f32 %v1355_v63, %v1355_v63  ;;  %v395_v10 = vld [vmem:[%s1289_s15 + $0x48] sm:$0xff] }
  0x1f   : > { %v665_v8 = vmul.f32 %v1364_v4, %v1364_v4  ;;  %v1373_v9 = vmul.f32 %v1368_v6, %v394_v5  ;;  %v1418_v47 = vmul.f32 %v1413_v39, %v399_v35 }
  0x20   : > { %v676_v56 = vadd.f32 %v675_v51, %v661_v52  ;;  %v1422_v51 = vld [vmem:[%s1294_s18 + $0x70] sm:$0xff] }
  0x21   : > { %v671_v54 = vmul.f32 %v1418_v47, %v1418_v47 }
  0x22   : > { %589 = vperm.xlu1 %1094, %v551_v11   ;;  %477 = vperm.xlu0 %1093, %v439_v12   ;;  %v677_v61 = vadd.f32 %v676_v56, %v662_v57  ;;  %v1377_v11 = vld [vmem:[%s1294_s18 + $0x48] sm:$0xff]  ;;  %v401_v56 = vld [vmem:[%s1289_s15 + $0x78] sm:$0xff] }
  0x23   : > { %v1428_v57 = vld [vmem:[%s1294_s18 + $0x78] sm:$0xff] }
  0x24   : > { %v678_v2 = vadd.f32 %v677_v61, %v663_v62  ;;  %v1431_v62 = vmul.f32 %v1422_v51, %v400_v49 }
  0x26   : > { %594 = vperm.xlu1 %1094, %v552_v13   ;;  %482 = vperm.xlu0 %1093, %v440_v14   ;;  %v679_v7 = vadd.f32 %v678_v2, %v664_v3  ;;  %v666_v13 = vmul.f32 %v1373_v9, %v1373_v9  ;;  %v1382_v14 = vmul.f32 %v1377_v11, %v395_v10 }
  0x27   : > { %v672_v2 = vmul.f32 %v1431_v62, %v1431_v62  ;;  %v1436_v3 = vmul.f32 %v1428_v57, %v401_v56 }
  0x28   : > { %v680_v12 = vadd.f32 %v679_v7, %v665_v8 }
  0x29   : > { %1543 = vst [vmem:[#allocation2_spill] sm:$0xff] %v1436_v3  ;;  %v673_v10 = vmul.f32 %v1436_v3, %v1436_v3 }
  0x2a   : > { %599 = vperm.xlu1 %1094, %v553_v15   ;;  %487 = vperm.xlu0 %1093, %v441_v16   ;;  %v396_v15 = vld [vmem:[%s1289_s15 + $0x50] sm:$0xff] }
  0x2b   : > { %v1386_v16 = vld [vmem:[%s1294_s18 + $0x50] sm:$0xff] }
  0x2e   : > { %604 = vperm.xlu1 %1094, %v554_v17   ;;  %492 = vperm.xlu0 %1093, %v442_v18   ;;  %v681_v17 = vadd.f32 %v680_v12, %v666_v13  ;;  %v667_v18 = vmul.f32 %v1382_v14, %v1382_v14 }
  0x32   : > { %609 = vperm.xlu1 %1094, %v555_v19   ;;  %497 = vperm.xlu0 %1093, %v443_v20   ;;  %v1391_v19 = vmul.f32 %v1386_v16, %v396_v15  ;;  %v397_v20 = vld [vmem:[%s1289_s15 + $0x58] sm:$0xff] }
  0x36   : > { %614 = vperm.xlu1 %1094, %v556_v21   ;;  %502 = vperm.xlu0 %1093, %v444_v22   ;;  %v1395_v21 = vld [vmem:[%s1294_s18 + $0x58] sm:$0xff]  ;;  %v682_v22 = vadd.f32 %v681_v17, %v667_v18 }
  0x3a   : > { %619 = vperm.xlu1 %1094, %v557_v23   ;;  %507 = vperm.xlu0 %1093, %v445_v24   ;;  %v668_v23 = vmul.f32 %v1391_v19, %v1391_v19 }
  0x3e   : > { %624 = vperm.xlu1 %1094, %v558_v25   ;;  %512 = vperm.xlu0 %1093, %v446_v26   ;;  %v1400_v26 = vmul.f32 %v1395_v21, %v397_v20 }
  0x42   : > { %629 = vperm.xlu1 %1094, %v559_v27   ;;  %517 = vperm.xlu0 %1093, %v447_v28   ;;  %v398_v27 = vld [vmem:[%s1289_s15 + $0x60] sm:$0xff] }
  0x43   : > { %v1404_v28 = vld [vmem:[%s1294_s18 + $0x60] sm:$0xff] }
  0x44   : > { %v1409_v33 = vmul.f32 %v1404_v28, %v398_v27 }
  0x46   : > { %634 = vperm.xlu1 %1094, %v560_v29   ;;  %522 = vperm.xlu0 %1093, %v448_v30   ;;  %v683_v29 = vadd.f32 %v682_v22, %v668_v23  ;;  %v669_v30 = vmul.f32 %v1400_v26, %v1400_v26  ;;  %v670_v42 = vmul.f32 %v1409_v33, %v1409_v33 }
  0x48   : > { %v684_v41 = vadd.f32 %v683_v29, %v669_v30 }
  0x4a   : > { %639 = vperm.xlu1 %1094, %v561_v31   ;;  %527 = vperm.xlu0 %1093, %v449_v32   ;;  %v685_v52 = vadd.f32 %v684_v41, %v670_v42 }
  0x4c   : > { %v686_v0 = vadd.f32 %v685_v52, %v671_v54 }
  0x4e   : > { %v687_v8 = vadd.f32 %v686_v0, %v672_v2 }
  0x50   : > { %v688_v15 = vadd.f32 %v687_v8, %v673_v10 }
  0x52   : > { %v689_v23 = vrot.slane %v688_v15, 4 }
  0x89   : > { %v565_v24 = vpop.permute.xlu1 %564  ;;  %v453_v25 = vpop.permute.xlu0 %452 }
  0x8a   : > { %v642_v27 = vmul.f32 %v565_v24, %v1298_v34  ;;  %v530_v29 = vmul.f32 %v453_v25, %v1298_v34 }
  0x8c   : > { %v695_v24 = vmul.f32 %v530_v29, %v530_v29  ;;  %v769_v25 = vmul.f32 %v530_v29, %v1305_v37 }
  0x8d   : > { %v570_v31 = vpop.permute.xlu1 %569  ;;  %v458_v32 = vpop.permute.xlu0 %457 }
  0x8e   : > { %v643_v20 = vmul.f32 %v570_v31, %v1302_v36  ;;  %v531_v22 = vmul.f32 %v458_v32, %v1302_v36  ;;  %v1448_v31 = vadd.f32 %v689_v23, %v688_v15  ;;  %v732_v36 = vmul.f32 %v642_v27, %v642_v27 }
  0x8f   : > { %v806_v32 = vmul.f32 %v642_v27, %v1305_v37 }
  0x90   : > { %v733_v42 = vmul.f32 %v643_v20, %v643_v20  ;;  %v807_v52 = vmul.f32 %v643_v20, %v1308_v38  ;;  %v696_v54 = vmul.f32 %v531_v22, %v531_v22 }
  0x91   : > { %v575_v44 = vpop.permute.xlu1 %574  ;;  %v463_v46 = vpop.permute.xlu0 %462 }
  0x92   : > { %v644_v30 = vmul.f32 %v575_v44, %v1312_v40  ;;  %v532_v49 = vmul.f32 %v463_v46, %v1312_v40  ;;  %v770_v44 = vmul.f32 %v531_v22, %v1308_v38  ;;  %v748_v8 = vadd.f32 %v733_v42, %v732_v36 }
  0x93   : > { %v822_v20 = vadd.f32 %v807_v52, %v806_v32  ;;  %v711_v23 = vadd.f32 %v696_v54, %v695_v24 }
  0x94   : > { %v734_v0 = vmul.f32 %v644_v30, %v644_v30  ;;  %v808_v40 = vmul.f32 %v644_v30, %v1319_v43  ;;  %v697_v10 = vmul.f32 %v532_v49, %v532_v49  ;;  %v771_v27 = vmul.f32 %v532_v49, %v1319_v43 }
  0x95   : > { %v580_v59 = vpop.permute.xlu1 %579  ;;  %v468_v61 = vpop.permute.xlu0 %467  ;;  %v785_v29 = vadd.f32 %v770_v44, %v769_v25 }
  0x96   : > { %v645_v56 = vmul.f32 %v580_v59, %v1323_v45  ;;  %v533_v34 = vmul.f32 %v468_v61, %v1323_v45  ;;  %v749_v30 = vadd.f32 %v748_v8, %v734_v0  ;;  %v823_v42 = vadd.f32 %v822_v20, %v808_v40 }
  0x97   : > { %v786_v49 = vadd.f32 %v785_v29, %v771_v27 }
  0x98   : > { %v735_v45 = vmul.f32 %v645_v56, %v645_v56  ;;  %v809_v37 = vmul.f32 %v645_v56, %v1328_v48  ;;  %v698_v61 = vmul.f32 %v533_v34, %v533_v34  ;;  %v772_v36 = vmul.f32 %v533_v34, %v1328_v48 }
  0x99   : > { %v585_v5 = vpop.permute.xlu1 %584  ;;  %v473_v7 = vpop.permute.xlu0 %472 }
  0x9a   : > { %v646_v59 = vmul.f32 %v585_v5, %v1332_v50  ;;  %v534_v15 = vmul.f32 %v473_v7, %v1332_v50  ;;  %v712_v50 = vadd.f32 %v711_v23, %v697_v10  ;;  %v750_v54 = vadd.f32 %v749_v30, %v735_v45 }
  0x9b   : > { %v824_v32 = vadd.f32 %v823_v42, %v809_v37  ;;  %v787_v25 = vadd.f32 %v786_v49, %v772_v36 }
  0x9c   : > { %v736_v7 = vmul.f32 %v646_v59, %v646_v59  ;;  %v699_v52 = vmul.f32 %v534_v15, %v534_v15  ;;  %v810_v56 = vmul.f32 %v646_v59, %v1337_v53  ;;  %v773_v48 = vmul.f32 %v534_v15, %v1337_v53 }
  0x9d   : > { %v590_v12 = vpop.permute.xlu1 %589  ;;  %v478_v13 = vpop.permute.xlu0 %477 }
  0x9e   : > { %v647_v38 = vmul.f32 %v590_v12, %v1341_v55  ;;  %v535_v22 = vmul.f32 %v478_v13, %v1341_v55  ;;  %v713_v55 = vadd.f32 %v712_v50, %v698_v61  ;;  %v825_v20 = vadd.f32 %v824_v32, %v810_v56 }
  0x9f   : > { %v788_v29 = vadd.f32 %v787_v25, %v773_v48 }
  0xa0   : > { %v737_v13 = vmul.f32 %v647_v38, %v647_v38  ;;  %v700_v24 = vmul.f32 %v535_v22, %v535_v22  ;;  %v714_v8 = vadd.f32 %v713_v55, %v699_v52  ;;  %v811_v10 = vmul.f32 %v647_v38, %v1346_v58 }
  0xa1   : > { %v595_v17 = vpop.permute.xlu1 %594  ;;  %v483_v18 = vpop.permute.xlu0 %482  ;;  %v774_v53 = vmul.f32 %v535_v22, %v1346_v58 }
  0xa2   : > { %v648_v43 = vmul.f32 %v595_v17, %v1350_v60  ;;  %v536_v12 = vmul.f32 %v483_v18, %v1350_v60  ;;  %v751_v17 = vadd.f32 %v750_v54, %v736_v7  ;;  %v715_v45 = vadd.f32 %v714_v8, %v700_v24 }
  0xa3   : > { %v826_v30 = vadd.f32 %v825_v20, %v811_v10  ;;  %v789_v22 = vadd.f32 %v788_v29, %v774_v53 }
  0xa4   : > { %v738_v59 = vmul.f32 %v648_v43, %v648_v43  ;;  %v701_v60 = vmul.f32 %v536_v12, %v536_v12  ;;  %v752_v27 = vadd.f32 %v751_v17, %v737_v13 }
  0xa5   : > { %v600_v35 = vpop.permute.xlu1 %599  ;;  %v488_v41 = vpop.permute.xlu0 %487 }
  0xa6   : > { %v649_v34 = vmul.f32 %v600_v35, %v1359_v1  ;;  %v537_v44 = vmul.f32 %v488_v41, %v1359_v1  ;;  %v812_v35 = vmul.f32 %v648_v43, %v1355_v63  ;;  %v753_v42 = vadd.f32 %v752_v27, %v738_v59 }
  0xa8   : > { %v739_v1 = vmul.f32 %v649_v34, %v649_v34  ;;  %v702_v41 = vmul.f32 %v537_v44, %v537_v44  ;;  %v827_v50 = vadd.f32 %v826_v30, %v812_v35 }
  0xa9   : > { %v605_v46 = vpop.permute.xlu1 %604  ;;  %v493_v2 = vpop.permute.xlu0 %492 }
  0xaa   : > { %v650_v18 = vmul.f32 %v605_v46, %v1368_v6  ;;  %v538_v23 = vmul.f32 %v493_v2, %v1368_v6  ;;  %v775_v46 = vmul.f32 %v536_v12, %v1355_v63  ;;  %v716_v6 = vadd.f32 %v715_v45, %v701_v60 }
  0xab   : > { %v813_v2 = vmul.f32 %v649_v34, %v1364_v4  ;;  %v754_v52 = vadd.f32 %v753_v42, %v739_v1  ;;  %v776_v63 = vmul.f32 %v537_v44, %v1364_v4 }
  0xac   : > { %v740_v36 = vmul.f32 %v650_v18, %v650_v18  ;;  %v703_v58 = vmul.f32 %v538_v23, %v538_v23  ;;  %v790_v56 = vadd.f32 %v789_v22, %v775_v46  ;;  %v814_v24 = vmul.f32 %v650_v18, %v1373_v9 }
  0xad   : > { %v610_v5 = vpop.permute.xlu1 %609  ;;  %v498_v3 = vpop.permute.xlu0 %497  ;;  %v828_v55 = vadd.f32 %v827_v50, %v813_v2 }
  0xae   : > { %v651_v15 = vmul.f32 %v610_v5, %v1377_v11  ;;  %v539_v37 = vmul.f32 %v498_v3, %v1377_v11  ;;  %v717_v11 = vadd.f32 %v716_v6, %v702_v41  ;;  %v755_v13 = vadd.f32 %v754_v52, %v740_v36 }
  0xaf   : > { %v791_v18 = vadd.f32 %v790_v56, %v776_v63  ;;  %v829_v27 = vadd.f32 %v828_v55, %v814_v24 }
  0xb0   : > { %v741_v3 = vmul.f32 %v651_v15, %v651_v15  ;;  %v704_v43 = vmul.f32 %v539_v37, %v539_v37  ;;  %v718_v25 = vadd.f32 %v717_v11, %v703_v58  ;;  %v815_v4 = vmul.f32 %v651_v15, %v1382_v14 }
  0xb1   : > { %v615_v0 = vpop.permute.xlu1 %614  ;;  %v503_v40 = vpop.permute.xlu0 %502  ;;  %v778_v45 = vmul.f32 %v539_v37, %v1382_v14 }
  0xb2   : > { %v652_v7 = vmul.f32 %v615_v0, %v1386_v16  ;;  %v540_v5 = vmul.f32 %v503_v40, %v1386_v16  ;;  %v777_v40 = vmul.f32 %v538_v23, %v1373_v9  ;;  %v756_v17 = vadd.f32 %v755_v13, %v741_v3 }
  0xb3   : > { %v719_v44 = vadd.f32 %v718_v25, %v704_v43  ;;  %v830_v41 = vadd.f32 %v829_v27, %v815_v4 }
  0xb4   : > { %v742_v48 = vmul.f32 %v652_v7, %v652_v7  ;;  %v705_v16 = vmul.f32 %v540_v5, %v540_v5  ;;  %v792_v1 = vadd.f32 %v791_v18, %v777_v40  ;;  %v779_v46 = vmul.f32 %v540_v5, %v1391_v19 }
  0xb5   : > { %v620_v61 = vpop.permute.xlu1 %619  ;;  %v508_v38 = vpop.permute.xlu0 %507 }
  0xb6   : > { %v653_v12 = vmul.f32 %v620_v61, %v1395_v21  ;;  %v541_v32 = vmul.f32 %v508_v38, %v1395_v21  ;;  %v757_v53 = vadd.f32 %v756_v17, %v742_v48  ;;  %v720_v9 = vadd.f32 %v719_v44, %v705_v16  ;;  %v1544_v44 = vld [vmem:[#allocation2_spill] sm:$0xff] }
  0xb7   : > { %v691_v38 = vrot.slane %v1448_v31, 2  ;;  %v793_v2 = vadd.f32 %v792_v1, %v778_v45 }
  0xb8   : > { %v743_v21 = vmul.f32 %v653_v12, %v653_v12  ;;  %v706_v59 = vmul.f32 %v541_v32, %v541_v32  ;;  %v817_v14 = vmul.f32 %v653_v12, %v1400_v26  ;;  %v780_v50 = vmul.f32 %v541_v32, %v1400_v26 }
  0xb9   : > { %v625_v49 = vpop.permute.xlu1 %624  ;;  %v513_v54 = vpop.permute.xlu0 %512  ;;  %v794_v56 = vadd.f32 %v793_v2, %v779_v46  ;;  %v692_v4 = vadd.f32 %v691_v38, %v1448_v31 }
  0xba   : > { %v654_v34 = vmul.f32 %v625_v49, %v1404_v28  ;;  %v542_v0 = vmul.f32 %v513_v54, %v1404_v28  ;;  %v816_v28 = vmul.f32 %v652_v7, %v1391_v19  ;;  %v758_v29 = vadd.f32 %v757_v53, %v743_v21 }
  0xbb   : > { %v721_v30 = vadd.f32 %v720_v9, %v706_v59  ;;  %v795_v24 = vadd.f32 %v794_v56, %v780_v50  ;;  %v693_v27 = vrot.slane %v692_v4, 1 }
  0xbc   : > { %v744_v23 = vmul.f32 %v654_v34, %v654_v34  ;;  %v707_v35 = vmul.f32 %v542_v0, %v542_v0  ;;  %v831_v36 = vadd.f32 %v830_v41, %v816_v28  ;;  %v818_v7 = vmul.f32 %v654_v34, %v1409_v33 }
  0xbd   : > { %v630_v8 = vpop.permute.xlu1 %629  ;;  %v518_v10 = vpop.permute.xlu0 %517  ;;  %v781_v63 = vmul.f32 %v542_v0, %v1409_v33  ;;  %v694_v31 = vadd.f32 %v693_v27, %v692_v4 }
  0xbe   : > { %v655_v20 = vmul.f32 %v630_v8, %v1413_v39  ;;  %v543_v60 = vmul.f32 %v518_v10, %v1413_v39  ;;  %v759_v58 = vadd.f32 %v758_v29, %v744_v23  ;;  %v722_v22 = vadd.f32 %v721_v30, %v707_v35 }
  0xbf   : > { %v796_v17 = vadd.f32 %v795_v24, %v781_v63 }
  0xc0   : > { %v745_v42 = vmul.f32 %v655_v20, %v655_v20  ;;  %v708_v39 = vmul.f32 %v543_v60, %v543_v60  ;;  %v819_v12 = vmul.f32 %v655_v20, %v1418_v47  ;;  %v782_v25 = vmul.f32 %v543_v60, %v1418_v47 }
  0xc1   : > { %v635_v15 = vpop.permute.xlu1 %634  ;;  %v523_v61 = vpop.permute.xlu0 %522 }
  0xc2   : > { %v656_v37 = vmul.f32 %v635_v15, %v1422_v51  ;;  %v544_v6 = vmul.f32 %v523_v61, %v1422_v51  ;;  %v760_v49 = vadd.f32 %v759_v58, %v745_v42  ;;  %v723_v19 = vadd.f32 %v722_v22, %v708_v39 }
  0xc3   : > { %v832_v51 = vadd.f32 %v831_v36, %v817_v14  ;;  %v797_v21 = vadd.f32 %v796_v17, %v782_v25 }
  0xc4   : > { %v746_v52 = vmul.f32 %v656_v37, %v656_v37  ;;  %v709_v11 = vmul.f32 %v544_v6, %v544_v6  ;;  %v820_v16 = vmul.f32 %v656_v37, %v1431_v62 }
  0xc5   : > { %v640_v3 = vpop.permute.xlu1 %639  ;;  %v528_v43 = vpop.permute.xlu0 %527  ;;  %v833_v48 = vadd.f32 %v832_v51, %v818_v7 }
  0xc6   : > { %v657_v5 = vmul.f32 %v640_v3, %v1428_v57  ;;  %v545_v54 = vmul.f32 %v528_v43, %v1428_v57  ;;  %v761_v55 = vadd.f32 %v760_v49, %v746_v52  ;;  %v724_v26 = vadd.f32 %v723_v19, %v709_v11 }
  0xc7   : > { %v783_v57 = vmul.f32 %v544_v6, %v1431_v62  ;;  %v834_v33 = vadd.f32 %v833_v48, %v819_v12  ;;  %v1124_v19 = vmov 0.0  }
  0xc8   : > { %v747_v32 = vmul.f32 %v657_v5, %v657_v5  ;;  %v710_v13 = vmul.f32 %v545_v54, %v545_v54  ;;  %v821_v8 = vmul.f32 %v657_v5, %v1544_v44  ;;  %v784_v59 = vmul.f32 %v545_v54, %v1544_v44 }
  0xc9   : > { %v835_v20 = vadd.f32 %v834_v33, %v820_v16  ;;  %v798_v18 = vadd.f32 %v797_v21, %v783_v57 }
  0xca   : > { %v762_v34 = vadd.f32 %v761_v55, %v747_v32  ;;  %v725_v40 = vadd.f32 %v724_v26, %v710_v13 }
  0xcb   : > { %v836_v28 = vadd.f32 %v835_v20, %v821_v8  ;;  %v799_v9 = vadd.f32 %v798_v18, %v784_v59 }
  0xcc   : > { %v763_v0 = vrot.slane %v762_v34, 4  ;;  %v726_v10 = vrot.slane %v725_v40, 4 }
  0xcd   : > { %v837_v1 = vrot.slane %v836_v28, 4  ;;  %v800_v15 = vrot.slane %v799_v9, 4 }
  0xce   : > { %v764_v47 = vadd.f32 %v763_v0, %v762_v34  ;;  %v727_v60 = vadd.f32 %v726_v10, %v725_v40 }
  0xcf   : > { %v838_v29 = vadd.f32 %v837_v1, %v836_v28  ;;  %v801_v39 = vadd.f32 %v800_v15, %v799_v9 }
  0xd0   : > { %v765_v45 = vrot.slane %v764_v47, 2  ;;  %v728_v53 = vrot.slane %v727_v60, 2 }
  0xd1   : > { %v839_v37 = vrot.slane %v838_v29, 2  ;;  %v802_v6 = vrot.slane %v801_v39, 2 }
  0xd2   : > { %v766_v62 = vadd.f32 %v765_v45, %v764_v47  ;;  %v729_v23 = vadd.f32 %v728_v53, %v727_v60 }
  0xd3   : > { %v840_v2 = vadd.f32 %v839_v37, %v838_v29  ;;  %v803_v36 = vadd.f32 %v802_v6, %v801_v39 }
  0xd4   : > { %v767_v35 = vrot.slane %v766_v62, 1  ;;  %v730_v41 = vrot.slane %v729_v23, 1 }
  0xd5   : > { %v841_v58 = vrot.slane %v840_v2, 1  ;;  %v804_v22 = vrot.slane %v803_v36, 1 }
  0xd6   : > { %v768_v61 = vadd.f32 %v767_v35, %v766_v62  ;;  %v731_v38 = vadd.f32 %v730_v41, %v729_v23 }
  0xd7   : > { %v842_v50 = vadd.f32 %v841_v58, %v840_v2  ;;  %v805_v52 = vadd.f32 %v804_v22, %v803_v36 }
  0xd8   : > { %v847_v30 = vmul.f32 %v768_v61, %v694_v31  ;;  %v843_v42 = vmul.f32 %v731_v38, %v694_v31 }
  0xda   : > { %v848_v46 = vmax.f32 %v847_v30, 1e-16  ;;  %v844_v14 = vmax.f32 %v843_v42, 1e-16 }
  0xdc   : > { %1095 = vrsqrt.f32 %v848_v46 }
  0xdd   : > { %1097 = vrsqrt.f32 %v844_v14 }
  0xe9   : > { %v1096_v7 = vpop.eup %1095 }
  0xea   : > { %v1098_v11 = vpop.eup %1097  ;;  %v850_v3 = vmul.f32 %v1096_v7, %v842_v50 }
  0xeb   : > { %v846_v43 = vmul.f32 %v1098_v11, %v805_v52 }
  0xec   : > { %852 = vst [vmem:[%s373_s21] sm:$0x1] %v850_v3 }
  0xed   : > { %851 = vst [vmem:[%s367_s28] sm:$0x1] %v846_v43  ;;  %vm853_vm0 = vcmp.gt.f32.partialorder %v850_v3, %v846_v43  ;;  %v857_v49 = vmax.f32 %v846_v43, %v850_v3 }
  0xee   : > { %v1062_v5 = vsel %vm853_vm0, 1.0, %v1124_v19 }
  0xef   : > { %856 = vst [vmem:[%s379_s8] sm:$0x1] %v1062_v5  ;;  %858 = vst [vmem:[%s385_s11] sm:$0x1] %v857_v49 }
  0xf0 PF: > { %s18_s26 = sadd.s32 1, %s1121_s26   ;;  %s1545_s24 = smov %s1117_s25 }
  0xf1   : > { %p15_p5 = scmp.ge.s32.totalorder %s18_s26, 5   ;;  %s1546_s25 = smov %s1548_s27 }
  0xf3   :  { %17 = sbr.rel (!%p15_p5) target bundleno = 2 (0x2), region = 105 }

// kernel: semantic_layer_forward.5
= control target key start
LH: loop header
LB: loop body
LE: loop exit
PB: predicated region body
PF: predicated region fallthrough
CT: control target
= control target key end

     0   :  { %s1542_s0 = inlined_call_operand.vmem [shape: s32[3,2], index: 0, kind: input, shape index: {}]   ;;  %s1543_s1 = inlined_call_operand.vmem [shape: bf16[3,128,128], index: 1, kind: input, shape index: {}]   ;;  %s1544_s2 = inlined_call_operand.vmem [shape: f32[2,128,128], index: 2, kind: input, shape index: {}]   ;;  %s1545_s3 = inlined_call_operand.vmem [shape: bf16[3,128,128], index: 3, kind: input, shape index: {}]   ;;  %s1546_s4 = inlined_call_operand.vmem [shape: bf16[3,128,128], index: 4, kind: input, shape index: {}]   ;;  %s1547_s5 = inlined_call_operand.vmem [shape: f32[3,1,128], index: 5, kind: input, shape index: {}]   ;;  %s1548_s6 = inlined_call_operand.vmem [shape: f32[3,128,128], index: 6, kind: output, shape index: {}]  }
   0x1   :  { %s11_s23 = sshll.u32 %s1542_s0, 4  ;;  %s12_s23 = int_to_ptr.vmem [resolvable:$true] %s11_s23 }
   0x2   :  { %s1253_s24 = scalar_lea.vmem %s12_s23, 64  ;;  %p1258_p1 = scmp.lt.s32.totalorder %s12_s23, %s12_s23 }
   0x3   :  { %p1254_p0 = scmp.ne.s32.totalorder %s12_s23, %s1253_s24  ;;  %p1259_p2 = scmp.lt.s32.totalorder %s1253_s24, %s1253_s24 }
   0x5   :  { %p1260_p3 = por %p1259_p2, %p1258_p1 }
   0x7   :  { %p1261_p4 = pnand %p1260_p3, %p1254_p0 }
   0x9   :  { %1264 = shalt.err (!%p1261_p4)  }
   0xa   :  { %s1291_s25 = smov [#allocation3]  }
   0xb   :  { %14 = dma.vmem_to_smem %s12_s23, 64, %s1291_s25, [#allocation2] }
   0xc   :  { %1277 = dma.done.wait [#allocation2], 64 }
   0xd   :  { %1278 = vsyncadd [#allocation2], 4294967232 }
   0xe   :  { %16 = sfence }
   0xf   :  { %s1330_s26 = smov 0   ;;  %s1332_s27 = smov 0  }
  0x10   :  { %s1334_s28 = smov 0  }
  0x11 LB: > { %s34_s0 = sadd.s32 1, %s1285_s27  ;;  %p1029_p5 = scmp.ge.s32.totalorder %s1289_s28, 1  ;;  %s1289_s28 = sphi %s1334_s28, %s22_s28   ;;  %s1285_s27 = sphi %s1332_s27, %s1550_s27   ;;  %s1281_s26 = sphi %s1330_s26, %s1549_s26  }
  0x12   : > { %p36_p6 = scmp.ge.s32.totalorder %s34_s0, 3  ;;  %p268_p7 = scmp.lt.s32.totalorder %s1289_s28, 4 }
  0x14   : > { %s1552_s0 = smov (%p36_p6, %s34_s0), 0  ;;  %p269_p8 = pnand %p1029_p5, %p268_p7 }
  0x15   : > { %p329_p9 = scmp.lt.s32.totalorder (!%p269_p8), %s1281_s26, 2  ;;  %s1032_s29 = sshll.u32 (!%p269_p8), %s1281_s26, 7 }
  0x16   : > { %272 = sbr.rel (%p269_p8) target bundleno = 540 (0x21c), region = 40  ;;  %s339_s30 = sld [smem:[#allocation3 + %s1032_s29]] (!%p269_p8) }
  0x1b   : > { %s1355_s7 = scalar_select %p329_p9, %s1281_s26, 2 }
  0x1c   : > { %p341_p10 = scmp.lt.s32.totalorder %s339_s30, 1 }
  0x1d   : > { %s1071_s8 = sshll.u32 %s1355_s7, 6  ;;  %s1075_s9 = sshll.u32 %s1355_s7, 7 }
  0x1e   : > { %s1362_s12 = scalar_lea.vmem %s1545_s3, %s1071_s8  ;;  %s1367_s15 = scalar_lea.vmem %s1546_s4, %s1071_s8 }
  0x1f   : > { %s1372_s18 = scalar_lea.vmem %s1548_s6, %s1075_s9  ;;  %v1229_v0 = vld [vmem:[%s1362_s12 + $0x38] sm:$0xff]   ;;  %v1230_v1 = vld [vmem:[%s1362_s12 + $0x30] sm:$0xff]   ;;  %s1554_s30 = smov (!%p341_p10, %s339_s30), 1  ;;  %v1231_v2 = vld [vmem:[%s1362_s12 + $0x28] sm:$0xff]  }
  0x20   : > { %1108 = vmatprep.subr.bf16.mxu0 %v1229_v0  ;;  %1172 = vmatprep.subr.bf16.mxu1 %v1229_v0  ;;  %s1072_s19 = sshll.u32 %s1554_s30, 7  ;;  %s1380_s22 = scalar_lea.vmem %s1543_s1, %s1071_s8  ;;  %v1232_v3 = vld [vmem:[%s1362_s12 + $0x20] sm:$0xff]   ;;  %v1233_v6 = vld [vmem:[%s1362_s12 + $0x18] sm:$0xff]   ;;  %v1234_v7 = vld [vmem:[%s1362_s12 + $0x10] sm:$0xff]  }
  0x21   : > { %1109 = vmatpush3.bf16.msra.mxu0 %v1229_v0  ;;  %1180 = vmatpush3.bf16.msra.mxu1 %v1229_v0  ;;  %s1385_s25 = scalar_lea.vmem %s1544_s2, %s1072_s19  ;;  %v1237_v4 = vld [vmem:[%s1380_s22] sm:$0xff]   ;;  %v1235_v8 = vld [vmem:[%s1362_s12 + $0x8] sm:$0xff]   ;;  %v1241_v12 = vld [vmem:[%s1380_s22 + $0x10] sm:$0xff]   ;;  %s1402_s30 = sadd.s32 1, %s1032_s29 }
  0x22   : > { %1110 = vmatprep.subr.bf16.mxu0 %v1230_v1  ;;  %1173 = vmatprep.subr.bf16.mxu1 %v1230_v1  ;;  %v1238_v5 = vld [vmem:[%s1380_s22 + $0x20] sm:$0xff]   ;;  %v1239_v10 = vld [vmem:[%s1380_s22 + $0x8] sm:$0xff]   ;;  %v1242_v13 = vld [vmem:[%s1380_s22 + $0x30] sm:$0xff]   ;;  %s1405_s8 = sld [smem:[#allocation3 + %s1402_s30]]  ;;  %s364_s11 = scalar_lea.vmem %s1547_s5, %s1355_s7 }
  0x23   : > { %1124 = vmatprep.mubr.bf16.mxu0 %v1237_v4  ;;  %1132 = vmatprep.mubr.bf16.mxu1 %v1238_v5  ;;  %v1236_v9 = vld [vmem:[%s1362_s12] sm:$0xff]   ;;  %v1240_v11 = vld [vmem:[%s1380_s22 + $0x28] sm:$0xff]   ;;  %v1243_v14 = vld [vmem:[%s1380_s22 + $0x18] sm:$0xff]  }
  0x24   : > { %v1244_v15 = vld [vmem:[%s1380_s22 + $0x38] sm:$0xff]   ;;  %v1041_v16 = vld [vmem:[%s364_s11] ss:$0 sm:$0xff] }
  0x25   : > { %1111 = vmatpush3.bf16.msra.mxu0 %v1230_v1  ;;  %1181 = vmatpush3.bf16.msra.mxu1 %v1230_v1 }
  0x26   : > { %1112 = vmatprep.subr.bf16.mxu0 %v1231_v2  ;;  %1174 = vmatprep.subr.bf16.mxu1 %v1231_v2 }
  0x28   : > { %p1059_p11 = scmp.ne.s32.totalorder %s1405_s8, 1 }
  0x29   : > { %1113 = vmatpush3.bf16.msra.mxu0 %v1231_v2  ;;  %1182 = vmatpush3.bf16.msra.mxu1 %v1231_v2 }
  0x2a   : > { %1114 = vmatprep.subr.bf16.mxu0 %v1232_v3  ;;  %1175 = vmatprep.subr.bf16.mxu1 %v1232_v3 }
  0x2d   : > { %1115 = vmatpush3.bf16.msra.mxu0 %v1232_v3  ;;  %1183 = vmatpush3.bf16.msra.mxu1 %v1232_v3 }
  0x2e   : > { %1116 = vmatprep.subr.bf16.mxu0 %v1233_v6  ;;  %1176 = vmatprep.subr.bf16.mxu1 %v1233_v6 }
  0x31   : > { %1117 = vmatpush3.bf16.msra.mxu0 %v1233_v6  ;;  %1184 = vmatpush3.bf16.msra.mxu1 %v1233_v6 }
  0x32   : > { %1118 = vmatprep.subr.bf16.mxu0 %v1234_v7  ;;  %1177 = vmatprep.subr.bf16.mxu1 %v1234_v7 }
  0x35   : > { %1119 = vmatpush3.bf16.msra.mxu0 %v1234_v7  ;;  %1185 = vmatpush3.bf16.msra.mxu1 %v1234_v7 }
  0x36   : > { %1120 = vmatprep.subr.bf16.mxu0 %v1235_v8  ;;  %1178 = vmatprep.subr.bf16.mxu1 %v1235_v8 }
  0x39   : > { %1121 = vmatpush3.bf16.msra.mxu0 %v1235_v8  ;;  %1186 = vmatpush3.bf16.msra.mxu1 %v1235_v8 }
  0x3a   : > { %1122 = vmatprep.subr.bf16.mxu0 %v1236_v9  ;;  %1179 = vmatprep.subr.bf16.mxu1 %v1236_v9 }
  0x3d   : > { %1123 = vmatpush3.bf16.msra.mxu0 %v1236_v9  ;;  %1187 = vmatpush3.bf16.msra.mxu1 %v1236_v9 }
  0x40   : > { %1125 = vmatmul.mubr.bf16.vlgmr.msra.gmra.mxu0 %v1239_v10  ;;  %1133 = vmatmul.mubr.bf16.vlgmr.msra.gmra.mxu1 %v1240_v11 }
  0x41   : > { %1128 = vmatprep.mubr.bf16.mxu0 %v1241_v12  ;;  %1136 = vmatprep.mubr.bf16.mxu1 %v1242_v13 }
  0x48   : > { %1129 = vmatmul.mubr.bf16.gmra.mxu0 %v1243_v14  ;;  %1137 = vmatmul.mubr.bf16.gmra.mxu1 %v1244_v15 }
 0x100   : > { %v1126_v17 = vpop.f32.mrf.mxu0  ;;  %v1134_v18 = vpop.f32.mrf.mxu1 }
 0x101   : > { %v1411_v19 = vadd.f32 %v1126_v17, %v1041_v16  ;;  %v1413_v20 = vadd.f32 %v1134_v18, %v1041_v16 }
 0x102   : > { %v545_v21 = vpop.f32.mrf.mxu0  ;;  %v577_v22 = vpop.f32.mrf.mxu1 }
 0x103   : > { %v1415_v23 = vadd.f32 %v1041_v16, %v545_v21  ;;  %v1417_v24 = vadd.f32 %v1041_v16, %v577_v22 }
 0x104   : > { %v1127_v25 = vpop.f32.mrf.mxu0  ;;  %v1135_v26 = vpop.f32.mrf.mxu1 }
 0x105   : > { %v1419_v27 = vadd.f32 %v1127_v25, %v1041_v16  ;;  %v1421_v28 = vadd.f32 %v1135_v26, %v1041_v16 }
 0x106   : > { %v548_v29 = vpop.f32.mrf.mxu0  ;;  %v580_v30 = vpop.f32.mrf.mxu1 }
 0x107   : > { %v1423_v31 = vadd.f32 %v1041_v16, %v548_v29  ;;  %v1425_v32 = vadd.f32 %v1041_v16, %v580_v30 }
 0x108   : > { %v1130_v33 = vpop.f32.mrf.mxu0  ;;  %v1138_v34 = vpop.f32.mrf.mxu1 }
 0x109   : > { %v1427_v35 = vadd.f32 %v1130_v33, %v1041_v16  ;;  %v1429_v36 = vadd.f32 %v1138_v34, %v1041_v16 }
 0x10a   : > { %v561_v37 = vpop.f32.mrf.mxu0  ;;  %v593_v38 = vpop.f32.mrf.mxu1 }
 0x10b   : > { %v1431_v39 = vadd.f32 %v1041_v16, %v561_v37  ;;  %v1433_v40 = vadd.f32 %v1041_v16, %v593_v38  ;;  %614 = sbr.rel (%p1059_p11) target bundleno = 517 (0x205), region = 44 }
 0x10c   : > { %v1131_v41 = vpop.f32.mrf.mxu0  ;;  %v1139_v42 = vpop.f32.mrf.mxu1 }
 0x10d   : > { %v1435_v43 = vadd.f32 %v1131_v41, %v1041_v16  ;;  %v1437_v44 = vadd.f32 %v1139_v42, %v1041_v16 }
 0x10e   : > { %v564_v45 = vpop.f32.mrf.mxu0  ;;  %v596_v46 = vpop.f32.mrf.mxu1 }
 0x10f   : > { %v1439_v47 = vadd.f32 %v1041_v16, %v564_v45  ;;  %v1441_v48 = vadd.f32 %v1041_v16, %v596_v46 }
 0x110   : > { %v1245_v49 = vld [vmem:[%s1367_s15 + $0x38] sm:$0xff]   ;;  %v1246_v50 = vld [vmem:[%s1367_s15 + $0x30] sm:$0xff]   ;;  %v1247_v51 = vld [vmem:[%s1367_s15 + $0x28] sm:$0xff]  }
 0x111   : > { %1140 = vmatprep.subr.bf16.mxu0 %v1245_v49  ;;  %1188 = vmatprep.subr.bf16.mxu1 %v1245_v49  ;;  %v1248_v52 = vld [vmem:[%s1367_s15 + $0x20] sm:$0xff]   ;;  %v616_v54 = vld [vmem:[%s1385_s25 + $0x8] sm:$0xff]  ;;  %v1249_v59 = vld [vmem:[%s1367_s15 + $0x18] sm:$0xff]  }
 0x112   : > { %1141 = vmatpush3.bf16.msra.mxu0 %v1245_v49  ;;  %1196 = vmatpush3.bf16.msra.mxu1 %v1245_v49  ;;  %v615_v53 = vld [vmem:[%s1385_s25] sm:$0xff]  ;;  %v624_v57 = vld [vmem:[%s1385_s25 + $0x48] sm:$0xff]  ;;  %v1250_v60 = vld [vmem:[%s1367_s15 + $0x10] sm:$0xff]  }
 0x113   : > { %1142 = vmatprep.subr.bf16.mxu0 %v1246_v50  ;;  %1189 = vmatprep.subr.bf16.mxu1 %v1246_v50  ;;  %v623_v55 = vld [vmem:[%s1385_s25 + $0x40] sm:$0xff]  ;;  %v631_v56 = vpack.c.bf16 %v616_v54, %v615_v53  ;;  %v1251_v61 = vld [vmem:[%s1367_s15 + $0x8] sm:$0xff]   ;;  %v617_v63 = vld [vmem:[%s1385_s25 + $0x10] sm:$0xff] }
 0x114   : > { %v635_v58 = vpack.c.bf16 %v624_v57, %v623_v55  ;;  %v1252_v62 = vld [vmem:[%s1367_s15] sm:$0xff]   ;;  %v618_v0 = vld [vmem:[%s1385_s25 + $0x18] sm:$0xff]  ;;  %v625_v1 = vld [vmem:[%s1385_s25 + $0x50] sm:$0xff] }
 0x115   : > { %1156 = vmatprep.mubr.bf16.mxu0 %v631_v56  ;;  %v626_v2 = vld [vmem:[%s1385_s25 + $0x58] sm:$0xff]  ;;  %v619_v3 = vld [vmem:[%s1385_s25 + $0x20] sm:$0xff]  ;;  %v620_v4 = vld [vmem:[%s1385_s25 + $0x28] sm:$0xff]  ;;  %v632_v7 = vpack.c.bf16 %v618_v0, %v617_v63 }
 0x116   : > { %1143 = vmatpush3.bf16.msra.mxu0 %v1246_v50  ;;  %1197 = vmatpush3.bf16.msra.mxu1 %v1246_v50  ;;  %v627_v5 = vld [vmem:[%s1385_s25 + $0x60] sm:$0xff]  ;;  %v628_v6 = vld [vmem:[%s1385_s25 + $0x68] sm:$0xff]  ;;  %v636_v8 = vpack.c.bf16 %v626_v2, %v625_v1  ;;  %v633_v9 = vpack.c.bf16 %v620_v4, %v619_v3  ;;  %v621_v11 = vld [vmem:[%s1385_s25 + $0x30] sm:$0xff] }
 0x117   : > { %1144 = vmatprep.subr.bf16.mxu0 %v1247_v51  ;;  %1190 = vmatprep.subr.bf16.mxu1 %v1247_v51  ;;  %v637_v10 = vpack.c.bf16 %v628_v6, %v627_v5  ;;  %v622_v12 = vld [vmem:[%s1385_s25 + $0x38] sm:$0xff]  ;;  %v629_v13 = vld [vmem:[%s1385_s25 + $0x70] sm:$0xff] }
 0x118   : > { %1164 = vmatprep.mubr.bf16.mxu1 %v635_v58  ;;  %v630_v14 = vld [vmem:[%s1385_s25 + $0x78] sm:$0xff]  ;;  %v634_v15 = vpack.c.bf16 %v622_v12, %v621_v11 }
 0x119   : > { %v638_v16 = vpack.c.bf16 %v630_v14, %v629_v13 }
 0x11a   : > { %1145 = vmatpush3.bf16.msra.mxu0 %v1247_v51  ;;  %1198 = vmatpush3.bf16.msra.mxu1 %v1247_v51 }
 0x11b   : > { %1146 = vmatprep.subr.bf16.mxu0 %v1248_v52  ;;  %1191 = vmatprep.subr.bf16.mxu1 %v1248_v52 }
 0x11e   : > { %1147 = vmatpush3.bf16.msra.mxu0 %v1248_v52  ;;  %1199 = vmatpush3.bf16.msra.mxu1 %v1248_v52 }
 0x11f   : > { %1148 = vmatprep.subr.bf16.mxu0 %v1249_v59  ;;  %1192 = vmatprep.subr.bf16.mxu1 %v1249_v59 }
 0x122   : > { %1149 = vmatpush3.bf16.msra.mxu0 %v1249_v59  ;;  %1200 = vmatpush3.bf16.msra.mxu1 %v1249_v59 }
 0x123   : > { %1150 = vmatprep.subr.bf16.mxu0 %v1250_v60  ;;  %1193 = vmatprep.subr.bf16.mxu1 %v1250_v60 }
 0x126   : > { %1151 = vmatpush3.bf16.msra.mxu0 %v1250_v60  ;;  %1201 = vmatpush3.bf16.msra.mxu1 %v1250_v60 }
 0x127   : > { %1152 = vmatprep.subr.bf16.mxu0 %v1251_v61  ;;  %1194 = vmatprep.subr.bf16.mxu1 %v1251_v61 }
 0x12a   : > { %1153 = vmatpush3.bf16.msra.mxu0 %v1251_v61  ;;  %1202 = vmatpush3.bf16.msra.mxu1 %v1251_v61 }
 0x12b   : > { %1154 = vmatprep.subr.bf16.mxu0 %v1252_v62  ;;  %1195 = vmatprep.subr.bf16.mxu1 %v1252_v62 }
 0x12e   : > { %1155 = vmatpush3.bf16.msra.mxu0 %v1252_v62  ;;  %1203 = vmatpush3.bf16.msra.mxu1 %v1252_v62 }
 0x131   : > { %1157 = vmatmul.mubr.bf16.vlgmr.msra.gmra.mxu0 %v632_v7  ;;  %1165 = vmatmul.mubr.bf16.vlgmr.msra.gmra.mxu1 %v636_v8 }
 0x132   : > { %1160 = vmatprep.mubr.bf16.mxu0 %v633_v9  ;;  %1168 = vmatprep.mubr.bf16.mxu1 %v637_v10 }
 0x139   : > { %1161 = vmatmul.mubr.bf16.gmra.mxu0 %v634_v15  ;;  %1169 = vmatmul.mubr.bf16.gmra.mxu1 %v638_v16 }
 0x1f1   : > { %v1158_v17 = vpop.f32.mrf.mxu0  ;;  %v1166_v18 = vpop.f32.mrf.mxu1 }
 0x1f2   : > { %v802_v21 = vadd.f32 %v1158_v17, %v1411_v19  ;;  %v810_v22 = vadd.f32 %v1166_v18, %v1413_v20 }
 0x1f3   : > { %v737_v25 = vpop.f32.mrf.mxu0  ;;  %v769_v26 = vpop.f32.mrf.mxu1 }
 0x1f4   : > { %v818_v29 = vmax.f32 %v802_v21, 0.0  ;;  %v826_v30 = vmax.f32 %v810_v22, 0.0  ;;  %v800_v33 = vadd.f32 %v737_v25, %v1415_v23  ;;  %v808_v34 = vadd.f32 %v769_v26, %v1417_v24 }
 0x1f5   : > { %v1159_v37 = vpop.f32.mrf.mxu0  ;;  %v1167_v38 = vpop.f32.mrf.mxu1 }
 0x1f6   : > { %834 = vst [vmem:[%s1372_s18 + $0x10] sm:$0xff] %v818_v29  ;;  %842 = vst [vmem:[%s1372_s18 + $0x50] sm:$0xff] %v826_v30  ;;  %v816_v41 = vmax.f32 %v800_v33, 0.0  ;;  %v824_v42 = vmax.f32 %v808_v34, 0.0  ;;  %v803_v45 = vadd.f32 %v1159_v37, %v1419_v27  ;;  %v811_v46 = vadd.f32 %v1167_v38, %v1421_v28 }
 0x1f7   : > { %v740_v49 = vpop.f32.mrf.mxu0  ;;  %v772_v50 = vpop.f32.mrf.mxu1 }
 0x1f8   : > { %832 = vst [vmem:[%s1372_s18] sm:$0xff] %v816_v41  ;;  %840 = vst [vmem:[%s1372_s18 + $0x40] sm:$0xff] %v824_v42  ;;  %v819_v51 = vmax.f32 %v803_v45, 0.0  ;;  %v827_v52 = vmax.f32 %v811_v46, 0.0  ;;  %v801_v53 = vadd.f32 %v740_v49, %v1423_v31  ;;  %v809_v54 = vadd.f32 %v772_v50, %v1425_v32 }
 0x1f9   : > { %v1162_v55 = vpop.f32.mrf.mxu0  ;;  %v1170_v56 = vpop.f32.mrf.mxu1 }
 0x1fa   : > { %835 = vst [vmem:[%s1372_s18 + $0x18] sm:$0xff] %v819_v51  ;;  %843 = vst [vmem:[%s1372_s18 + $0x58] sm:$0xff] %v827_v52  ;;  %v817_v57 = vmax.f32 %v801_v53, 0.0  ;;  %v825_v58 = vmax.f32 %v809_v54, 0.0  ;;  %v806_v59 = vadd.f32 %v1162_v55, %v1427_v35  ;;  %v814_v60 = vadd.f32 %v1170_v56, %v1429_v36 }
 0x1fb   : > { %v753_v61 = vpop.f32.mrf.mxu0  ;;  %v785_v62 = vpop.f32.mrf.mxu1 }
 0x1fc   : > { %833 = vst [vmem:[%s1372_s18 + $0x8] sm:$0xff] %v817_v57  ;;  %841 = vst [vmem:[%s1372_s18 + $0x48] sm:$0xff] %v825_v58  ;;  %v822_v63 = vmax.f32 %v806_v59, 0.0  ;;  %v830_v0 = vmax.f32 %v814_v60, 0.0  ;;  %v804_v1 = vadd.f32 %v753_v61, %v1431_v39  ;;  %v812_v2 = vadd.f32 %v785_v62, %v1433_v40 }
 0x1fd   : > { %v1163_v3 = vpop.f32.mrf.mxu0  ;;  %v1171_v4 = vpop.f32.mrf.mxu1 }
 0x1fe   : > { %838 = vst [vmem:[%s1372_s18 + $0x30] sm:$0xff] %v822_v63  ;;  %846 = vst [vmem:[%s1372_s18 + $0x70] sm:$0xff] %v830_v0  ;;  %v820_v5 = vmax.f32 %v804_v1, 0.0  ;;  %v828_v6 = vmax.f32 %v812_v2, 0.0  ;;  %v807_v7 = vadd.f32 %v1163_v3, %v1435_v43  ;;  %v815_v8 = vadd.f32 %v1171_v4, %v1437_v44 }
 0x1ff   : > { %v756_v9 = vpop.f32.mrf.mxu0  ;;  %v788_v10 = vpop.f32.mrf.mxu1 }
 0x200   : > { %836 = vst [vmem:[%s1372_s18 + $0x20] sm:$0xff] %v820_v5  ;;  %844 = vst [vmem:[%s1372_s18 + $0x60] sm:$0xff] %v828_v6  ;;  %v823_v11 = vmax.f32 %v807_v7, 0.0  ;;  %v831_v12 = vmax.f32 %v815_v8, 0.0  ;;  %v805_v13 = vadd.f32 %v756_v9, %v1439_v47  ;;  %v813_v14 = vadd.f32 %v788_v10, %v1441_v48 }
 0x202   : > { %839 = vst [vmem:[%s1372_s18 + $0x38] sm:$0xff] %v823_v11  ;;  %847 = vst [vmem:[%s1372_s18 + $0x78] sm:$0xff] %v831_v12  ;;  %v821_v15 = vmax.f32 %v805_v13, 0.0  ;;  %v829_v16 = vmax.f32 %v813_v14, 0.0 }
 0x204   : > { %837 = vst [vmem:[%s1372_s18 + $0x28] sm:$0xff] %v821_v15  ;;  %845 = vst [vmem:[%s1372_s18 + $0x68] sm:$0xff] %v829_v16 }
 0x205 PF: > { %s848_s26 = sld [smem:[#allocation3 + %s1402_s30]] }
 0x20b   : > { %p1068_p12 = scmp.ne.s32.totalorder %s848_s26, 0 }
 0x20d   : > { %852 = sbr.rel (%p1068_p12) target bundleno = 540 (0x21c), region = 48 }
 0x212   : > { %v853_v17 = vmax.f32 %v1415_v23, 0.0  ;;  %v854_v18 = vmax.f32 %v1423_v31, 0.0  ;;  %v855_v21 = vmax.f32 %v1411_v19, 0.0  ;;  %v856_v22 = vmax.f32 %v1419_v27, 0.0 }
 0x213   : > { %v857_v25 = vmax.f32 %v1431_v39, 0.0  ;;  %v858_v26 = vmax.f32 %v1439_v47, 0.0  ;;  %v859_v29 = vmax.f32 %v1427_v35, 0.0  ;;  %v860_v30 = vmax.f32 %v1435_v43, 0.0 }
 0x214   : > { %869 = vst [vmem:[%s1372_s18] sm:$0xff] %v853_v17  ;;  %870 = vst [vmem:[%s1372_s18 + $0x8] sm:$0xff] %v854_v18  ;;  %v861_v19 = vmax.f32 %v1417_v24, 0.0  ;;  %v862_v23 = vmax.f32 %v1425_v32, 0.0  ;;  %v863_v27 = vmax.f32 %v1413_v20, 0.0  ;;  %v864_v31 = vmax.f32 %v1421_v28, 0.0 }
 0x215   : > { %871 = vst [vmem:[%s1372_s18 + $0x10] sm:$0xff] %v855_v21  ;;  %872 = vst [vmem:[%s1372_s18 + $0x18] sm:$0xff] %v856_v22  ;;  %v865_v35 = vmax.f32 %v1433_v40, 0.0  ;;  %v866_v39 = vmax.f32 %v1441_v48, 0.0  ;;  %v867_v24 = vmax.f32 %v1429_v36, 0.0  ;;  %v868_v43 = vmax.f32 %v1437_v44, 0.0 }
 0x216   : > { %873 = vst [vmem:[%s1372_s18 + $0x20] sm:$0xff] %v857_v25  ;;  %874 = vst [vmem:[%s1372_s18 + $0x28] sm:$0xff] %v858_v26 }
 0x217   : > { %875 = vst [vmem:[%s1372_s18 + $0x30] sm:$0xff] %v859_v29  ;;  %876 = vst [vmem:[%s1372_s18 + $0x38] sm:$0xff] %v860_v30 }
 0x218   : > { %877 = vst [vmem:[%s1372_s18 + $0x40] sm:$0xff] %v861_v19  ;;  %878 = vst [vmem:[%s1372_s18 + $0x48] sm:$0xff] %v862_v23 }
 0x219   : > { %879 = vst [vmem:[%s1372_s18 + $0x50] sm:$0xff] %v863_v27  ;;  %880 = vst [vmem:[%s1372_s18 + $0x58] sm:$0xff] %v864_v31 }
 0x21a   : > { %881 = vst [vmem:[%s1372_s18 + $0x60] sm:$0xff] %v865_v35  ;;  %882 = vst [vmem:[%s1372_s18 + $0x68] sm:$0xff] %v866_v39 }
 0x21b   : > { %883 = vst [vmem:[%s1372_s18 + $0x70] sm:$0xff] %v867_v24  ;;  %884 = vst [vmem:[%s1372_s18 + $0x78] sm:$0xff] %v868_v43 }
 0x21c PF: > { %s22_s28 = sadd.s32 1, %s1289_s28   ;;  %s1549_s26 = smov %s1285_s27 }
 0x21d   : > { %p19_p13 = scmp.ge.s32.totalorder %s22_s28, 5   ;;  %s1550_s27 = smov %s1552_s0 }
 0x21f   :  { %21 = sbr.rel (!%p19_p13) target bundleno = 17 (0x11), region = 90 }

// kernel: semantic_layer_forward.4
= control target key start
LH: loop header
LB: loop body
LE: loop exit
PB: predicated region body
PF: predicated region fallthrough
CT: control target
= control target key end

     0   :  { %s2831_s0 = inlined_call_operand.vmem [shape: s32[11,4], index: 0, kind: input, shape index: {}]   ;;  %s2832_s1 = inlined_call_operand.vmem [shape: bf16[11,128,128], index: 1, kind: input, shape index: {}]   ;;  %s2833_s2 = inlined_call_operand.vmem [shape: bf16[3,128,256], index: 2, kind: input, shape index: {}]   ;;  %s2834_s3 = inlined_call_operand.vmem [shape: bf16[3,1,128], index: 3, kind: input, shape index: {}]   ;;  %s2835_s4 = inlined_call_operand.vmem [shape: bf16[3,128,1], index: 4, kind: input, shape index: {}]   ;;  %s2836_s5 = inlined_call_operand.vmem [shape: f32[3,128,1], index: 5, kind: input, shape index: {}]   ;;  %s2837_s6 = inlined_call_operand.vmem [shape: f32[2,128,128], index: 6, kind: output, shape index: {}]  }
   0x1   :  { %2838 = sst [smem:[#allocation6_spill]] %s2832_s1  ;;  %s11_s23 = sshll.u32 %s2831_s0, 4  ;;  %s12_s23 = int_to_ptr.vmem [resolvable:$true] %s11_s23 }
   0x2   :  { %s2335_s24 = scalar_lea.vmem %s12_s23, 256  ;;  %p2340_p1 = scmp.lt.s32.totalorder %s12_s23, %s12_s23 }
   0x3   :  { %p2336_p0 = scmp.ne.s32.totalorder %s12_s23, %s2335_s24  ;;  %p2341_p2 = scmp.lt.s32.totalorder %s2335_s24, %s2335_s24 }
   0x5   :  { %p2342_p3 = por %p2341_p2, %p2340_p1 }
   0x7   :  { %p2343_p4 = pnand %p2342_p3, %p2336_p0 }
   0x9   :  { %2346 = shalt.err (!%p2343_p4)  }
   0xa   :  { %s2373_s25 = smov [#allocation4]  }
   0xb   :  { %14 = dma.vmem_to_smem %s12_s23, 256, %s2373_s25, [#allocation3] }
   0xc   :  { %2359 = dma.done.wait [#allocation3], 256 }
   0xd   :  { %2360 = vsyncadd [#allocation3], 4294967040 }
   0xe   :  { %16 = sfence }
   0xf   :  { %s2418_s26 = smov 0   ;;  %s2420_s27 = smov 0  }
  0x10   :  { %s2422_s28 = smov 0  }
  0x11 LB: > { %s37_s0 = sadd.s32 1, %s2367_s27  ;;  %p2087_p5 = scmp.ge.s32.totalorder %s2371_s28, 1  ;;  %s2371_s28 = sphi %s2422_s28, %s22_s28   ;;  %s2367_s27 = sphi %s2420_s27, %s2857_s27   ;;  %s2363_s26 = sphi %s2418_s26, %s2856_s26  }
  0x12   : > { %p39_p6 = scmp.ge.s32.totalorder %s37_s0, 11  ;;  %p338_p7 = scmp.lt.s32.totalorder %s2371_s28, 12 }
  0x14   : > { %s2859_s0 = smov (%p39_p6, %s37_s0), 0  ;;  %p339_p8 = pnand %p2087_p5, %p338_p7 }
  0x15   : > { %p425_p9 = scmp.lt.s32.totalorder (!%p339_p8), %s2363_s26, 10  ;;  %s2090_s29 = sshll.u32 (!%p339_p8), %s2363_s26, 7 }
  0x16   : > { %342 = sbr.rel (%p339_p8) target bundleno = 873 (0x369), region = 40  ;;  %s438_s30 = sld [smem:[#allocation4 + %s2090_s29]] (!%p339_p8) }
  0x17   : > { %s2436_s7 = sadd.s32 (!%p339_p8), 1, %s2090_s29  ;;  %s453_s8 = sld [smem:[#allocation4 + %s2090_s29]] (!%p339_p8) }
  0x18   : > { %s512_s9 = sadd.s32 (!%p339_p8), 2, %s2090_s29  ;;  %s464_s11 = sld [smem:[#allocation4 + %s2436_s7]] (!%p339_p8) }
  0x19   : > { %s2839_s1 = sld [smem:[#allocation6_spill]] (!%p339_p8)  ;;  %s514_s17 = sadd.s32 (!%p339_p8), 3, %s2090_s29 }
  0x1a   : > { %s480_s15 = sld [smem:[#allocation4 + %s2436_s7]] (!%p339_p8) }
  0x1b   : > { %s2861_s26 = smov (!%p425_p9, %s2363_s26), 10  ;;  %s496_s16 = sld [smem:[#allocation4 + %s2436_s7]] }
  0x1c   : > { %s2174_s10 = sshll.u32 %s2861_s26, 6  ;;  %p440_p10 = scmp.lt.s32.totalorder %s438_s30, 2 }
  0x1d   : > { %s2446_s18 = sld [smem:[#allocation4 + %s512_s9]]  ;;  %p454_p11 = scmp.lt.s32.totalorder %s453_s8, 2 }
  0x1e   : > { %s515_s19 = sld [smem:[#allocation4 + %s514_s17]]  ;;  %s2863_s30 = smov (!%p440_p10, %s438_s30), 2 }
  0x1f   : > { %s2442_s14 = scalar_lea.vmem %s2839_s1, %s2174_s10  ;;  %p466_p12 = scmp.lt.s32.totalorder %s464_s11, 2 }
  0x20   : > { %s2175_s20 = sshll.u32 %s2863_s30, 7  ;;  %p482_p13 = scmp.lt.s32.totalorder %s480_s15, 2 }
  0x21   : > { %s2451_s23 = scalar_lea.vmem %s2833_s2, %s2175_s20  ;;  %p498_p0 = scmp.lt.s32.totalorder %s496_s16, 1 }
  0x22   : > { %s2865_s8 = smov (!%p454_p11, %s453_s8), 2  ;;  %s2867_s11 = smov (!%p466_p12, %s464_s11), 2 }
  0x23   : > { %s459_s26 = scalar_lea.vmem %s2834_s3, %s2865_s8  ;;  %s2176_s29 = sshll.u32 %s2867_s11, 6 }
  0x24   : > { %p517_p1 = scmp.eq.s32.totalorder %s515_s19, 1  ;;  %s2462_s30 = scalar_lea.vmem %s2835_s4, %s2176_s29 }
  0x25   : > { %s2869_s15 = smov (!%p482_p13, %s480_s15), 2  ;;  %s2871_s16 = smov (!%p498_p0, %s496_s16), 1  ;;  %v2374_v0 = vmov (%p517_p1), 0.0  }
  0x26   : > { %s2177_s12 = sshll.u32 %s2869_s15, 7  ;;  %s2178_s21 = sshll.u32 %s2871_s16, 7 }
  0x27   : > { %s2467_s20 = scalar_lea.vmem %s2836_s5, %s2177_s12  ;;  %s2472_s24 = scalar_lea.vmem %s2837_s6, %s2178_s21 }
  0x28   : > { %521 = sbr.rel (!%p517_p1) target bundleno = 48 (0x30), region = 44  ;;  %522 = vst [vmem:[%s2472_s24] sm:$0xff] (%p517_p1), %v2374_v0  ;;  %523 = vst [vmem:[%s2472_s24 + $0x8] sm:$0xff] (%p517_p1), %v2374_v0 }
  0x29   : > { %524 = vst [vmem:[%s2472_s24 + $0x10] sm:$0xff] (%p517_p1), %v2374_v0  ;;  %525 = vst [vmem:[%s2472_s24 + $0x18] sm:$0xff] (%p517_p1), %v2374_v0 }
  0x2a   : > { %526 = vst [vmem:[%s2472_s24 + $0x20] sm:$0xff] (%p517_p1), %v2374_v0  ;;  %527 = vst [vmem:[%s2472_s24 + $0x28] sm:$0xff] (%p517_p1), %v2374_v0 }
  0x2b   : > { %528 = vst [vmem:[%s2472_s24 + $0x30] sm:$0xff] (%p517_p1), %v2374_v0  ;;  %529 = vst [vmem:[%s2472_s24 + $0x38] sm:$0xff] (%p517_p1), %v2374_v0 }
  0x2c   : > { %530 = vst [vmem:[%s2472_s24 + $0x40] sm:$0xff] (%p517_p1), %v2374_v0  ;;  %531 = vst [vmem:[%s2472_s24 + $0x48] sm:$0xff] (%p517_p1), %v2374_v0 }
  0x2d   : > { %532 = vst [vmem:[%s2472_s24 + $0x50] sm:$0xff] %v2374_v0  ;;  %533 = vst [vmem:[%s2472_s24 + $0x58] sm:$0xff] %v2374_v0 }
  0x2e   : > { %534 = vst [vmem:[%s2472_s24 + $0x60] sm:$0xff] %v2374_v0  ;;  %535 = vst [vmem:[%s2472_s24 + $0x68] sm:$0xff] %v2374_v0 }
  0x2f   : > { %536 = vst [vmem:[%s2472_s24 + $0x70] sm:$0xff] %v2374_v0  ;;  %537 = vst [vmem:[%s2472_s24 + $0x78] sm:$0xff] %v2374_v0 }
  0x30 PF: > { %p573_p2 = scmp.eq.s32.totalorder %s2446_s18, 1  ;;  %v2375_v1 = vmov 0.0   ;;  %p2105_p3 = scmp.ne.s32.totalorder %s2446_s18, 1 }
  0x31   : > { %541 = vst [vmem:[#allocation2 + $0xb0] sm:$0xff] %v2375_v1  ;;  %542 = vst [vmem:[#allocation2] sm:$0xff] %v2375_v1 }
  0x32   : > { %543 = vst [vmem:[#allocation2 + $0xd8] sm:$0xff] %v2375_v1  ;;  %544 = vst [vmem:[#allocation2 + $0x18] sm:$0xff] %v2375_v1 }
  0x33   : > { %545 = vst [vmem:[#allocation2 + $0x50] sm:$0xff] %v2375_v1  ;;  %546 = vst [vmem:[#allocation2 + $0x68] sm:$0xff] %v2375_v1 }
  0x34   : > { %547 = vst [vmem:[#allocation2 + $0x30] sm:$0xff] %v2375_v1  ;;  %548 = vst [vmem:[#allocation2 + $0x48] sm:$0xff] %v2375_v1 }
  0x35   : > { %549 = vst [vmem:[#allocation2 + $0x80] sm:$0xff] %v2375_v1  ;;  %550 = vst [vmem:[#allocation2 + $0x88] sm:$0xff] %v2375_v1 }
  0x36   : > { %551 = vst [vmem:[#allocation2 + $0xe8] sm:$0xff] %v2375_v1  ;;  %552 = vst [vmem:[#allocation2 + $0xb8] sm:$0xff] %v2375_v1 }
  0x37   : > { %553 = vst [vmem:[#allocation2 + $0x60] sm:$0xff] %v2375_v1  ;;  %554 = vst [vmem:[#allocation2 + $0xf0] sm:$0xff] %v2375_v1 }
  0x38   : > { %555 = vst [vmem:[#allocation2 + $0x8] sm:$0xff] %v2375_v1  ;;  %556 = vst [vmem:[#allocation2 + $0x78] sm:$0xff] %v2375_v1 }
  0x39   : > { %557 = vst [vmem:[#allocation2 + $0x38] sm:$0xff] %v2375_v1  ;;  %558 = vst [vmem:[#allocation2 + $0x58] sm:$0xff] %v2375_v1 }
  0x3a   : > { %559 = vst [vmem:[#allocation2 + $0x40] sm:$0xff] %v2375_v1  ;;  %560 = vst [vmem:[#allocation2 + $0xc8] sm:$0xff] %v2375_v1 }
  0x3b   : > { %561 = vst [vmem:[#allocation2 + $0xe0] sm:$0xff] %v2375_v1  ;;  %562 = vst [vmem:[#allocation2 + $0x90] sm:$0xff] %v2375_v1 }
  0x3c   : > { %563 = vst [vmem:[#allocation2 + $0x70] sm:$0xff] %v2375_v1  ;;  %564 = vst [vmem:[#allocation2 + $0xc0] sm:$0xff] %v2375_v1  ;;  %576 = sbr.rel (%p2105_p3) target bundleno = 427 (0x1ab), region = 52 }
  0x3d   : > { %565 = vst [vmem:[#allocation2 + $0xa8] sm:$0xff] %v2375_v1  ;;  %566 = vst [vmem:[#allocation2 + $0xd0] sm:$0xff] %v2375_v1 }
  0x3e   : > { %567 = vst [vmem:[#allocation2 + $0x10] sm:$0xff] %v2375_v1  ;;  %568 = vst [vmem:[#allocation2 + $0x28] sm:$0xff] %v2375_v1 }
  0x3f   : > { %569 = vst [vmem:[#allocation2 + $0xa0] sm:$0xff] %v2375_v1  ;;  %570 = vst [vmem:[#allocation2 + $0xf8] sm:$0xff] %v2375_v1 }
  0x40   : > { %571 = vst [vmem:[#allocation2 + $0x20] sm:$0xff] %v2375_v1  ;;  %572 = vst [vmem:[#allocation2 + $0x98] sm:$0xff] %v2375_v1 }
  0x41   : > { %v585_v2 = vld [vmem:[%s2462_s30 + $0x20] sm:$0xf]  ;;  %v2376_v4 = vmov 0   ;;  %v586_v5 = vld [vmem:[%s2462_s30 + $0x24] sm:$0xf]  ;;  %v602_v35 = vlaneseq }
  0x42   : > { %v577_v3 = vld [vmem:[%s2462_s30] sm:$0xf]  ;;  %2244 = vset.pattern.permute.xlu1 %v2376_v4  ;;  %2243 = vset.pattern.permute.xlu0 %v2376_v4  ;;  %v578_v6 = vld [vmem:[%s2462_s30 + $0x4] sm:$0xf]  ;;  %v580_v7 = vld [vmem:[%s2462_s30 + $0xc] sm:$0xf] }
  0x43   : > { %692 = vperm.xlu1 %2244, %v585_v2   ;;  %596 = vperm.xlu0 %2243, %v577_v3   ;;  %v2245_v8 = vld [vmem:[%s2451_s23 + $0x74] ss:$8 sps:$4 sm:$0xff]   ;;  %v2247_v9 = vld [vmem:[%s2451_s23 + $0x70] ss:$8 sps:$4 sm:$0xff]   ;;  %v579_v10 = vld [vmem:[%s2462_s30 + $0x8] sm:$0xf] }
  0x44   : > { %1053 = vmatprep.mubr.bf16.mxu0 %v2376_v4  ;;  %1093 = vmatprep.mubr.bf16.mxu1 %v2376_v4  ;;  %v2248_v11 = vld [vmem:[%s2451_s23 + $0x64] ss:$8 sps:$4 sm:$0xff]   ;;  %v2250_v12 = vld [vmem:[%s2451_s23 + $0x60] ss:$8 sps:$4 sm:$0xff]   ;;  %v2251_v15 = vld [vmem:[%s2451_s23 + $0x54] ss:$8 sps:$4 sm:$0xff]  }
  0x45   : > { %1021 = vmatprep.subr.bf16.mxu0 %v2245_v8  ;;  %2180 = vmatprep.subr.bf16.mxu1 %v2245_v8  ;;  %v588_v13 = vld [vmem:[%s2462_s30 + $0x2c] sm:$0xf]  ;;  %v587_v14 = vld [vmem:[%s2462_s30 + $0x28] sm:$0xf]  ;;  %v2253_v16 = vld [vmem:[%s2451_s23 + $0x50] ss:$8 sps:$4 sm:$0xff]  }
  0x46   : > { %1022 = vmatpush1.bf16.msra.mxu0 %v2247_v9  ;;  %2188 = vmatpush1.bf16.msra.mxu1 %v2247_v9  ;;  %v582_v17 = vld [vmem:[%s2462_s30 + $0x14] sm:$0xf]  ;;  %v581_v18 = vld [vmem:[%s2462_s30 + $0x10] sm:$0xf]  ;;  %v2254_v19 = vld [vmem:[%s2451_s23 + $0x44] ss:$8 sps:$4 sm:$0xff]  }
  0x47   : > { %704 = vperm.xlu1 %2244, %v586_v5   ;;  %608 = vperm.xlu0 %2243, %v578_v6   ;;  %v2256_v20 = vld [vmem:[%s2451_s23 + $0x40] ss:$8 sps:$4 sm:$0xff]   ;;  %v590_v21 = vld [vmem:[%s2462_s30 + $0x34] sm:$0xf]  ;;  %v589_v22 = vld [vmem:[%s2462_s30 + $0x30] sm:$0xf] }
  0x48   : > { %1023 = vmatprep.subr.bf16.mxu0 %v2248_v11  ;;  %2181 = vmatprep.subr.bf16.mxu1 %v2248_v11  ;;  %v2257_v23 = vld [vmem:[%s2451_s23 + $0x34] ss:$8 sps:$4 sm:$0xff]   ;;  %v2259_v24 = vld [vmem:[%s2451_s23 + $0x30] ss:$8 sps:$4 sm:$0xff]   ;;  %v2260_v27 = vld [vmem:[%s2451_s23 + $0x24] ss:$8 sps:$4 sm:$0xff]  }
  0x49   : > { %v584_v25 = vld [vmem:[%s2462_s30 + $0x1c] sm:$0xf]  ;;  %v583_v26 = vld [vmem:[%s2462_s30 + $0x18] sm:$0xf]  ;;  %v2262_v28 = vld [vmem:[%s2451_s23 + $0x20] ss:$8 sps:$4 sm:$0xff]  }
  0x4a   : > { %1024 = vmatpush1.bf16.msra.mxu0 %v2250_v12  ;;  %2189 = vmatpush1.bf16.msra.mxu1 %v2250_v12  ;;  %v592_v29 = vld [vmem:[%s2462_s30 + $0x3c] sm:$0xf]  ;;  %v591_v30 = vld [vmem:[%s2462_s30 + $0x38] sm:$0xf]  ;;  %v2266_v33 = vld [vmem:[%s2451_s23 + $0x4] ss:$8 sps:$4 sm:$0xff]  }
  0x4b   : > { %632 = vperm.xlu1 %2244, %v580_v7   ;;  %620 = vperm.xlu0 %2243, %v579_v10   ;;  %v2263_v31 = vld [vmem:[%s2451_s23 + $0x14] ss:$8 sps:$4 sm:$0xff]   ;;  %v2265_v32 = vld [vmem:[%s2451_s23 + $0x10] ss:$8 sps:$4 sm:$0xff]   ;;  %v2268_v34 = vld [vmem:[%s2451_s23] ss:$8 sps:$4 sm:$0xff]  }
  0x4c   : > { %1025 = vmatprep.subr.bf16.mxu0 %v2251_v15  ;;  %2182 = vmatprep.subr.bf16.mxu1 %v2251_v15  ;;  %v2377_v36 = vmov 839922192   ;;  %v603_v38 = vshrl.u32 %v602_v35, 7  ;;  %v593_v39 = vld [vmem:[%s459_s26] sm:$0x1] }
  0x4d   : > { %v600_v37 = vunpack.c.l.s4 %v2377_v36  ;;  %v787_v41 = vpack.i.b16 %v593_v39, %v593_v39  ;;  %v821_v50 = vld [vmem:[%s2442_s14 + $0x20] sm:$0xf]  ;;  %v822_v55 = vld [vmem:[%s2442_s14 + $0x24] sm:$0xf]  ;;  %v816_v7 = vld [vmem:[%s2442_s14 + $0xc] sm:$0xf] }
  0x4e   : > { %1026 = vmatpush1.bf16.msra.mxu0 %v2253_v16  ;;  %2190 = vmatpush1.bf16.msra.mxu1 %v2253_v16  ;;  %v791_v42 = vsub.s32 0, %v603_v38  ;;  %v813_v54 = vld [vmem:[%s2442_s14] sm:$0xf]  ;;  %v814_v57 = vld [vmem:[%s2442_s14 + $0x4] sm:$0xf] }
  0x4f   : > { %728 = vperm.xlu1 %2244, %v588_v13   ;;  %716 = vperm.xlu0 %2243, %v587_v14   ;;  %v601_v40 = vunpack.c.0.s8 %v600_v37  ;;  %v815_v9 = vld [vmem:[%s2442_s14 + $0x8] sm:$0xf]  ;;  %v824_v13 = vld [vmem:[%s2442_s14 + $0x2c] sm:$0xf]  ;;  %v825_v35 = vld [vmem:[%s2442_s14 + $0x30] sm:$0xf] }
  0x50   : > { %1027 = vmatprep.subr.bf16.mxu0 %v2254_v19  ;;  %2183 = vmatprep.subr.bf16.mxu1 %v2254_v19  ;;  %v792_v44 = vrot.slane %v787_v41, %v791_v42  ;;  %v823_v15 = vld [vmem:[%s2442_s14 + $0x28] sm:$0xf] }
  0x51   : > { %v2565_v43 = vsub.s32 %v601_v40, %v603_v38 }
  0x52   : > { %1028 = vmatpush1.bf16.msra.mxu0 %v2256_v20  ;;  %2191 = vmatpush1.bf16.msra.mxu1 %v2256_v20  ;;  %v2567_v47 = vcombine.low %v792_v44, %v792_v44 }
  0x53   : > { %656 = vperm.xlu1 %2244, %v582_v17   ;;  %644 = vperm.xlu0 %2243, %v581_v18  }
  0x54   : > { %1029 = vmatprep.subr.bf16.mxu0 %v2257_v23  ;;  %2184 = vmatprep.subr.bf16.mxu1 %v2257_v23 }
  0x56   : > { %1030 = vmatpush1.bf16.msra.mxu0 %v2259_v24  ;;  %2192 = vmatpush1.bf16.msra.mxu1 %v2259_v24 }
  0x57   : > { %752 = vperm.xlu1 %2244, %v590_v21   ;;  %740 = vperm.xlu0 %2243, %v589_v22  }
  0x58   : > { %1031 = vmatprep.subr.bf16.mxu0 %v2260_v27  ;;  %2185 = vmatprep.subr.bf16.mxu1 %v2260_v27  ;;  %v818_v27 = vld [vmem:[%s2442_s14 + $0x14] sm:$0xf] }
  0x5a   : > { %1032 = vmatpush1.bf16.msra.mxu0 %v2262_v28  ;;  %2193 = vmatpush1.bf16.msra.mxu1 %v2262_v28  ;;  %v850_v28 = vld [vmem:[#allocation2 + $0x68] sm:$0xff] }
  0x5b   : > { %680 = vperm.xlu1 %2244, %v584_v25   ;;  %668 = vperm.xlu0 %2243, %v583_v26  }
  0x5c   : > { %1033 = vmatprep.subr.bf16.mxu0 %v2263_v31  ;;  %2186 = vmatprep.subr.bf16.mxu1 %v2263_v31 }
  0x5e   : > { %1034 = vmatpush1.bf16.msra.mxu0 %v2265_v32  ;;  %2194 = vmatpush1.bf16.msra.mxu1 %v2265_v32 }
  0x5f   : > { %776 = vperm.xlu1 %2244, %v592_v29   ;;  %764 = vperm.xlu0 %2243, %v591_v30   ;;  %v817_v29 = vld [vmem:[%s2442_s14 + $0x10] sm:$0xf] }
  0x60   : > { %1035 = vmatprep.subr.bf16.mxu0 %v2266_v33  ;;  %2187 = vmatprep.subr.bf16.mxu1 %v2266_v33  ;;  %v826_v33 = vld [vmem:[%s2442_s14 + $0x34] sm:$0xf] }
  0x62   : > { %1036 = vmatpush1.bf16.msra.mxu0 %v2268_v34  ;;  %2195 = vmatpush1.bf16.msra.mxu1 %v2268_v34 }
  0xbe   : > { %v693_v45 = vpop.permute.xlu1 %692  ;;  %v597_v46 = vpop.permute.xlu0 %596 }
  0xbf   : > { %v701_v48 = vrot.slane %v693_v45, %v2565_v43  ;;  %v605_v49 = vrot.slane %v597_v46, %v2565_v43 }
  0xc1   : > { %vm2573_vm0 = vcmp.eq.bf16.partialorder %v701_v48, %v2567_v47  ;;  %vm797_vm1 = vcmp.eq.bf16.partialorder %v605_v49, %v2567_v47  ;;  %v820_v49 = vld [vmem:[%s2442_s14 + $0x1c] sm:$0xf] }
  0xc2   : > { %v705_v51 = vpop.permute.xlu1 %704  ;;  %v609_v52 = vpop.permute.xlu0 %608  ;;  %v837_v59 = vsel %vm2573_vm0, %v821_v50, 0  ;;  %v829_v60 = vsel %vm797_vm1, %v813_v54, 0 }
  0xc3   : > { %v713_v56 = vrot.slane %v705_v51, %v2565_v43  ;;  %v617_v58 = vrot.slane %v609_v52, %v2565_v43  ;;  %v819_v51 = vld [vmem:[%s2442_s14 + $0x18] sm:$0xf] }
  0xc5   : > { %vm806_vm2 = vcmp.eq.bf16.partialorder %v713_v56, %v2567_v47  ;;  %vm798_vm3 = vcmp.eq.bf16.partialorder %v617_v58, %v2567_v47 }
  0xc6   : > { %v838_v61 = vsel %vm806_vm2, %v822_v55, 0  ;;  %v830_v62 = vsel %vm798_vm3, %v814_v57, 0  ;;  %v633_v63 = vpop.permute.xlu1 %632  ;;  %v621_v0 = vpop.permute.xlu0 %620  ;;  %v828_v55 = vld [vmem:[%s2442_s14 + $0x3c] sm:$0xf]  ;;  %v827_v57 = vld [vmem:[%s2442_s14 + $0x38] sm:$0xf] }
  0xc7   : > { %v641_v2 = vrot.slane %v633_v63, %v2565_v43  ;;  %v629_v3 = vrot.slane %v621_v0, %v2565_v43  ;;  %v2107_v5 = vcombine.low %v829_v60, %v830_v62  ;;  %v2111_v6 = vcombine.low %v837_v59, %v838_v61  ;;  %v845_v0 = vld [vmem:[#allocation2 + $0xb0] sm:$0xff] }
  0xc9   : > { %vm2591_vm4 = vcmp.eq.bf16.partialorder %v641_v2, %v2567_v47  ;;  %vm2597_vm5 = vcmp.eq.bf16.partialorder %v629_v3, %v2567_v47  ;;  %1054 = vmatmul.mubr.bf16.vlgmr.msra.gmra.mxu0 %v2107_v5  ;;  %1094 = vmatmul.mubr.bf16.vlgmr.msra.gmra.mxu1 %v2111_v6  ;;  %v861_v2 = vld [vmem:[#allocation2 + $0x38] sm:$0xff]  ;;  %v846_v5 = vld [vmem:[#allocation2] sm:$0xff] }
  0xca   : > { %v729_v11 = vpop.permute.xlu1 %728  ;;  %v717_v12 = vpop.permute.xlu0 %716  ;;  %1063 = vmatprep.mubr.bf16.mxu0 %v2376_v4  ;;  %1103 = vmatprep.mubr.bf16.mxu1 %v2376_v4  ;;  %v832_v17 = vsel %vm2591_vm4, %v816_v7, 0  ;;  %v831_v18 = vsel %vm2597_vm5, %v815_v9, 0  ;;  %v862_v6 = vld [vmem:[#allocation2 + $0x58] sm:$0xff] }
  0xcb   : > { %v737_v14 = vrot.slane %v729_v11, %v2565_v43  ;;  %v725_v16 = vrot.slane %v717_v12, %v2565_v43  ;;  %v2108_v25 = vcombine.low %v831_v18, %v832_v17  ;;  %v847_v11 = vld [vmem:[#allocation2 + $0xd8] sm:$0xff]  ;;  %v863_v12 = vld [vmem:[#allocation2 + $0x40] sm:$0xff]  ;;  %v864_v17 = vld [vmem:[#allocation2 + $0xc8] sm:$0xff] }
  0xcd   : > { %vm808_vm6 = vcmp.eq.bf16.partialorder %v737_v14, %v2567_v47  ;;  %vm807_vm7 = vcmp.eq.bf16.partialorder %v725_v16, %v2567_v47  ;;  %v848_v16 = vld [vmem:[#allocation2 + $0x18] sm:$0xff] }
  0xce   : > { %v840_v19 = vsel %vm808_vm6, %v824_v13, 0  ;;  %v839_v20 = vsel %vm807_vm7, %v823_v15, 0  ;;  %v657_v21 = vpop.permute.xlu1 %656  ;;  %v645_v22 = vpop.permute.xlu0 %644 }
  0xcf   : > { %v665_v23 = vrot.slane %v657_v21, %v2565_v43  ;;  %v653_v24 = vrot.slane %v645_v22, %v2565_v43  ;;  %v2112_v26 = vcombine.low %v839_v20, %v840_v19  ;;  %v849_v22 = vld [vmem:[#allocation2 + $0x50] sm:$0xff] }
  0xd1   : > { %vm2617_vm8 = vcmp.eq.bf16.partialorder %v665_v23, %v2567_v47  ;;  %vm2623_vm9 = vcmp.eq.bf16.partialorder %v653_v24, %v2567_v47  ;;  %1064 = vmatmul.mubr.bf16.gmra.mxu0 %v2108_v25  ;;  %1104 = vmatmul.mubr.bf16.gmra.mxu1 %v2112_v26  ;;  %v865_v23 = vld [vmem:[#allocation2 + $0xe0] sm:$0xff] }
  0xd2   : > { %v753_v31 = vpop.permute.xlu1 %752  ;;  %v741_v32 = vpop.permute.xlu0 %740  ;;  %1073 = vmatprep.mubr.bf16.mxu0 %v2376_v4  ;;  %1113 = vmatprep.mubr.bf16.mxu1 %v2376_v4  ;;  %v834_v37 = vsel %vm2617_vm8, %v818_v27, 0  ;;  %v833_v38 = vsel %vm2623_vm9, %v817_v29, 0  ;;  %v866_v29 = vld [vmem:[#allocation2 + $0x90] sm:$0xff] }
  0xd3   : > { %v761_v34 = vrot.slane %v753_v31, %v2565_v43  ;;  %v749_v36 = vrot.slane %v741_v32, %v2565_v43  ;;  %v2109_v46 = vcombine.low %v833_v38, %v834_v37 }
  0xd5   : > { %vm810_vm10 = vcmp.eq.bf16.partialorder %v761_v34, %v2567_v47  ;;  %vm809_vm11 = vcmp.eq.bf16.partialorder %v749_v36, %v2567_v47  ;;  %v851_v34 = vld [vmem:[#allocation2 + $0x30] sm:$0xff] }
  0xd6   : > { %v842_v39 = vsel %vm810_vm10, %v826_v33, 0  ;;  %v841_v40 = vsel %vm809_vm11, %v825_v35, 0  ;;  %v681_v41 = vpop.permute.xlu1 %680  ;;  %v669_v42 = vpop.permute.xlu0 %668  ;;  %v867_v35 = vld [vmem:[#allocation2 + $0x70] sm:$0xff] }
  0xd7   : > { %v689_v44 = vrot.slane %v681_v41, %v2565_v43  ;;  %v677_v45 = vrot.slane %v669_v42, %v2565_v43  ;;  %v2113_v48 = vcombine.low %v841_v40, %v842_v39  ;;  %v852_v40 = vld [vmem:[#allocation2 + $0x48] sm:$0xff]  ;;  %v868_v41 = vld [vmem:[#allocation2 + $0xc0] sm:$0xff] }
  0xd9   : > { %vm2643_vm12 = vcmp.eq.bf16.partialorder %v689_v44, %v2567_v47  ;;  %vm2649_vm13 = vcmp.eq.bf16.partialorder %v677_v45, %v2567_v47  ;;  %1074 = vmatmul.mubr.bf16.gmra.mxu0 %v2109_v46  ;;  %1114 = vmatmul.mubr.bf16.gmra.mxu1 %v2113_v48  ;;  %v853_v48 = vld [vmem:[#allocation2 + $0x80] sm:$0xff] }
  0xda   : > { %v777_v53 = vpop.permute.xlu1 %776  ;;  %v765_v54 = vpop.permute.xlu0 %764  ;;  %1083 = vmatprep.mubr.bf16.mxu0 %v2376_v4  ;;  %1123 = vmatprep.mubr.bf16.mxu1 %v2376_v4  ;;  %v836_v59 = vsel %vm2643_vm12, %v820_v49, 0  ;;  %v835_v60 = vsel %vm2649_vm13, %v819_v51, 0  ;;  %v869_v49 = vld [vmem:[#allocation2 + $0xa8] sm:$0xff] }
  0xdb   : > { %v785_v56 = vrot.slane %v777_v53, %v2565_v43  ;;  %v773_v58 = vrot.slane %v765_v54, %v2565_v43  ;;  %v2110_v63 = vcombine.low %v835_v60, %v836_v59  ;;  %v854_v54 = vld [vmem:[#allocation2 + $0x88] sm:$0xff] }
  0xdc   : > { %v855_v60 = vld [vmem:[#allocation2 + $0xe8] sm:$0xff] }
  0xdd   : > { %vm812_vm14 = vcmp.eq.bf16.partialorder %v785_v56, %v2567_v47  ;;  %vm811_vm15 = vcmp.eq.bf16.partialorder %v773_v58, %v2567_v47 }
  0xde   : > { %v844_v61 = vsel %vm812_vm14, %v828_v55, 0  ;;  %v843_v62 = vsel %vm811_vm15, %v827_v57, 0  ;;  %v870_v55 = vld [vmem:[#allocation2 + $0xd0] sm:$0xff] }
  0xdf   : > { %v2114_v4 = vcombine.low %v843_v62, %v844_v61  ;;  %v871_v61 = vld [vmem:[#allocation2 + $0x10] sm:$0xff] }
  0xe1   : > { %1084 = vmatmul.mubr.bf16.gmra.mxu0 %v2110_v63  ;;  %1124 = vmatmul.mubr.bf16.gmra.mxu1 %v2114_v4 }
 0x189   : > { %v1055_v3 = vpop.f32.mrf.mxu0  ;;  %v1095_v43 = vpop.f32.mrf.mxu1 }
 0x18a   : > { %v1134_v7 = vadd.f32 %v1055_v3, %v845_v0  ;;  %v1150_v8 = vadd.f32 %v1095_v43, %v861_v2  ;;  %v856_v2 = vld [vmem:[#allocation2 + $0xb8] sm:$0xff]  ;;  %v872_v3 = vld [vmem:[#allocation2 + $0x28] sm:$0xff] }
 0x18b   : > { %v1057_v9 = vpop.f32.mrf.mxu0  ;;  %v1097_v10 = vpop.f32.mrf.mxu1 }
 0x18c   : > { %1166 = vst [vmem:[#allocation2 + $0xb0] sm:$0xff] %v1134_v7  ;;  %1182 = vst [vmem:[#allocation2 + $0x38] sm:$0xff] %v1150_v8  ;;  %v1135_v47 = vadd.f32 %v1057_v9, %v846_v5  ;;  %v1151_v13 = vadd.f32 %v1097_v10, %v862_v6  ;;  %v857_v8 = vld [vmem:[#allocation2 + $0x60] sm:$0xff] }
 0x18d   : > { %v1059_v14 = vpop.f32.mrf.mxu0  ;;  %v1099_v15 = vpop.f32.mrf.mxu1  ;;  %v873_v9 = vld [vmem:[#allocation2 + $0xa0] sm:$0xff] }
 0x18e   : > { %1167 = vst [vmem:[#allocation2] sm:$0xff] %v1135_v47  ;;  %1183 = vst [vmem:[#allocation2 + $0x58] sm:$0xff] %v1151_v13  ;;  %v1136_v18 = vadd.f32 %v1059_v14, %v847_v11  ;;  %v1152_v19 = vadd.f32 %v1099_v15, %v863_v12  ;;  %v858_v13 = vld [vmem:[#allocation2 + $0xf0] sm:$0xff]  ;;  %v874_v14 = vld [vmem:[#allocation2 + $0xf8] sm:$0xff] }
 0x18f   : > { %v1061_v20 = vpop.f32.mrf.mxu0  ;;  %v1101_v21 = vpop.f32.mrf.mxu1 }
 0x190   : > { %1168 = vst [vmem:[#allocation2 + $0xd8] sm:$0xff] %v1136_v18  ;;  %1184 = vst [vmem:[#allocation2 + $0x40] sm:$0xff] %v1152_v19  ;;  %v1137_v24 = vadd.f32 %v1061_v20, %v848_v16  ;;  %v1153_v25 = vadd.f32 %v1101_v21, %v864_v17  ;;  %v859_v19 = vld [vmem:[#allocation2 + $0x8] sm:$0xff]  ;;  %v875_v20 = vld [vmem:[#allocation2 + $0x20] sm:$0xff] }
 0x191   : > { %v1065_v26 = vpop.f32.mrf.mxu0  ;;  %v1105_v27 = vpop.f32.mrf.mxu1 }
 0x192   : > { %1169 = vst [vmem:[#allocation2 + $0x18] sm:$0xff] %v1137_v24  ;;  %1185 = vst [vmem:[#allocation2 + $0xc8] sm:$0xff] %v1153_v25  ;;  %v1138_v30 = vadd.f32 %v1065_v26, %v849_v22  ;;  %v1154_v31 = vadd.f32 %v1105_v27, %v865_v23  ;;  %v860_v25 = vld [vmem:[#allocation2 + $0x78] sm:$0xff] }
 0x193   : > { %v1067_v32 = vpop.f32.mrf.mxu0  ;;  %v1107_v33 = vpop.f32.mrf.mxu1  ;;  %v876_v26 = vld [vmem:[#allocation2 + $0x98] sm:$0xff] }
 0x194   : > { %1170 = vst [vmem:[#allocation2 + $0x50] sm:$0xff] %v1138_v30  ;;  %1186 = vst [vmem:[#allocation2 + $0xe0] sm:$0xff] %v1154_v31  ;;  %v1139_v36 = vadd.f32 %v1067_v32, %v850_v28  ;;  %v1155_v37 = vadd.f32 %v1107_v33, %v866_v29 }
 0x195   : > { %v1069_v38 = vpop.f32.mrf.mxu0  ;;  %v1109_v39 = vpop.f32.mrf.mxu1 }
 0x196   : > { %1171 = vst [vmem:[#allocation2 + $0x68] sm:$0xff] %v1139_v36  ;;  %1187 = vst [vmem:[#allocation2 + $0x90] sm:$0xff] %v1155_v37  ;;  %v1140_v42 = vadd.f32 %v1069_v38, %v851_v34  ;;  %v1156_v44 = vadd.f32 %v1109_v39, %v867_v35 }
 0x197   : > { %v1071_v45 = vpop.f32.mrf.mxu0  ;;  %v1111_v46 = vpop.f32.mrf.mxu1 }
 0x198   : > { %1172 = vst [vmem:[#allocation2 + $0x30] sm:$0xff] %v1140_v42  ;;  %1188 = vst [vmem:[#allocation2 + $0x70] sm:$0xff] %v1156_v44  ;;  %v1141_v50 = vadd.f32 %v1071_v45, %v852_v40  ;;  %v1157_v51 = vadd.f32 %v1111_v46, %v868_v41 }
 0x199   : > { %v1075_v52 = vpop.f32.mrf.mxu0  ;;  %v1115_v53 = vpop.f32.mrf.mxu1 }
 0x19a   : > { %1173 = vst [vmem:[#allocation2 + $0x48] sm:$0xff] %v1141_v50  ;;  %1189 = vst [vmem:[#allocation2 + $0xc0] sm:$0xff] %v1157_v51  ;;  %v1142_v56 = vadd.f32 %v1075_v52, %v853_v48  ;;  %v1158_v57 = vadd.f32 %v1115_v53, %v869_v49 }
 0x19b   : > { %v1077_v58 = vpop.f32.mrf.mxu0  ;;  %v1117_v59 = vpop.f32.mrf.mxu1 }
 0x19c   : > { %1174 = vst [vmem:[#allocation2 + $0x80] sm:$0xff] %v1142_v56  ;;  %1190 = vst [vmem:[#allocation2 + $0xa8] sm:$0xff] %v1158_v57  ;;  %v1143_v62 = vadd.f32 %v1077_v58, %v854_v54  ;;  %v1159_v63 = vadd.f32 %v1117_v59, %v870_v55 }
 0x19d   : > { %v1079_v4 = vpop.f32.mrf.mxu0  ;;  %v1119_v0 = vpop.f32.mrf.mxu1 }
 0x19e   : > { %1175 = vst [vmem:[#allocation2 + $0x88] sm:$0xff] %v1143_v62  ;;  %1191 = vst [vmem:[#allocation2 + $0xd0] sm:$0xff] %v1159_v63  ;;  %v1144_v43 = vadd.f32 %v1079_v4, %v855_v60  ;;  %v1160_v5 = vadd.f32 %v1119_v0, %v871_v61 }
 0x19f   : > { %v1081_v6 = vpop.f32.mrf.mxu0  ;;  %v1121_v7 = vpop.f32.mrf.mxu1 }
 0x1a0   : > { %1176 = vst [vmem:[#allocation2 + $0xe8] sm:$0xff] %v1144_v43  ;;  %1192 = vst [vmem:[#allocation2 + $0x10] sm:$0xff] %v1160_v5  ;;  %v1145_v10 = vadd.f32 %v1081_v6, %v856_v2  ;;  %v1161_v11 = vadd.f32 %v1121_v7, %v872_v3 }
 0x1a1   : > { %v1085_v12 = vpop.f32.mrf.mxu0  ;;  %v1125_v47 = vpop.f32.mrf.mxu1 }
 0x1a2   : > { %1177 = vst [vmem:[#allocation2 + $0xb8] sm:$0xff] %v1145_v10  ;;  %1193 = vst [vmem:[#allocation2 + $0x28] sm:$0xff] %v1161_v11  ;;  %v1146_v15 = vadd.f32 %v1085_v12, %v857_v8  ;;  %v1162_v16 = vadd.f32 %v1125_v47, %v873_v9 }
 0x1a3   : > { %v1087_v17 = vpop.f32.mrf.mxu0  ;;  %v1127_v18 = vpop.f32.mrf.mxu1 }
 0x1a4   : > { %1178 = vst [vmem:[#allocation2 + $0x60] sm:$0xff] %v1146_v15  ;;  %1194 = vst [vmem:[#allocation2 + $0xa0] sm:$0xff] %v1162_v16  ;;  %v1147_v21 = vadd.f32 %v1087_v17, %v858_v13  ;;  %v1163_v22 = vadd.f32 %v1127_v18, %v874_v14 }
 0x1a5   : > { %v1089_v23 = vpop.f32.mrf.mxu0  ;;  %v1129_v24 = vpop.f32.mrf.mxu1 }
 0x1a6   : > { %1179 = vst [vmem:[#allocation2 + $0xf0] sm:$0xff] %v1147_v21  ;;  %1195 = vst [vmem:[#allocation2 + $0xf8] sm:$0xff] %v1163_v22  ;;  %v1148_v27 = vadd.f32 %v1089_v23, %v859_v19  ;;  %v1164_v28 = vadd.f32 %v1129_v24, %v875_v20 }
 0x1a7   : > { %v1091_v29 = vpop.f32.mrf.mxu0  ;;  %v1131_v30 = vpop.f32.mrf.mxu1 }
 0x1a8   : > { %1180 = vst [vmem:[#allocation2 + $0x8] sm:$0xff] %v1148_v27  ;;  %1196 = vst [vmem:[#allocation2 + $0x20] sm:$0xff] %v1164_v28  ;;  %v1149_v31 = vadd.f32 %v1091_v29, %v860_v25  ;;  %v1165_v32 = vadd.f32 %v1131_v30, %v876_v26 }
 0x1aa   : > { %1181 = vst [vmem:[#allocation2 + $0x78] sm:$0xff] %v1149_v31  ;;  %1197 = vst [vmem:[#allocation2 + $0x98] sm:$0xff] %v1165_v32 }
 0x1ab PF: > { %p2131_p4 = scmp.ne.s32.totalorder %s2446_s18, 0 }
 0x1ad   : > { %1201 = sbr.rel (%p2131_p4) target bundleno = 694 (0x2b6), region = 56 }
 0x1b2   : > { %v2269_v33 = vld [vmem:[%s2451_s23 + $0x74] ss:$8 sps:$4 sm:$0xff]   ;;  %v2271_v34 = vld [vmem:[%s2451_s23 + $0x70] ss:$8 sps:$4 sm:$0xff]   ;;  %v2378_v35 = vmov 0   ;;  %v2293_v52 = vld [vmem:[%s2442_s14] sm:$0xff]  }
 0x1b3   : > { %1426 = vmatprep.mubr.bf16.mxu0 %v2378_v35  ;;  %1466 = vmatprep.mubr.bf16.mxu1 %v2378_v35  ;;  %v2272_v36 = vld [vmem:[%s2451_s23 + $0x64] ss:$8 sps:$4 sm:$0xff]   ;;  %v2274_v37 = vld [vmem:[%s2451_s23 + $0x60] ss:$8 sps:$4 sm:$0xff]   ;;  %v2275_v38 = vld [vmem:[%s2451_s23 + $0x54] ss:$8 sps:$4 sm:$0xff]  }
 0x1b4   : > { %1394 = vmatprep.subr.bf16.mxu0 %v2269_v33  ;;  %2196 = vmatprep.subr.bf16.mxu1 %v2269_v33  ;;  %v2277_v39 = vld [vmem:[%s2451_s23 + $0x50] ss:$8 sps:$4 sm:$0xff]   ;;  %v2278_v40 = vld [vmem:[%s2451_s23 + $0x44] ss:$8 sps:$4 sm:$0xff]   ;;  %v2280_v41 = vld [vmem:[%s2451_s23 + $0x40] ss:$8 sps:$4 sm:$0xff]  }
 0x1b5   : > { %1395 = vmatpush1.bf16.msra.mxu0 %v2271_v34  ;;  %2204 = vmatpush1.bf16.msra.mxu1 %v2271_v34  ;;  %v2281_v42 = vld [vmem:[%s2451_s23 + $0x34] ss:$8 sps:$4 sm:$0xff]   ;;  %v2283_v44 = vld [vmem:[%s2451_s23 + $0x30] ss:$8 sps:$4 sm:$0xff]   ;;  %v2284_v45 = vld [vmem:[%s2451_s23 + $0x24] ss:$8 sps:$4 sm:$0xff]  }
 0x1b6   : > { %1396 = vmatprep.subr.bf16.mxu0 %v2272_v36  ;;  %2197 = vmatprep.subr.bf16.mxu1 %v2272_v36  ;;  %v2286_v46 = vld [vmem:[%s2451_s23 + $0x20] ss:$8 sps:$4 sm:$0xff]   ;;  %v2287_v48 = vld [vmem:[%s2451_s23 + $0x14] ss:$8 sps:$4 sm:$0xff]   ;;  %v2289_v49 = vld [vmem:[%s2451_s23 + $0x10] ss:$8 sps:$4 sm:$0xff]  }
 0x1b7   : > { %v2290_v50 = vld [vmem:[%s2451_s23 + $0x4] ss:$8 sps:$4 sm:$0xff]   ;;  %v2292_v51 = vld [vmem:[%s2451_s23] ss:$8 sps:$4 sm:$0xff]   ;;  %v2297_v56 = vld [vmem:[%s2442_s14 + $0x10] sm:$0xff]  }
 0x1b8   : > { %v2294_v53 = vld [vmem:[%s2442_s14 + $0x20] sm:$0xff]   ;;  %v2295_v54 = vld [vmem:[%s2442_s14 + $0x8] sm:$0xff]   ;;  %v2298_v57 = vld [vmem:[%s2442_s14 + $0x30] sm:$0xff]  }
 0x1b9   : > { %1397 = vmatpush1.bf16.msra.mxu0 %v2274_v37  ;;  %2205 = vmatpush1.bf16.msra.mxu1 %v2274_v37  ;;  %v2296_v55 = vld [vmem:[%s2442_s14 + $0x28] sm:$0xff]   ;;  %v2299_v58 = vld [vmem:[%s2442_s14 + $0x18] sm:$0xff]   ;;  %v1202_v60 = vld [vmem:[#allocation2 + $0xb0] sm:$0xff] }
 0x1ba   : > { %1398 = vmatprep.subr.bf16.mxu0 %v2275_v38  ;;  %2198 = vmatprep.subr.bf16.mxu1 %v2275_v38  ;;  %v2300_v59 = vld [vmem:[%s2442_s14 + $0x38] sm:$0xff]   ;;  %v1203_v4 = vld [vmem:[#allocation2] sm:$0xff]  ;;  %v1221_v47 = vld [vmem:[#allocation2 + $0xc8] sm:$0xff] }
 0x1bb   : > { %v1218_v61 = vld [vmem:[#allocation2 + $0x38] sm:$0xff]  ;;  %v1220_v7 = vld [vmem:[#allocation2 + $0x40] sm:$0xff]  ;;  %v1206_v17 = vld [vmem:[#allocation2 + $0x50] sm:$0xff] }
 0x1bc   : > { %v1219_v0 = vld [vmem:[#allocation2 + $0x58] sm:$0xff]  ;;  %v1222_v18 = vld [vmem:[#allocation2 + $0xe0] sm:$0xff]  ;;  %v1207_v23 = vld [vmem:[#allocation2 + $0x68] sm:$0xff] }
 0x1bd   : > { %1399 = vmatpush1.bf16.msra.mxu0 %v2277_v39  ;;  %2206 = vmatpush1.bf16.msra.mxu1 %v2277_v39  ;;  %v1204_v6 = vld [vmem:[#allocation2 + $0xd8] sm:$0xff]  ;;  %v1223_v24 = vld [vmem:[#allocation2 + $0x90] sm:$0xff]  ;;  %v1225_v36 = vld [vmem:[#allocation2 + $0xc0] sm:$0xff] }
 0x1be   : > { %1400 = vmatprep.subr.bf16.mxu0 %v2278_v40  ;;  %2199 = vmatprep.subr.bf16.mxu1 %v2278_v40  ;;  %v1205_v12 = vld [vmem:[#allocation2 + $0x18] sm:$0xff]  ;;  %v1208_v29 = vld [vmem:[#allocation2 + $0x30] sm:$0xff] }
 0x1bf   : > { %v1224_v30 = vld [vmem:[#allocation2 + $0x70] sm:$0xff] }
 0x1c1   : > { %1401 = vmatpush1.bf16.msra.mxu0 %v2280_v41  ;;  %2207 = vmatpush1.bf16.msra.mxu1 %v2280_v41  ;;  %v1210_v41 = vld [vmem:[#allocation2 + $0x80] sm:$0xff] }
 0x1c2   : > { %1402 = vmatprep.subr.bf16.mxu0 %v2281_v42  ;;  %2200 = vmatprep.subr.bf16.mxu1 %v2281_v42  ;;  %v1226_v42 = vld [vmem:[#allocation2 + $0xa8] sm:$0xff] }
 0x1c5   : > { %1403 = vmatpush1.bf16.msra.mxu0 %v2283_v44  ;;  %2208 = vmatpush1.bf16.msra.mxu1 %v2283_v44 }
 0x1c6   : > { %1404 = vmatprep.subr.bf16.mxu0 %v2284_v45  ;;  %2201 = vmatprep.subr.bf16.mxu1 %v2284_v45 }
 0x1c9   : > { %1405 = vmatpush1.bf16.msra.mxu0 %v2286_v46  ;;  %2209 = vmatpush1.bf16.msra.mxu1 %v2286_v46 }
 0x1ca   : > { %1406 = vmatprep.subr.bf16.mxu0 %v2287_v48  ;;  %2202 = vmatprep.subr.bf16.mxu1 %v2287_v48 }
 0x1cd   : > { %1407 = vmatpush1.bf16.msra.mxu0 %v2289_v49  ;;  %2210 = vmatpush1.bf16.msra.mxu1 %v2289_v49  ;;  %v1211_v49 = vld [vmem:[#allocation2 + $0x88] sm:$0xff] }
 0x1ce   : > { %1408 = vmatprep.subr.bf16.mxu0 %v2290_v50  ;;  %2203 = vmatprep.subr.bf16.mxu1 %v2290_v50  ;;  %v1227_v50 = vld [vmem:[#allocation2 + $0xd0] sm:$0xff] }
 0x1d1   : > { %1409 = vmatpush1.bf16.msra.mxu0 %v2292_v51  ;;  %2211 = vmatpush1.bf16.msra.mxu1 %v2292_v51 }
 0x1d4   : > { %1427 = vmatmul.mubr.bf16.vlgmr.msra.gmra.mxu0 %v2293_v52  ;;  %1467 = vmatmul.mubr.bf16.vlgmr.msra.gmra.mxu1 %v2294_v53 }
 0x1d5   : > { %1436 = vmatprep.mubr.bf16.mxu0 %v2378_v35  ;;  %1476 = vmatprep.mubr.bf16.mxu1 %v2378_v35 }
 0x1dc   : > { %1437 = vmatmul.mubr.bf16.gmra.mxu0 %v2295_v54  ;;  %1477 = vmatmul.mubr.bf16.gmra.mxu1 %v2296_v55  ;;  %v1212_v55 = vld [vmem:[#allocation2 + $0xe8] sm:$0xff] }
 0x1dd   : > { %1446 = vmatprep.mubr.bf16.mxu0 %v2378_v35  ;;  %1486 = vmatprep.mubr.bf16.mxu1 %v2378_v35 }
 0x1e4   : > { %1447 = vmatmul.mubr.bf16.gmra.mxu0 %v2297_v56  ;;  %1487 = vmatmul.mubr.bf16.gmra.mxu1 %v2298_v57  ;;  %v1228_v56 = vld [vmem:[#allocation2 + $0x10] sm:$0xff] }
 0x1e5   : > { %1456 = vmatprep.mubr.bf16.mxu0 %v2378_v35  ;;  %1496 = vmatprep.mubr.bf16.mxu1 %v2378_v35  ;;  %v1209_v35 = vld [vmem:[#allocation2 + $0x48] sm:$0xff] }
 0x1ec   : > { %1457 = vmatmul.mubr.bf16.gmra.mxu0 %v2299_v58  ;;  %1497 = vmatmul.mubr.bf16.gmra.mxu1 %v2300_v59 }
 0x294   : > { %v1428_v62 = vpop.f32.mrf.mxu0  ;;  %v1468_v63 = vpop.f32.mrf.mxu1 }
 0x295   : > { %v1507_v2 = vadd.f32 %v1428_v62, %v1202_v60  ;;  %v1523_v3 = vadd.f32 %v1468_v63, %v1218_v61  ;;  %v1213_v61 = vld [vmem:[#allocation2 + $0xb8] sm:$0xff]  ;;  %v1229_v62 = vld [vmem:[#allocation2 + $0x28] sm:$0xff] }
 0x296   : > { %v1430_v43 = vpop.f32.mrf.mxu0  ;;  %v1470_v5 = vpop.f32.mrf.mxu1 }
 0x297   : > { %1539 = vst [vmem:[#allocation2 + $0xb0] sm:$0xff] %v1507_v2  ;;  %1555 = vst [vmem:[#allocation2 + $0x38] sm:$0xff] %v1523_v3  ;;  %v1508_v8 = vadd.f32 %v1430_v43, %v1203_v4  ;;  %v1524_v9 = vadd.f32 %v1470_v5, %v1219_v0  ;;  %v1214_v3 = vld [vmem:[#allocation2 + $0x60] sm:$0xff] }
 0x298   : > { %v1432_v10 = vpop.f32.mrf.mxu0  ;;  %v1472_v11 = vpop.f32.mrf.mxu1  ;;  %v1230_v43 = vld [vmem:[#allocation2 + $0xa0] sm:$0xff] }
 0x299   : > { %1540 = vst [vmem:[#allocation2] sm:$0xff] %v1508_v8  ;;  %1556 = vst [vmem:[#allocation2 + $0x58] sm:$0xff] %v1524_v9  ;;  %v1509_v13 = vadd.f32 %v1432_v10, %v1204_v6  ;;  %v1525_v14 = vadd.f32 %v1472_v11, %v1220_v7  ;;  %v1215_v9 = vld [vmem:[#allocation2 + $0xf0] sm:$0xff]  ;;  %v1231_v10 = vld [vmem:[#allocation2 + $0xf8] sm:$0xff] }
 0x29a   : > { %v1434_v15 = vpop.f32.mrf.mxu0  ;;  %v1474_v16 = vpop.f32.mrf.mxu1 }
 0x29b   : > { %1541 = vst [vmem:[#allocation2 + $0xd8] sm:$0xff] %v1509_v13  ;;  %1557 = vst [vmem:[#allocation2 + $0x40] sm:$0xff] %v1525_v14  ;;  %v1510_v19 = vadd.f32 %v1434_v15, %v1205_v12  ;;  %v1526_v20 = vadd.f32 %v1474_v16, %v1221_v47  ;;  %v1216_v14 = vld [vmem:[#allocation2 + $0x8] sm:$0xff]  ;;  %v1232_v15 = vld [vmem:[#allocation2 + $0x20] sm:$0xff] }
 0x29c   : > { %v1438_v21 = vpop.f32.mrf.mxu0  ;;  %v1478_v22 = vpop.f32.mrf.mxu1 }
 0x29d   : > { %1542 = vst [vmem:[#allocation2 + $0x18] sm:$0xff] %v1510_v19  ;;  %1558 = vst [vmem:[#allocation2 + $0xc8] sm:$0xff] %v1526_v20  ;;  %v1511_v25 = vadd.f32 %v1438_v21, %v1206_v17  ;;  %v1527_v26 = vadd.f32 %v1478_v22, %v1222_v18  ;;  %v1217_v20 = vld [vmem:[#allocation2 + $0x78] sm:$0xff] }
 0x29e   : > { %v1440_v27 = vpop.f32.mrf.mxu0  ;;  %v1480_v28 = vpop.f32.mrf.mxu1  ;;  %v1233_v21 = vld [vmem:[#allocation2 + $0x98] sm:$0xff] }
 0x29f   : > { %1543 = vst [vmem:[#allocation2 + $0x50] sm:$0xff] %v1511_v25  ;;  %1559 = vst [vmem:[#allocation2 + $0xe0] sm:$0xff] %v1527_v26  ;;  %v1512_v31 = vadd.f32 %v1440_v27, %v1207_v23  ;;  %v1528_v32 = vadd.f32 %v1480_v28, %v1223_v24 }
 0x2a0   : > { %v1442_v33 = vpop.f32.mrf.mxu0  ;;  %v1482_v34 = vpop.f32.mrf.mxu1 }
 0x2a1   : > { %1544 = vst [vmem:[#allocation2 + $0x68] sm:$0xff] %v1512_v31  ;;  %1560 = vst [vmem:[#allocation2 + $0x90] sm:$0xff] %v1528_v32  ;;  %v1513_v37 = vadd.f32 %v1442_v33, %v1208_v29  ;;  %v1529_v38 = vadd.f32 %v1482_v34, %v1224_v30 }
 0x2a2   : > { %v1444_v39 = vpop.f32.mrf.mxu0  ;;  %v1484_v40 = vpop.f32.mrf.mxu1 }
 0x2a3   : > { %1545 = vst [vmem:[#allocation2 + $0x30] sm:$0xff] %v1513_v37  ;;  %1561 = vst [vmem:[#allocation2 + $0x70] sm:$0xff] %v1529_v38  ;;  %v1514_v44 = vadd.f32 %v1444_v39, %v1209_v35  ;;  %v1530_v45 = vadd.f32 %v1484_v40, %v1225_v36 }
 0x2a4   : > { %v1448_v46 = vpop.f32.mrf.mxu0  ;;  %v1488_v48 = vpop.f32.mrf.mxu1 }
 0x2a5   : > { %1546 = vst [vmem:[#allocation2 + $0x48] sm:$0xff] %v1514_v44  ;;  %1562 = vst [vmem:[#allocation2 + $0xc0] sm:$0xff] %v1530_v45  ;;  %v1515_v51 = vadd.f32 %v1448_v46, %v1210_v41  ;;  %v1531_v52 = vadd.f32 %v1488_v48, %v1226_v42 }
 0x2a6   : > { %v1450_v53 = vpop.f32.mrf.mxu0  ;;  %v1490_v54 = vpop.f32.mrf.mxu1 }
 0x2a7   : > { %1547 = vst [vmem:[#allocation2 + $0x80] sm:$0xff] %v1515_v51  ;;  %1563 = vst [vmem:[#allocation2 + $0xa8] sm:$0xff] %v1531_v52  ;;  %v1516_v57 = vadd.f32 %v1450_v53, %v1211_v49  ;;  %v1532_v58 = vadd.f32 %v1490_v54, %v1227_v50 }
 0x2a8   : > { %v1452_v59 = vpop.f32.mrf.mxu0  ;;  %v1492_v60 = vpop.f32.mrf.mxu1 }
 0x2a9   : > { %1548 = vst [vmem:[#allocation2 + $0x88] sm:$0xff] %v1516_v57  ;;  %1564 = vst [vmem:[#allocation2 + $0xd0] sm:$0xff] %v1532_v58  ;;  %v1517_v63 = vadd.f32 %v1452_v59, %v1212_v55  ;;  %v1533_v4 = vadd.f32 %v1492_v60, %v1228_v56 }
 0x2aa   : > { %v1454_v0 = vpop.f32.mrf.mxu0  ;;  %v1494_v2 = vpop.f32.mrf.mxu1 }
 0x2ab   : > { %1549 = vst [vmem:[#allocation2 + $0xe8] sm:$0xff] %v1517_v63  ;;  %1565 = vst [vmem:[#allocation2 + $0x10] sm:$0xff] %v1533_v4  ;;  %v1518_v5 = vadd.f32 %v1454_v0, %v1213_v61  ;;  %v1534_v6 = vadd.f32 %v1494_v2, %v1229_v62 }
 0x2ac   : > { %v1458_v7 = vpop.f32.mrf.mxu0  ;;  %v1498_v8 = vpop.f32.mrf.mxu1 }
 0x2ad   : > { %1550 = vst [vmem:[#allocation2 + $0xb8] sm:$0xff] %v1518_v5  ;;  %1566 = vst [vmem:[#allocation2 + $0x28] sm:$0xff] %v1534_v6  ;;  %v1519_v11 = vadd.f32 %v1458_v7, %v1214_v3  ;;  %v1535_v12 = vadd.f32 %v1498_v8, %v1230_v43 }
 0x2ae   : > { %v1460_v47 = vpop.f32.mrf.mxu0  ;;  %v1500_v13 = vpop.f32.mrf.mxu1 }
 0x2af   : > { %1551 = vst [vmem:[#allocation2 + $0x60] sm:$0xff] %v1519_v11  ;;  %1567 = vst [vmem:[#allocation2 + $0xa0] sm:$0xff] %v1535_v12  ;;  %v1520_v16 = vadd.f32 %v1460_v47, %v1215_v9  ;;  %v1536_v17 = vadd.f32 %v1500_v13, %v1231_v10 }
 0x2b0   : > { %v1462_v18 = vpop.f32.mrf.mxu0  ;;  %v1502_v19 = vpop.f32.mrf.mxu1 }
 0x2b1   : > { %1552 = vst [vmem:[#allocation2 + $0xf0] sm:$0xff] %v1520_v16  ;;  %1568 = vst [vmem:[#allocation2 + $0xf8] sm:$0xff] %v1536_v17  ;;  %v1521_v22 = vadd.f32 %v1462_v18, %v1216_v14  ;;  %v1537_v23 = vadd.f32 %v1502_v19, %v1232_v15 }
 0x2b2   : > { %v1464_v24 = vpop.f32.mrf.mxu0  ;;  %v1504_v25 = vpop.f32.mrf.mxu1 }
 0x2b3   : > { %1553 = vst [vmem:[#allocation2 + $0x8] sm:$0xff] %v1521_v22  ;;  %1569 = vst [vmem:[#allocation2 + $0x20] sm:$0xff] %v1537_v23  ;;  %v1522_v26 = vadd.f32 %v1464_v24, %v1217_v20  ;;  %v1538_v27 = vadd.f32 %v1504_v25, %v1233_v21 }
 0x2b5   : > { %1554 = vst [vmem:[#allocation2 + $0x78] sm:$0xff] %v1522_v26  ;;  %1570 = vst [vmem:[#allocation2 + $0x98] sm:$0xff] %v1538_v27 }
 0x2b6 PF: > { %v1579_v28 = vld [vmem:[#allocation2 + $0x68] sm:$0xff]  ;;  %v1575_v29 = vld [vmem:[#allocation2] sm:$0xff]  ;;  %v2379_v30 = vmov 0   ;;  %s1690_s8 = sld [smem:[#allocation4 + %s2436_s7]]  ;;  %v1577_v34 = vld [vmem:[#allocation2 + $0x18] sm:$0xff] }
 0x2b7   : > { %2302 = vset.pattern.permute.xlu1 %v2379_v30  ;;  %2301 = vset.pattern.permute.xlu0 %v2379_v30  ;;  %v1695_v31 = vmax.f32 %v1579_v28, 1.0  ;;  %v1693_v32 = vmax.f32 %v1575_v29, 1.0  ;;  %v1581_v33 = vld [vmem:[#allocation2 + $0x48] sm:$0xff]  ;;  %v1585_v35 = vld [vmem:[#allocation2 + $0xb8] sm:$0xff]  ;;  %s1670_s14 = scalar_select %p573_p2, 1, 0 }
 0x2b8   : > { %v1608_v36 = vld [vmem:[%s2467_s20 + $0x10] sm:$0xff]  ;;  %v1696_v37 = vmax.f32 %v1581_v33, 1.0  ;;  %v1694_v38 = vmax.f32 %v1577_v34, 1.0  ;;  %v1583_v39 = vld [vmem:[#allocation2 + $0x88] sm:$0xff]  ;;  %v1606_v40 = vld [vmem:[%s2467_s20] sm:$0xff]  ;;  %v1698_v41 = vmax.f32 %v1585_v35, 1.0 }
 0x2b9   : > { %2303 = vrcp.f32 %v1695_v31  ;;  %v1587_v44 = vld [vmem:[#allocation2 + $0xf0] sm:$0xff]  ;;  %vm1624_vm0 = vcmp.gt.f32.partialorder %v1608_v36, 0.3  ;;  %v1671_v45 = vstv %s1670_s14  ;;  %v1697_v46 = vmax.f32 %v1583_v39, 1.0  ;;  %v1609_v48 = vld [vmem:[%s2467_s20 + $0x18] sm:$0xff]  ;;  %v1593_v50 = vld [vmem:[#allocation2 + $0xc8] sm:$0xff] }
 0x2ba   : > { %2305 = vrcp.f32 %v1693_v32  ;;  %vm1622_vm1 = vcmp.gt.f32.partialorder %v1606_v40, 0.3  ;;  %v1699_v51 = vmax.f32 %v1587_v44, 1.0  ;;  %v1591_v52 = vld [vmem:[#allocation2 + $0x58] sm:$0xff]  ;;  %v2158_v53 = vsel %vm1624_vm0, 1.0, %v2375_v1  ;;  %v1607_v55 = vld [vmem:[%s2467_s20 + $0x8] sm:$0xff] }
 0x2bb   : > { %2307 = vrcp.f32 %v1696_v37  ;;  %vm2705_vm2 = vcmp.eq.s32.totalorder %v1671_v45, 1  ;;  %v2156_v56 = vsel %vm1622_vm1, 1.0, %v2375_v1  ;;  %vm1625_vm3 = vcmp.gt.f32.partialorder %v1609_v48, 0.3  ;;  %v1597_v58 = vld [vmem:[#allocation2 + $0xc0] sm:$0xff]  ;;  %v1611_v59 = vld [vmem:[%s2467_s20 + $0x28] sm:$0xff] }
 0x2bc   : > { %v1589_v42 = vld [vmem:[#allocation2 + $0x78] sm:$0xff]  ;;  %p1691_p5 = scmp.eq.s32.totalorder %s1690_s8, 0  ;;  %2309 = vrcp.f32 %v1694_v38  ;;  %v1702_v57 = vmax.f32 %v1593_v50, 1.0  ;;  %v1610_v60 = vld [vmem:[%s2467_s20 + $0x20] sm:$0xff]  ;;  %v1701_v61 = vmax.f32 %v1591_v52, 1.0  ;;  %v1595_v62 = vld [vmem:[#allocation2 + $0x90] sm:$0xff] }
 0x2bd   : > { %2311 = vrcp.f32 %v1698_v41  ;;  %v1700_v49 = vmax.f32 %v1589_v42, 1.0  ;;  %v1675_v63 = vsel %vm2705_vm2, %v2158_v53, 1.0  ;;  %vm1623_vm4 = vcmp.gt.f32.partialorder %v1607_v55, 0.3  ;;  %v1601_v0 = vld [vmem:[#allocation2 + $0x28] sm:$0xff]  ;;  %v1599_v7 = vld [vmem:[#allocation2 + $0xd0] sm:$0xff] }
 0x2be   : > { %s1692_s7 = scalar_select %p1691_p5, 0.14285715, 1.0  ;;  %2313 = vrcp.f32 %v1697_v46  ;;  %v1673_v2 = vsel %vm2705_vm2, %v2156_v56, 1.0  ;;  %v2159_v3 = vsel %vm1625_vm3, 1.0, %v2375_v1  ;;  %v1704_v43 = vmax.f32 %v1597_v58, 1.0 }
 0x2bf   : > { %2315 = vrcp.f32 %v1700_v49  ;;  %vm1627_vm5 = vcmp.gt.f32.partialorder %v1611_v59, 0.3  ;;  %vm1626_vm6 = vcmp.gt.f32.partialorder %v1610_v60, 0.3  ;;  %v1703_v6 = vmax.f32 %v1595_v62, 1.0  ;;  %v1613_v11 = vld [vmem:[%s2467_s20 + $0x38] sm:$0xff] }
 0x2c0   : > { %2317 = vrcp.f32 %v1699_v51  ;;  %v2715_v4 = vstv %s1692_s7  ;;  %v2157_v10 = vsel %vm1623_vm4, 1.0, %v2375_v1  ;;  %v1706_v12 = vmax.f32 %v1601_v0, 1.0  ;;  %v1612_v13 = vld [vmem:[%s2467_s20 + $0x30] sm:$0xff]  ;;  %v1605_v14 = vld [vmem:[#allocation2 + $0x98] sm:$0xff]  ;;  %v1615_v26 = vld [vmem:[%s2467_s20 + $0x48] sm:$0xff] }
 0x2c1   : > { %2319 = vrcp.f32 %v1702_v57  ;;  %v2161_v16 = vsel %vm1627_vm5, 1.0, %v2375_v1  ;;  %v2160_v17 = vsel %vm1626_vm6, 1.0, %v2375_v1  ;;  %v1705_v18 = vmax.f32 %v1599_v7, 1.0  ;;  %v1603_v23 = vld [vmem:[#allocation2 + $0xf8] sm:$0xff]  ;;  %v1614_v32 = vld [vmem:[%s2467_s20 + $0x40] sm:$0xff]  ;;  %v1616_v51 = vld [vmem:[%s2467_s20 + $0x50] sm:$0xff] }
 0x2c2   : > { %2321 = vrcp.f32 %v1701_v61  ;;  %v1676_v21 = vsel %vm2705_vm2, %v2159_v3, 1.0  ;;  %v1674_v22 = vsel %vm2705_vm2, %v2157_v10, 1.0  ;;  %vm1629_vm7 = vcmp.gt.f32.partialorder %v1613_v11, 0.3  ;;  %v1617_v46 = vld [vmem:[%s2467_s20 + $0x58] sm:$0xff]  ;;  %v1619_v60 = vld [vmem:[%s2467_s20 + $0x68] sm:$0xff] }
 0x2c3   : > { %2323 = vrcp.f32 %v1704_v43  ;;  %vm1628_vm8 = vcmp.gt.f32.partialorder %v1612_v13, 0.3  ;;  %v1708_v27 = vmax.f32 %v1605_v14, 1.0  ;;  %v1678_v30 = vsel %vm2705_vm2, %v2161_v16, 1.0  ;;  %v1620_v13 = vld [vmem:[%s2467_s20 + $0x70] sm:$0xff] }
 0x2c4   : > { %2325 = vrcp.f32 %v1703_v6  ;;  %v1677_v31 = vsel %vm2705_vm2, %v2160_v17, 1.0  ;;  %v2163_v36 = vsel %vm1629_vm7, 1.0, %v2375_v1  ;;  %v1707_v37 = vmax.f32 %v1603_v23, 1.0  ;;  %v1580_v54 = vld [vmem:[#allocation2 + $0x30] sm:$0xff] }
 0x2c5   : > { %2327 = vrcp.f32 %v1706_v12  ;;  %v2162_v41 = vsel %vm1628_vm8, 1.0, %v2375_v1  ;;  %vm1631_vm9 = vcmp.gt.f32.partialorder %v1615_v26, 0.3  ;;  %vm1630_vm10 = vcmp.gt.f32.partialorder %v1614_v32, 0.3 }
 0x2c6   : > { %v2304_v5 = vpop.eup %2303  ;;  %2329 = vrcp.f32 %v1705_v18  ;;  %v1680_v49 = vsel %vm2705_vm2, %v2163_v36, 1.0  ;;  %v1679_v53 = vsel %vm2705_vm2, %v2162_v41, 1.0  ;;  %v2165_v55 = vsel %vm1631_vm9, 1.0, %v2375_v1  ;;  %v1574_v36 = vld [vmem:[#allocation2 + $0xb0] sm:$0xff] }
 0x2c7   : > { %v2306_v8 = vpop.eup %2305  ;;  %v1715_v9 = vmul.f32 %v2304_v5, %v2715_v4  ;;  %2331 = vrcp.f32 %v1708_v27  ;;  %v2164_v57 = vsel %vm1630_vm10, 1.0, %v2375_v1  ;;  %vm1633_vm11 = vcmp.gt.f32.partialorder %v1617_v46, 0.3  ;;  %v1761_v46 = vld [vmem:[%s2472_s24 + $0x18] sm:$0xff] }
 0x2c8   : > { %v1711_v47 = vmul.f32 %v2306_v8, %v2715_v4  ;;  %v2308_v19 = vpop.eup %2307  ;;  %2333 = vrcp.f32 %v1707_v37  ;;  %vm1632_vm12 = vcmp.gt.f32.partialorder %v1616_v51, 0.3  ;;  %v1681_v43 = vsel %vm2705_vm2, %v2164_v57, 1.0  ;;  %v1760_v37 = vld [vmem:[%s2472_s24 + $0x10] sm:$0xff] }
 0x2c9   : > { %v1744_v15 = vmul.f32 %v1715_v9, %v1675_v63  ;;  %v2310_v24 = vpop.eup %2309  ;;  %v1717_v25 = vmul.f32 %v2308_v19, %v2715_v4  ;;  %v1682_v63 = vsel %vm2705_vm2, %v2165_v55, 1.0  ;;  %v2167_v5 = vsel %vm1633_vm11, 1.0, %v2375_v1  ;;  %v1621_v9 = vld [vmem:[%s2467_s20 + $0x78] sm:$0xff] }
 0x2ca   : > { %v1742_v20 = vmul.f32 %v1711_v47, %v1673_v2  ;;  %v2312_v28 = vpop.eup %2311  ;;  %v1713_v29 = vmul.f32 %v2310_v24, %v2715_v4  ;;  %v1618_v2 = vld [vmem:[%s2467_s20 + $0x60] sm:$0xff]  ;;  %v2166_v6 = vsel %vm1632_vm12, 1.0, %v2375_v1  ;;  %vm1635_vm13 = vcmp.gt.f32.partialorder %v1619_v60, 0.3 }
 0x2cb   : > { %1786 = vperm.xlu1 %2302, %v1744_v15   ;;  %v2314_v33 = vpop.eup %2313  ;;  %v1745_v34 = vmul.f32 %v1717_v25, %v1676_v21  ;;  %v1721_v35 = vmul.f32 %v2312_v28, %v2715_v4  ;;  %vm1634_vm14 = vcmp.gt.f32.partialorder %v1618_v2, 0.3  ;;  %v1684_v12 = vsel %vm2705_vm2, %v2167_v5, 1.0  ;;  %v1765_v5 = vld [vmem:[%s2472_s24 + $0x38] sm:$0xff] }
 0x2cc   : > { %1776 = vperm.xlu0 %2301, %v1742_v20   ;;  %v2316_v38 = vpop.eup %2315  ;;  %v1743_v39 = vmul.f32 %v1713_v29, %v1674_v22  ;;  %v1719_v40 = vmul.f32 %v2314_v33, %v2715_v4  ;;  %v1683_v15 = vsel %vm2705_vm2, %v2166_v6, 1.0  ;;  %v2169_v16 = vsel %vm1635_vm13, 1.0, %v2375_v1 }
 0x2cd   : > { %v2318_v42 = vpop.eup %2317  ;;  %v1747_v44 = vmul.f32 %v1721_v35, %v1678_v30  ;;  %v1725_v45 = vmul.f32 %v2316_v38, %v2715_v4  ;;  %v2168_v17 = vsel %vm1634_vm14, 1.0, %v2375_v1  ;;  %vm1637_vm15 = vcmp.gt.f32.partialorder %v1621_v9, 0.3  ;;  %v1578_v35 = vld [vmem:[#allocation2 + $0x50] sm:$0xff] }
 0x2ce   : > { %v1746_v48 = vmul.f32 %v1719_v40, %v1677_v31  ;;  %v1723_v50 = vmul.f32 %v2318_v42, %v2715_v4  ;;  %v2320_v52 = vpop.eup %2319  ;;  %vm1636_vm0 = vcmp.gt.f32.partialorder %v1620_v13, 0.3  ;;  %v1686_v22 = vsel %vm2705_vm2, %v2169_v16, 1.0  ;;  %v1758_v40 = vld [vmem:[%s2472_s24] sm:$0xff] }
 0x2cf   : > { %1791 = vperm.xlu1 %2302, %v1745_v34   ;;  %v2322_v56 = vpop.eup %2321  ;;  %v1749_v58 = vmul.f32 %v1725_v45, %v1680_v49  ;;  %v1729_v59 = vmul.f32 %v2320_v52, %v2715_v4  ;;  %v1685_v25 = vsel %vm2705_vm2, %v2168_v17, 1.0  ;;  %v2171_v26 = vsel %vm1637_vm15, 1.0, %v2375_v1  ;;  %v1766_v17 = vld [vmem:[%s2472_s24 + $0x40] sm:$0xff] }
 0x2d0   : > { %1781 = vperm.xlu0 %2301, %v1743_v39   ;;  %v2324_v61 = vpop.eup %2323  ;;  %v1748_v62 = vmul.f32 %v1723_v50, %v1679_v53  ;;  %v1727_v0 = vmul.f32 %v2322_v56, %v2715_v4  ;;  %v2170_v27 = vsel %vm1636_vm0, 1.0, %v2375_v1  ;;  %v1688_v31 = vsel %vm2705_vm2, %v2171_v26, 1.0  ;;  %v1759_v50 = vld [vmem:[%s2472_s24 + $0x8] sm:$0xff]  ;;  %v1582_v56 = vld [vmem:[#allocation2 + $0x80] sm:$0xff] }
 0x2d1   : > { %v2326_v3 = vpop.eup %2325  ;;  %v1751_v7 = vmul.f32 %v1729_v59, %v1682_v63  ;;  %v1733_v8 = vmul.f32 %v2324_v61, %v2715_v4  ;;  %v1687_v33 = vsel %vm2705_vm2, %v2170_v27, 1.0  ;;  %v1584_v53 = vld [vmem:[#allocation2 + $0xe8] sm:$0xff]  ;;  %v1762_v61 = vld [vmem:[%s2472_s24 + $0x20] sm:$0xff]  ;;  %v1768_v27 = vld [vmem:[%s2472_s24 + $0x50] sm:$0xff] }
 0x2d2   : > { %v2328_v10 = vpop.eup %2327  ;;  %v1750_v11 = vmul.f32 %v1727_v0, %v1681_v43  ;;  %v1731_v47 = vmul.f32 %v2326_v3, %v2715_v4  ;;  %v1588_v0 = vld [vmem:[#allocation2 + $0x8] sm:$0xff]  ;;  %v1586_v3 = vld [vmem:[#allocation2 + $0x60] sm:$0xff] }
 0x2d3   : > { %1801 = vperm.xlu1 %2302, %v1747_v44   ;;  %v2330_v14 = vpop.eup %2329  ;;  %v1753_v18 = vmul.f32 %v1733_v8, %v1684_v12  ;;  %v1737_v19 = vmul.f32 %v2328_v10, %v2715_v4  ;;  %v1576_v44 = vld [vmem:[#allocation2 + $0xd8] sm:$0xff]  ;;  %v1764_v8 = vld [vmem:[%s2472_s24 + $0x30] sm:$0xff] }
 0x2d4   : > { %1796 = vperm.xlu0 %2301, %v1746_v48   ;;  %v2332_v20 = vpop.eup %2331  ;;  %v1752_v21 = vmul.f32 %v1731_v47, %v1683_v15  ;;  %v1735_v23 = vmul.f32 %v2330_v14, %v2715_v4  ;;  %v1590_v47 = vld [vmem:[#allocation2 + $0x38] sm:$0xff]  ;;  %v1767_v14 = vld [vmem:[%s2472_s24 + $0x48] sm:$0xff] }
 0x2d5   : > { %v2334_v24 = vpop.eup %2333  ;;  %v1755_v28 = vmul.f32 %v1737_v19, %v1686_v22  ;;  %v1741_v29 = vmul.f32 %v2332_v20, %v2715_v4  ;;  %v1596_v20 = vld [vmem:[#allocation2 + $0x70] sm:$0xff]  ;;  %v1594_v22 = vld [vmem:[#allocation2 + $0xe0] sm:$0xff] }
 0x2d6   : > { %v1754_v30 = vmul.f32 %v1735_v23, %v1685_v25  ;;  %v1739_v32 = vmul.f32 %v2334_v24, %v2715_v4  ;;  %v1769_v24 = vld [vmem:[%s2472_s24 + $0x58] sm:$0xff] }
 0x2d7   : > { %1811 = vperm.xlu1 %2302, %v1749_v58   ;;  %v1757_v34 = vmul.f32 %v1741_v29, %v1688_v31  ;;  %v1763_v58 = vld [vmem:[%s2472_s24 + $0x28] sm:$0xff] }
 0x2d8   : > { %1806 = vperm.xlu0 %2301, %v1748_v62   ;;  %v1756_v1 = vmul.f32 %v1739_v32, %v1687_v33  ;;  %v1598_v32 = vld [vmem:[#allocation2 + $0xa8] sm:$0xff] }
 0x2db   : > { %1821 = vperm.xlu1 %2302, %v1751_v7  }
 0x2dc   : > { %1816 = vperm.xlu0 %2301, %v1750_v11   ;;  %v1592_v11 = vld [vmem:[#allocation2 + $0x40] sm:$0xff] }
 0x2df   : > { %1831 = vperm.xlu1 %2302, %v1753_v18  }
 0x2e0   : > { %1826 = vperm.xlu0 %2301, %v1752_v21  }
 0x2e3   : > { %1841 = vperm.xlu1 %2302, %v1755_v28  }
 0x2e4   : > { %1836 = vperm.xlu0 %2301, %v1754_v30   ;;  %v1600_v30 = vld [vmem:[#allocation2 + $0x10] sm:$0xff] }
 0x2e7   : > { %1851 = vperm.xlu1 %2302, %v1757_v34   ;;  %v1771_v34 = vld [vmem:[%s2472_s24 + $0x68] sm:$0xff] }
 0x2e8   : > { %1846 = vperm.xlu0 %2301, %v1756_v1  }
 0x346   : > { %v1787_v38 = vpop.permute.xlu1 %1786 }
 0x347   : > { %v1856_v39 = vmul.f32 %v1787_v38, %v1578_v35  ;;  %v1777_v4 = vpop.permute.xlu0 %1776 }
 0x348   : > { %v1854_v41 = vmul.f32 %v1777_v4, %v1574_v36  ;;  %v1770_v36 = vld [vmem:[%s2472_s24 + $0x60] sm:$0xff] }
 0x349   : > { %v1872_v42 = vadd.f32 %v1856_v39, %v1760_v37  ;;  %v1604_v39 = vld [vmem:[#allocation2 + $0x20] sm:$0xff] }
 0x34a   : > { %v1870_v45 = vadd.f32 %v1854_v41, %v1758_v40  ;;  %v1792_v48 = vpop.permute.xlu1 %1791  ;;  %v1602_v4 = vld [vmem:[#allocation2 + $0xa0] sm:$0xff] }
 0x34b   : > { %1888 = vst [vmem:[%s2472_s24 + $0x10] sm:$0xff] %v1872_v42  ;;  %v1857_v49 = vmul.f32 %v1792_v48, %v1580_v54  ;;  %v1782_v51 = vpop.permute.xlu0 %1781  ;;  %v1773_v54 = vld [vmem:[%s2472_s24 + $0x78] sm:$0xff] }
 0x34c   : > { %1886 = vst [vmem:[%s2472_s24] sm:$0xff] %v1870_v45  ;;  %v1855_v52 = vmul.f32 %v1782_v51, %v1576_v44  ;;  %v1772_v45 = vld [vmem:[%s2472_s24 + $0x70] sm:$0xff] }
 0x34d   : > { %v1873_v55 = vadd.f32 %v1857_v49, %v1761_v46 }
 0x34e   : > { %v1871_v57 = vadd.f32 %v1855_v52, %v1759_v50  ;;  %v1802_v59 = vpop.permute.xlu1 %1801 }
 0x34f   : > { %1889 = vst [vmem:[%s2472_s24 + $0x18] sm:$0xff] %v1873_v55  ;;  %v1859_v60 = vmul.f32 %v1802_v59, %v1584_v53  ;;  %v1797_v62 = vpop.permute.xlu0 %1796 }
 0x350   : > { %1887 = vst [vmem:[%s2472_s24 + $0x8] sm:$0xff] %v1871_v57  ;;  %v1858_v63 = vmul.f32 %v1797_v62, %v1582_v56 }
 0x351   : > { %v1875_v2 = vadd.f32 %v1859_v60, %v1763_v58 }
 0x352   : > { %v1874_v43 = vadd.f32 %v1858_v63, %v1762_v61  ;;  %v1812_v6 = vpop.permute.xlu1 %1811 }
 0x353   : > { %1891 = vst [vmem:[%s2472_s24 + $0x28] sm:$0xff] %v1875_v2  ;;  %v1861_v7 = vmul.f32 %v1812_v6, %v1588_v0  ;;  %v1807_v9 = vpop.permute.xlu0 %1806 }
 0x354   : > { %1890 = vst [vmem:[%s2472_s24 + $0x20] sm:$0xff] %v1874_v43  ;;  %v1860_v10 = vmul.f32 %v1807_v9, %v1586_v3 }
 0x355   : > { %v1877_v12 = vadd.f32 %v1861_v7, %v1765_v5 }
 0x356   : > { %v1876_v13 = vadd.f32 %v1860_v10, %v1764_v8  ;;  %v1822_v15 = vpop.permute.xlu1 %1821 }
 0x357   : > { %1893 = vst [vmem:[%s2472_s24 + $0x38] sm:$0xff] %v1877_v12  ;;  %v1863_v16 = vmul.f32 %v1822_v15, %v1592_v11  ;;  %v1817_v18 = vpop.permute.xlu0 %1816 }
 0x358   : > { %1892 = vst [vmem:[%s2472_s24 + $0x30] sm:$0xff] %v1876_v13  ;;  %v1862_v19 = vmul.f32 %v1817_v18, %v1590_v47 }
 0x359   : > { %v1879_v21 = vadd.f32 %v1863_v16, %v1767_v14 }
 0x35a   : > { %v1878_v23 = vadd.f32 %v1862_v19, %v1766_v17  ;;  %v1832_v25 = vpop.permute.xlu1 %1831 }
 0x35b   : > { %1895 = vst [vmem:[%s2472_s24 + $0x48] sm:$0xff] %v1879_v21  ;;  %v1865_v26 = vmul.f32 %v1832_v25, %v1596_v20  ;;  %v1827_v28 = vpop.permute.xlu0 %1826 }
 0x35c   : > { %1894 = vst [vmem:[%s2472_s24 + $0x40] sm:$0xff] %v1878_v23  ;;  %v1864_v29 = vmul.f32 %v1827_v28, %v1594_v22 }
 0x35d   : > { %v1881_v31 = vadd.f32 %v1865_v26, %v1769_v24 }
 0x35e   : > { %v1880_v33 = vadd.f32 %v1864_v29, %v1768_v27  ;;  %v1842_v1 = vpop.permute.xlu1 %1841 }
 0x35f   : > { %1897 = vst [vmem:[%s2472_s24 + $0x58] sm:$0xff] %v1881_v31  ;;  %v1867_v35 = vmul.f32 %v1842_v1, %v1600_v30  ;;  %v1837_v37 = vpop.permute.xlu0 %1836 }
 0x360   : > { %1896 = vst [vmem:[%s2472_s24 + $0x50] sm:$0xff] %v1880_v33  ;;  %v1866_v38 = vmul.f32 %v1837_v37, %v1598_v32 }
 0x361   : > { %v1883_v40 = vadd.f32 %v1867_v35, %v1771_v34 }
 0x362   : > { %v1882_v41 = vadd.f32 %v1866_v38, %v1770_v36  ;;  %v1852_v42 = vpop.permute.xlu1 %1851 }
 0x363   : > { %1899 = vst [vmem:[%s2472_s24 + $0x68] sm:$0xff] %v1883_v40  ;;  %v1869_v44 = vmul.f32 %v1852_v42, %v1604_v39  ;;  %v1847_v46 = vpop.permute.xlu0 %1846 }
 0x364   : > { %1898 = vst [vmem:[%s2472_s24 + $0x60] sm:$0xff] %v1882_v41  ;;  %v1868_v48 = vmul.f32 %v1847_v46, %v1602_v4 }
 0x365   : > { %v1885_v49 = vadd.f32 %v1869_v44, %v1773_v54 }
 0x366   : > { %v1884_v50 = vadd.f32 %v1868_v48, %v1772_v45 }
 0x367   : > { %1901 = vst [vmem:[%s2472_s24 + $0x78] sm:$0xff] %v1885_v49 }
 0x368   : > { %1900 = vst [vmem:[%s2472_s24 + $0x70] sm:$0xff] %v1884_v50 }
 0x369 PF: > { %s22_s28 = sadd.s32 1, %s2371_s28   ;;  %s2856_s26 = smov %s2367_s27 }
 0x36a   : > { %p19_p6 = scmp.ge.s32.totalorder %s22_s28, 13   ;;  %s2857_s27 = smov %s2859_s0 }
 0x36c   :  { %21 = sbr.rel (!%p19_p6) target bundleno = 17 (0x11), region = 102 }

</bundles_post_ra>
